<compile_context>
chip_gen: v6e
topology: v6e:2x2x1
jax: 0.10.0
libtpu: 0.0.40
codegen_flags: <defaults>
</compile_context>

<pallas_src>
import functools
import math

import jax
import jax.numpy as jnp
from jax.experimental import pallas as pl
from jax.experimental.pallas import tpu as pltpu


def _swin_block_kernel(x_ref, bias_ref, wqkv_ref, bqkv_ref, wo_ref, bo_ref,
                       gamma_ref, beta_ref, o_ref, *, num_heads, eps):
    # x block: (L, Bt, E) -- native (seq, batch, embed) layout, Bt sequences per step.
    xblk = x_ref[...]
    L, Bt, E = xblk.shape
    H = num_heads
    hd = E // H
    R = L * Bt

    # (L, Bt, E) -> (R, E); rows ordered (l, b).  Leading-dim merge only: free.
    x2d = xblk.reshape(R, E)
    x_f32 = x2d.astype(jnp.float32)

    # ---- fused QKV projection: bf16 MXU operands, f32 accumulation -----------
    # (Q columns of w_qkv / b_qkv were pre-scaled by 1/sqrt(hd) in the wrapper.)
    qkv = jnp.dot(x2d.astype(jnp.bfloat16), wqkv_ref[...],
                  preferred_element_type=jnp.float32)
    qkv = qkv + bqkv_ref[...].astype(jnp.float32)            # (R, 3E) f32

    bias = bias_ref[...]     # (R, R): 0 within a batch element, -1e9 across.

    # ---- attention: one (R x R) masked matmul per head covers all Bt seqs ----
    ctx_heads = []
    for h in range(H):                                        # static loop, H small
        lo = h * hd
        q_h = qkv[:, lo:lo + hd].astype(jnp.bfloat16)             # (R, hd)
        k_h = qkv[:, E + lo:E + lo + hd].astype(jnp.bfloat16)     # (R, hd)
        v_h = qkv[:, 2 * E + lo:2 * E + lo + hd].astype(jnp.bfloat16)

        # q @ k^T via contraction over both minor dims (no explicit transpose).
        s = jax.lax.dot_general(q_h, k_h, (((1,), (1,)), ((), ())),
                                preferred_element_type=jnp.float32)  # (R, R)
        s = s + bias                                                 # block-diag mask
        s = s - jnp.max(s, axis=-1, keepdims=True)
        p = jnp.exp(s)
        denom = jnp.sum(p, axis=-1, keepdims=True)                   # (R, 1)
        ctx = jnp.dot(p.astype(jnp.bfloat16), v_h,
                      preferred_element_type=jnp.float32)            # (R, hd)
        # Deferred softmax normalization on the EUP (approx reciprocal).
        ctx = ctx * pl.reciprocal(denom, approx=True)
        ctx_heads.append(ctx.astype(jnp.bfloat16))

    ctx_all = jnp.concatenate(ctx_heads, axis=-1)                    # (R, E) bf16

    # ---- output projection + residual + LayerNorm (f32) ----------------------
    attn_out = jnp.dot(ctx_all, wo_ref[...],
                       preferred_element_type=jnp.float32)           # (R, E)
    attn_out = attn_out + bo_ref[...].astype(jnp.float32)

    y = x_f32 + attn_out
    mean = jnp.mean(y, axis=-1, keepdims=True)
    var = jnp.mean((y - mean) ** 2, axis=-1, keepdims=True)
    y = (y - mean) * jax.lax.rsqrt(var + eps)
    y = y * gamma_ref[...].astype(jnp.float32) + beta_ref[...].astype(jnp.float32)

    o_ref[...] = y.reshape(L, Bt, E).astype(o_ref.dtype)


def _choose_batch_tile(N, L, target_rows=256):
    """Batch elements packed per grid step.

    Prefers sublane-aligned tiles (Bt % 8 == 0 => free reshape to the flat slab)
    and keeping >= 2 grid steps (both v7x TensorCores get work), while aiming
    for Bt*L around `target_rows` MXU rows.
    """
    cands = [d for d in range(1, N + 1) if N % d == 0 and (d % 8 == 0 or d == N)]
    multi = [d for d in cands if N // d >= 2] or cands
    fit = [d for d in multi if d * L <= max(target_rows, L)] or [min(multi)]
    return max(fit)


def swin_transformer_block(x, params, *, num_heads, eps=1e-5, target_rows=256):
    """x: (L, N, E) — same layout as torch nn.MultiheadAttention (batch_first=False)."""
    L, N, E = x.shape
    assert E % num_heads == 0
    hd = E // num_heads
    Bt = _choose_batch_tile(N, L, target_rows)
    assert N % Bt == 0
    R = L * Bt

    # bf16 MXU weights; fold the 1/sqrt(hd) query scale into the Q columns.
    scale = 1.0 / math.sqrt(hd)
    q_scale = jnp.concatenate(
        [jnp.full((E,), scale, jnp.float32), jnp.ones((2 * E,), jnp.float32)])
    w_qkv = (params["w_qkv"] * q_scale[None, :]).astype(jnp.bfloat16)  # (E, 3E)
    b_qkv = params["b_qkv"] * q_scale[None, :]                         # (1, 3E)
    w_out = params["w_out"].astype(jnp.bfloat16)                       # (E, E)
    b_out = params["b_out"]                                            # (1, E)
    gamma = params["ln_gamma"]                                         # (1, E)
    beta = params["ln_beta"]                                           # (1, E)

    # Additive attention bias: rows ordered (l, b) -> 0 within one batch
    # element, -1e9 across, so one (R, R) matmul per head handles all Bt
    # packed sequences.
    b_idx = jnp.arange(R, dtype=jnp.int32) % Bt
    attn_bias = jnp.where(b_idx[:, None] == b_idx[None, :],
                          jnp.float32(0.0), jnp.float32(-1e9))

    kernel = functools.partial(_swin_block_kernel, num_heads=num_heads, eps=eps)

    return pl.pallas_call(
        kernel,
        out_shape=jax.ShapeDtypeStruct((L, N, E), x.dtype),
        grid_spec=pltpu.PrefetchScalarGridSpec(
            num_scalar_prefetch=0,
            grid=(N // Bt,),
            in_specs=[
                pl.BlockSpec((L, Bt, E), lambda b: (0, b, 0)),   # x (native layout)
                pl.BlockSpec((R, R), lambda b: (0, 0)),          # attention bias
                pl.BlockSpec((E, 3 * E), lambda b: (0, 0)),      # w_qkv (bf16, Q pre-scaled)
                pl.BlockSpec((1, 3 * E), lambda b: (0, 0)),      # b_qkv
                pl.BlockSpec((E, E), lambda b: (0, 0)),          # w_out (bf16)
                pl.BlockSpec((1, E), lambda b: (0, 0)),          # b_out
                pl.BlockSpec((1, E), lambda b: (0, 0)),          # ln_gamma
                pl.BlockSpec((1, E), lambda b: (0, 0)),          # ln_beta
            ],
            out_specs=pl.BlockSpec((L, Bt, E), lambda b: (0, b, 0)),
        ),
        compiler_params=pltpu.CompilerParams(
            dimension_semantics=("parallel",)),
    )(x, attn_bias, w_qkv, b_qkv, w_out, b_out, gamma, beta)


def reference_block(x, params, *, num_heads, eps=1e-5):
    """Pure-JAX (f32) reference matching torch.nn.MultiheadAttention + LayerNorm."""
    L, N, E = x.shape
    hd = E // num_heads
    xb = jnp.transpose(x, (1, 0, 2))                        # (N, L, E)
    qkv = xb @ params["w_qkv"] + params["b_qkv"][0]
    q, k, v = qkv[..., :E], qkv[..., E:2 * E], qkv[..., 2 * E:]

    def split_heads(t):
        return jnp.transpose(t.reshape(N, L, num_heads, hd), (0, 2, 1, 3))

    qh, kh, vh = split_heads(q), split_heads(k), split_heads(v)
    s = jnp.einsum("bhqd,bhkd->bhqk", qh * (1.0 / math.sqrt(hd)), kh)
    p = jax.nn.softmax(s, axis=-1)
    a = jnp.einsum("bhqk,bhkd->bhqd", p, vh)
    a = jnp.transpose(a, (0, 2, 1, 3)).reshape(N, L, E)
    attn_out = a @ params["w_out"] + params["b_out"][0]
    y = xb + attn_out
    mean = jnp.mean(y, axis=-1, keepdims=True)
    var = jnp.mean((y - mean) ** 2, axis=-1, keepdims=True)
    y = (y - mean) / jnp.sqrt(var + eps)
    y = y * params["ln_gamma"][0] + params["ln_beta"][0]
    return jnp.transpose(y, (1, 0, 2))


def init_params(key, embed_dim):
    k1, k2, k3, k4 = jax.random.split(key, 4)
    bound = 1.0 / math.sqrt(embed_dim)
    return {
        # stored pre-transposed: q|k|v = x @ w_qkv + b_qkv
        "w_qkv": jax.random.uniform(k1, (embed_dim, 3 * embed_dim),
                                    jnp.float32, -bound, bound),
        "b_qkv": jax.random.uniform(k2, (1, 3 * embed_dim),
                                    jnp.float32, -bound, bound),
        "w_out": jax.random.uniform(k3, (embed_dim, embed_dim),
                                    jnp.float32, -bound, bound),
        "b_out": jax.random.uniform(k4, (1, embed_dim),
                                    jnp.float32, -bound, bound),
        # LayerNorm default init (ones / zeros)
        "ln_gamma": jnp.ones((1, embed_dim), jnp.float32),
        "ln_beta": jnp.zeros((1, embed_dim), jnp.float32),
    }


if __name__ == "__main__":
    SEQ, BATCH, EMBED, HEADS = 16, 16, 32, 4   # Bt=8 seqs/step -> 128 MXU rows, grid=2

    key = jax.random.PRNGKey(0)
    kx, kp = jax.random.split(key)
    x = jax.random.normal(kx, (SEQ, BATCH, EMBED), jnp.float32)
    params = init_params(kp, EMBED)

    out = jax.block_until_ready(swin_transformer_block(x, params, num_heads=HEADS))
    ref = reference_block(x, params, num_heads=HEADS)

    assert out.shape == (SEQ, BATCH, EMBED)
    max_err = float(jnp.max(jnp.abs(out - ref)))
    # bf16 MXU operands (f32 accumulation) -> looser tolerance than pure f32.
    assert max_err < 5e-2, f"mismatch vs reference, max|err|={max_err}"
    print("KERNEL_OK")
</pallas_src>

<mosaic_0001>
module attributes {stable_mosaic.version = 11 : i64} {
  func.func @_swin_block_kernel(%arg0: i32, %arg1: memref<16x8x32xf32, #tpu.memory_space<vmem>>, %arg2: memref<128x128xf32, #tpu.memory_space<vmem>>, %arg3: memref<32x96xbf16, #tpu.memory_space<vmem>>, %arg4: memref<1x96xf32, #tpu.memory_space<vmem>>, %arg5: memref<32x32xbf16, #tpu.memory_space<vmem>>, %arg6: memref<1x32xf32, #tpu.memory_space<vmem>>, %arg7: memref<1x32xf32, #tpu.memory_space<vmem>>, %arg8: memref<1x32xf32, #tpu.memory_space<vmem>>, %arg9: memref<16x8x32xf32, #tpu.memory_space<vmem>>) attributes {dimension_semantics = [#tpu.dimension_semantics<parallel>], iteration_bounds = array<i64: 2>, scalar_prefetch = 0 : i64, scratch_operands = 0 : i64, tpu.core_type = #tpu.core_type<tc>, window_params = [{transform_indices = @transform_0, window_bounds = array<i64: 16, 8, 32>}, {pipeline_mode = #tpu.pipeline_mode<synchronous>, transform_indices = @transform_1, window_bounds = array<i64: 128, 128>}, {pipeline_mode = #tpu.pipeline_mode<synchronous>, transform_indices = @transform_2, window_bounds = array<i64: 32, 96>}, {pipeline_mode = #tpu.pipeline_mode<synchronous>, transform_indices = @transform_3, window_bounds = array<i64: 1, 96>}, {pipeline_mode = #tpu.pipeline_mode<synchronous>, transform_indices = @transform_4, window_bounds = array<i64: 32, 32>}, {pipeline_mode = #tpu.pipeline_mode<synchronous>, transform_indices = @transform_5, window_bounds = array<i64: 1, 32>}, {pipeline_mode = #tpu.pipeline_mode<synchronous>, transform_indices = @transform_6, window_bounds = array<i64: 1, 32>}, {pipeline_mode = #tpu.pipeline_mode<synchronous>, transform_indices = @transform_7, window_bounds = array<i64: 1, 32>}, {transform_indices = @transform_8, window_bounds = array<i64: 16, 8, 32>}]} {
    %c0 = arith.constant 0 : index
    %c0_0 = arith.constant 0 : index
    %c0_1 = arith.constant 0 : index
    %0 = vector.load %arg1[%c0, %c0_0, %c0_1] : memref<16x8x32xf32, #tpu.memory_space<vmem>>, vector<16x8x32xf32>
    %1 = vector.shape_cast %0 : vector<16x8x32xf32> to vector<128x32xf32>
    %2 = arith.truncf %1 : vector<128x32xf32> to vector<128x32xbf16>
    %c0_2 = arith.constant 0 : index
    %c0_3 = arith.constant 0 : index
    %3 = vector.load %arg3[%c0_2, %c0_3] : memref<32x96xbf16, #tpu.memory_space<vmem>>, vector<32x96xbf16>
    %cst = arith.constant dense<0.000000e+00> : vector<128x96xf32>
    %4 = tpu.matmul %2, %3, %cst {dimension_numbers = #tpu.dot_dimension_numbers<[1], [0], [0], [1], [0, 0, 1, 1], [], []>} : vector<128x32xbf16>, vector<32x96xbf16>, vector<128x96xf32> -> vector<128x96xf32>
    %c0_4 = arith.constant 0 : index
    %c0_5 = arith.constant 0 : index
    %5 = vector.load %arg4[%c0_4, %c0_5] : memref<1x96xf32, #tpu.memory_space<vmem>>, vector<1x96xf32>
    %6 = vector.broadcast %5 : vector<1x96xf32> to vector<128x96xf32>
    %7 = arith.addf %4, %6 : vector<128x96xf32>
    %c0_6 = arith.constant 0 : index
    %c0_7 = arith.constant 0 : index
    %8 = vector.load %arg2[%c0_6, %c0_7] : memref<128x128xf32, #tpu.memory_space<vmem>>, vector<128x128xf32>
    %9 = vector.extract_strided_slice %7 {offsets = [0, 0], sizes = [128, 8], strides = [1, 1]} : vector<128x96xf32> to vector<128x8xf32>
    %10 = arith.truncf %9 : vector<128x8xf32> to vector<128x8xbf16>
    %11 = vector.extract_strided_slice %7 {offsets = [0, 32], sizes = [128, 8], strides = [1, 1]} : vector<128x96xf32> to vector<128x8xf32>
    %12 = arith.truncf %11 : vector<128x8xf32> to vector<128x8xbf16>
    %13 = vector.extract_strided_slice %7 {offsets = [0, 64], sizes = [128, 8], strides = [1, 1]} : vector<128x96xf32> to vector<128x8xf32>
    %14 = arith.truncf %13 : vector<128x8xf32> to vector<128x8xbf16>
    %cst_8 = arith.constant dense<0.000000e+00> : vector<128x128xf32>
    %15 = tpu.matmul %10, %12, %cst_8 {dimension_numbers = #tpu.dot_dimension_numbers<[1], [1], [0], [0], [0, 0, 1, 0], [], []>} : vector<128x8xbf16>, vector<128x8xbf16>, vector<128x128xf32> -> vector<128x128xf32>
    %16 = arith.addf %15, %8 : vector<128x128xf32>
    %cst_9 = arith.constant dense<0xFF800000> : vector<128xf32>
    %17 = vector.multi_reduction <maximumf>, %16, %cst_9 [1] : vector<128x128xf32> to vector<128xf32>
    %18 = vector.shape_cast %17 : vector<128xf32> to vector<128x1xf32>
    %19 = vector.broadcast %18 : vector<128x1xf32> to vector<128x128xf32>
    %20 = arith.subf %16, %19 : vector<128x128xf32>
    %21 = math.exp %20 : vector<128x128xf32>
    %cst_10 = arith.constant dense<0.000000e+00> : vector<128xf32>
    %22 = vector.multi_reduction <add>, %21, %cst_10 [1] : vector<128x128xf32> to vector<128xf32>
    %23 = vector.shape_cast %22 : vector<128xf32> to vector<128x1xf32>
    %24 = arith.truncf %21 : vector<128x128xf32> to vector<128x128xbf16>
    %cst_11 = arith.constant dense<0.000000e+00> : vector<128x8xf32>
    %25 = tpu.matmul %24, %14, %cst_11 {dimension_numbers = #tpu.dot_dimension_numbers<[1], [0], [0], [1], [0, 0, 1, 1], [], []>} : vector<128x128xbf16>, vector<128x8xbf16>, vector<128x8xf32> -> vector<128x8xf32>
    %26 = tpu.reciprocal %23 {approx = true} : vector<128x1xf32> -> vector<128x1xf32>
    %27 = vector.broadcast %26 : vector<128x1xf32> to vector<128x8xf32>
    %28 = arith.mulf %25, %27 : vector<128x8xf32>
    %29 = arith.truncf %28 : vector<128x8xf32> to vector<128x8xbf16>
    %30 = vector.extract_strided_slice %7 {offsets = [0, 8], sizes = [128, 8], strides = [1, 1]} : vector<128x96xf32> to vector<128x8xf32>
    %31 = arith.truncf %30 : vector<128x8xf32> to vector<128x8xbf16>
    %32 = vector.extract_strided_slice %7 {offsets = [0, 40], sizes = [128, 8], strides = [1, 1]} : vector<128x96xf32> to vector<128x8xf32>
    %33 = arith.truncf %32 : vector<128x8xf32> to vector<128x8xbf16>
    %34 = vector.extract_strided_slice %7 {offsets = [0, 72], sizes = [128, 8], strides = [1, 1]} : vector<128x96xf32> to vector<128x8xf32>
    %35 = arith.truncf %34 : vector<128x8xf32> to vector<128x8xbf16>
    %cst_12 = arith.constant dense<0.000000e+00> : vector<128x128xf32>
    %36 = tpu.matmul %31, %33, %cst_12 {dimension_numbers = #tpu.dot_dimension_numbers<[1], [1], [0], [0], [0, 0, 1, 0], [], []>} : vector<128x8xbf16>, vector<128x8xbf16>, vector<128x128xf32> -> vector<128x128xf32>
    %37 = arith.addf %36, %8 : vector<128x128xf32>
    %cst_13 = arith.constant dense<0xFF800000> : vector<128xf32>
    %38 = vector.multi_reduction <maximumf>, %37, %cst_13 [1] : vector<128x128xf32> to vector<128xf32>
    %39 = vector.shape_cast %38 : vector<128xf32> to vector<128x1xf32>
    %40 = vector.broadcast %39 : vector<128x1xf32> to vector<128x128xf32>
    %41 = arith.subf %37, %40 : vector<128x128xf32>
    %42 = math.exp %41 : vector<128x128xf32>
    %cst_14 = arith.constant dense<0.000000e+00> : vector<128xf32>
    %43 = vector.multi_reduction <add>, %42, %cst_14 [1] : vector<128x128xf32> to vector<128xf32>
    %44 = vector.shape_cast %43 : vector<128xf32> to vector<128x1xf32>
    %45 = arith.truncf %42 : vector<128x128xf32> to vector<128x128xbf16>
    %cst_15 = arith.constant dense<0.000000e+00> : vector<128x8xf32>
    %46 = tpu.matmul %45, %35, %cst_15 {dimension_numbers = #tpu.dot_dimension_numbers<[1], [0], [0], [1], [0, 0, 1, 1], [], []>} : vector<128x128xbf16>, vector<128x8xbf16>, vector<128x8xf32> -> vector<128x8xf32>
    %47 = tpu.reciprocal %44 {approx = true} : vector<128x1xf32> -> vector<128x1xf32>
    %48 = vector.broadcast %47 : vector<128x1xf32> to vector<128x8xf32>
    %49 = arith.mulf %46, %48 : vector<128x8xf32>
    %50 = arith.truncf %49 : vector<128x8xf32> to vector<128x8xbf16>
    %51 = vector.extract_strided_slice %7 {offsets = [0, 16], sizes = [128, 8], strides = [1, 1]} : vector<128x96xf32> to vector<128x8xf32>
    %52 = arith.truncf %51 : vector<128x8xf32> to vector<128x8xbf16>
    %53 = vector.extract_strided_slice %7 {offsets = [0, 48], sizes = [128, 8], strides = [1, 1]} : vector<128x96xf32> to vector<128x8xf32>
    %54 = arith.truncf %53 : vector<128x8xf32> to vector<128x8xbf16>
    %55 = vector.extract_strided_slice %7 {offsets = [0, 80], sizes = [128, 8], strides = [1, 1]} : vector<128x96xf32> to vector<128x8xf32>
    %56 = arith.truncf %55 : vector<128x8xf32> to vector<128x8xbf16>
    %cst_16 = arith.constant dense<0.000000e+00> : vector<128x128xf32>
    %57 = tpu.matmul %52, %54, %cst_16 {dimension_numbers = #tpu.dot_dimension_numbers<[1], [1], [0], [0], [0, 0, 1, 0], [], []>} : vector<128x8xbf16>, vector<128x8xbf16>, vector<128x128xf32> -> vector<128x128xf32>
    %58 = arith.addf %57, %8 : vector<128x128xf32>
    %cst_17 = arith.constant dense<0xFF800000> : vector<128xf32>
    %59 = vector.multi_reduction <maximumf>, %58, %cst_17 [1] : vector<128x128xf32> to vector<128xf32>
    %60 = vector.shape_cast %59 : vector<128xf32> to vector<128x1xf32>
    %61 = vector.broadcast %60 : vector<128x1xf32> to vector<128x128xf32>
    %62 = arith.subf %58, %61 : vector<128x128xf32>
    %63 = math.exp %62 : vector<128x128xf32>
    %cst_18 = arith.constant dense<0.000000e+00> : vector<128xf32>
    %64 = vector.multi_reduction <add>, %63, %cst_18 [1] : vector<128x128xf32> to vector<128xf32>
    %65 = vector.shape_cast %64 : vector<128xf32> to vector<128x1xf32>
    %66 = arith.truncf %63 : vector<128x128xf32> to vector<128x128xbf16>
    %cst_19 = arith.constant dense<0.000000e+00> : vector<128x8xf32>
    %67 = tpu.matmul %66, %56, %cst_19 {dimension_numbers = #tpu.dot_dimension_numbers<[1], [0], [0], [1], [0, 0, 1, 1], [], []>} : vector<128x128xbf16>, vector<128x8xbf16>, vector<128x8xf32> -> vector<128x8xf32>
    %68 = tpu.reciprocal %65 {approx = true} : vector<128x1xf32> -> vector<128x1xf32>
    %69 = vector.broadcast %68 : vector<128x1xf32> to vector<128x8xf32>
    %70 = arith.mulf %67, %69 : vector<128x8xf32>
    %71 = arith.truncf %70 : vector<128x8xf32> to vector<128x8xbf16>
    %72 = vector.extract_strided_slice %7 {offsets = [0, 24], sizes = [128, 8], strides = [1, 1]} : vector<128x96xf32> to vector<128x8xf32>
    %73 = arith.truncf %72 : vector<128x8xf32> to vector<128x8xbf16>
    %74 = vector.extract_strided_slice %7 {offsets = [0, 56], sizes = [128, 8], strides = [1, 1]} : vector<128x96xf32> to vector<128x8xf32>
    %75 = arith.truncf %74 : vector<128x8xf32> to vector<128x8xbf16>
    %76 = vector.extract_strided_slice %7 {offsets = [0, 88], sizes = [128, 8], strides = [1, 1]} : vector<128x96xf32> to vector<128x8xf32>
    %77 = arith.truncf %76 : vector<128x8xf32> to vector<128x8xbf16>
    %cst_20 = arith.constant dense<0.000000e+00> : vector<128x128xf32>
    %78 = tpu.matmul %73, %75, %cst_20 {dimension_numbers = #tpu.dot_dimension_numbers<[1], [1], [0], [0], [0, 0, 1, 0], [], []>} : vector<128x8xbf16>, vector<128x8xbf16>, vector<128x128xf32> -> vector<128x128xf32>
    %79 = arith.addf %78, %8 : vector<128x128xf32>
    %cst_21 = arith.constant dense<0xFF800000> : vector<128xf32>
    %80 = vector.multi_reduction <maximumf>, %79, %cst_21 [1] : vector<128x128xf32> to vector<128xf32>
    %81 = vector.shape_cast %80 : vector<128xf32> to vector<128x1xf32>
    %82 = vector.broadcast %81 : vector<128x1xf32> to vector<128x128xf32>
    %83 = arith.subf %79, %82 : vector<128x128xf32>
    %84 = math.exp %83 : vector<128x128xf32>
    %cst_22 = arith.constant dense<0.000000e+00> : vector<128xf32>
    %85 = vector.multi_reduction <add>, %84, %cst_22 [1] : vector<128x128xf32> to vector<128xf32>
    %86 = vector.shape_cast %85 : vector<128xf32> to vector<128x1xf32>
    %87 = arith.truncf %84 : vector<128x128xf32> to vector<128x128xbf16>
    %cst_23 = arith.constant dense<0.000000e+00> : vector<128x8xf32>
    %88 = tpu.matmul %87, %77, %cst_23 {dimension_numbers = #tpu.dot_dimension_numbers<[1], [0], [0], [1], [0, 0, 1, 1], [], []>} : vector<128x128xbf16>, vector<128x8xbf16>, vector<128x8xf32> -> vector<128x8xf32>
    %89 = tpu.reciprocal %86 {approx = true} : vector<128x1xf32> -> vector<128x1xf32>
    %90 = vector.broadcast %89 : vector<128x1xf32> to vector<128x8xf32>
    %91 = arith.mulf %88, %90 : vector<128x8xf32>
    %92 = arith.truncf %91 : vector<128x8xf32> to vector<128x8xbf16>
    %93 = tpu.concatenate %29, %50, %71, %92 in 1 : vector<128x8xbf16>, vector<128x8xbf16>, vector<128x8xbf16>, vector<128x8xbf16> -> vector<128x32xbf16>
    %c0_24 = arith.constant 0 : index
    %c0_25 = arith.constant 0 : index
    %94 = vector.load %arg5[%c0_24, %c0_25] : memref<32x32xbf16, #tpu.memory_space<vmem>>, vector<32x32xbf16>
    %cst_26 = arith.constant dense<0.000000e+00> : vector<128x32xf32>
    %95 = tpu.matmul %93, %94, %cst_26 {dimension_numbers = #tpu.dot_dimension_numbers<[1], [0], [0], [1], [0, 0, 1, 1], [], []>} : vector<128x32xbf16>, vector<32x32xbf16>, vector<128x32xf32> -> vector<128x32xf32>
    %c0_27 = arith.constant 0 : index
    %c0_28 = arith.constant 0 : index
    %96 = vector.load %arg6[%c0_27, %c0_28] : memref<1x32xf32, #tpu.memory_space<vmem>>, vector<1x32xf32>
    %97 = vector.broadcast %96 : vector<1x32xf32> to vector<128x32xf32>
    %98 = arith.addf %95, %97 : vector<128x32xf32>
    %99 = arith.addf %1, %98 : vector<128x32xf32>
    %cst_29 = arith.constant dense<0.000000e+00> : vector<128xf32>
    %100 = vector.multi_reduction <add>, %99, %cst_29 [1] : vector<128x32xf32> to vector<128xf32>
    %101 = vector.shape_cast %100 : vector<128xf32> to vector<128x1xf32>
    %cst_30 = arith.constant 3.200000e+01 : f32
    %102 = vector.broadcast %cst_30 : f32 to vector<128x1xf32>
    %103 = arith.divf %101, %102 : vector<128x1xf32>
    %104 = vector.broadcast %103 : vector<128x1xf32> to vector<128x32xf32>
    %105 = arith.subf %99, %104 : vector<128x32xf32>
    %106 = arith.mulf %105, %105 : vector<128x32xf32>
    %cst_31 = arith.constant dense<0.000000e+00> : vector<128xf32>
    %107 = vector.multi_reduction <add>, %106, %cst_31 [1] : vector<128x32xf32> to vector<128xf32>
    %108 = vector.shape_cast %107 : vector<128xf32> to vector<128x1xf32>
    %cst_32 = arith.constant 3.200000e+01 : f32
    %109 = vector.broadcast %cst_32 : f32 to vector<128x1xf32>
    %110 = arith.divf %108, %109 : vector<128x1xf32>
    %111 = vector.broadcast %103 : vector<128x1xf32> to vector<128x32xf32>
    %112 = arith.subf %99, %111 : vector<128x32xf32>
    %cst_33 = arith.constant 9.99999974E-6 : f32
    %113 = vector.broadcast %cst_33 : f32 to vector<128x1xf32>
    %114 = arith.addf %110, %113 : vector<128x1xf32>
    %115 = math.rsqrt %114 : vector<128x1xf32>
    %116 = vector.broadcast %115 : vector<128x1xf32> to vector<128x32xf32>
    %117 = arith.mulf %112, %116 : vector<128x32xf32>
    %c0_34 = arith.constant 0 : index
    %c0_35 = arith.constant 0 : index
    %118 = vector.load %arg7[%c0_34, %c0_35] : memref<1x32xf32, #tpu.memory_space<vmem>>, vector<1x32xf32>
    %119 = vector.broadcast %118 : vector<1x32xf32> to vector<128x32xf32>
    %120 = arith.mulf %117, %119 : vector<128x32xf32>
    %c0_36 = arith.constant 0 : index
    %c0_37 = arith.constant 0 : index
    %121 = vector.load %arg8[%c0_36, %c0_37] : memref<1x32xf32, #tpu.memory_space<vmem>>, vector<1x32xf32>
    %122 = vector.broadcast %121 : vector<1x32xf32> to vector<128x32xf32>
    %123 = arith.addf %120, %122 : vector<128x32xf32>
    %124 = vector.shape_cast %123 : vector<128x32xf32> to vector<16x8x32xf32>
    %c0_38 = arith.constant 0 : index
    %c0_39 = arith.constant 0 : index
    %c0_40 = arith.constant 0 : index
    %125 = vector.load %arg9[%c0_38, %c0_39, %c0_40] : memref<16x8x32xf32, #tpu.memory_space<vmem>>, vector<16x8x32xf32>
    tpu.vector_store %arg9[%c0_38, %c0_39, %c0_40], %124 {strides = array<i32>} : memref<16x8x32xf32, #tpu.memory_space<vmem>>, vector<16x8x32xf32>,
    return
  }
  func.func @transform_0(%arg0: i32) -> (i32, i32, i32) {
    %c0_i32 = arith.constant 0 : i32
    %c0_i32_0 = arith.constant 0 : i32
    %c0_i32_1 = arith.constant 0 : i32
    return %c0_i32, %arg0, %c0_i32_0 : i32, i32, i32
  }
  func.func @transform_1(%arg0: i32) -> (i32, i32) {
    %c0_i32 = arith.constant 0 : i32
    %c0_i32_0 = arith.constant 0 : i32
    %c0_i32_1 = arith.constant 0 : i32
    return %c0_i32, %c0_i32_0 : i32, i32
  }
  func.func @transform_2(%arg0: i32) -> (i32, i32) {
    %c0_i32 = arith.constant 0 : i32
    %c0_i32_0 = arith.constant 0 : i32
    %c0_i32_1 = arith.constant 0 : i32
    return %c0_i32, %c0_i32_0 : i32, i32
  }
  func.func @transform_3(%arg0: i32) -> (i32, i32) {
    %c0_i32 = arith.constant 0 : i32
    %c0_i32_0 = arith.constant 0 : i32
    %c0_i32_1 = arith.constant 0 : i32
    return %c0_i32, %c0_i32_0 : i32, i32
  }
  func.func @transform_4(%arg0: i32) -> (i32, i32) {
    %c0_i32 = arith.constant 0 : i32
    %c0_i32_0 = arith.constant 0 : i32
    %c0_i32_1 = arith.constant 0 : i32
    return %c0_i32, %c0_i32_0 : i32, i32
  }
  func.func @transform_5(%arg0: i32) -> (i32, i32) {
    %c0_i32 = arith.constant 0 : i32
    %c0_i32_0 = arith.constant 0 : i32
    %c0_i32_1 = arith.constant 0 : i32
    return %c0_i32, %c0_i32_0 : i32, i32
  }
  func.func @transform_6(%arg0: i32) -> (i32, i32) {
    %c0_i32 = arith.constant 0 : i32
    %c0_i32_0 = arith.constant 0 : i32
    %c0_i32_1 = arith.constant 0 : i32
    return %c0_i32, %c0_i32_0 : i32, i32
  }
  func.func @transform_7(%arg0: i32) -> (i32, i32) {
    %c0_i32 = arith.constant 0 : i32
    %c0_i32_0 = arith.constant 0 : i32
    %c0_i32_1 = arith.constant 0 : i32
    return %c0_i32, %c0_i32_0 : i32, i32
  }
  func.func @transform_8(%arg0: i32) -> (i32, i32, i32) {
    %c0_i32 = arith.constant 0 : i32
    %c0_i32_0 = arith.constant 0 : i32
    %c0_i32_1 = arith.constant 0 : i32
    return %c0_i32, %arg0, %c0_i32_0 : i32, i32, i32
  }
}

</mosaic_0001>

<bundles_post_ra>
// kernel: tpu_custom_call.1
= control target key start
LH: loop header
LB: loop body
LE: loop exit
PB: predicated region body
PF: predicated region fallthrough
CT: control target
= control target key end

     0   :  { %s5955_s0 = inlined_call_operand.hbm [shape: f32[16,16,32], index: 0, kind: input, shape index: {}]   ;;  %s5956_s1 = inlined_call_operand.hbm [shape: f32[128,128], index: 1, kind: input, shape index: {}]   ;;  %s5957_s2 = inlined_call_operand.hbm [shape: bf16[32,96], index: 2, kind: input, shape index: {}]   ;;  %s5958_s3 = inlined_call_operand.vmem [shape: f32[1,96], index: 3, kind: input, shape index: {}]   ;;  %s5959_s4 = inlined_call_operand.hbm [shape: bf16[32,32], index: 4, kind: input, shape index: {}]   ;;  %s5960_s5 = inlined_call_operand.vmem [shape: f32[1,32], index: 5, kind: input, shape index: {}]   ;;  %s5961_s6 = inlined_call_operand.vmem [shape: f32[1,32], index: 6, kind: input, shape index: {}]   ;;  %s5962_s7 = inlined_call_operand.vmem [shape: f32[1,32], index: 7, kind: input, shape index: {}]   ;;  %s5963_s8 = inlined_call_operand.hbm [shape: f32[16,16,32], index: 8, kind: output, shape index: {}]  }
   0x1   :  { %5992 = sst [smem:[#allocation76_spill]] %s5956_s1 }
   0x2   :  { %5993 = sst [smem:[#allocation77_spill]] %s5957_s2 }
   0x3   :  { %13 = vsyncpa [#allocation3], 0 }
   0x4   :  { %15 = vsyncpa [#allocation3 + $0x1], 0 }
   0x5   :  { %16 = vsyncpa [#allocation6], 0 }
   0x6   :  { %17 = vsyncpa [#allocation9], 0 }
   0x7   :  { %18 = vsyncpa [#allocation4], 0 }
   0x8   :  { %20 = vsyncpa [#allocation4 + $0x1], 0  ;;  %s4293_s27 = smov 0   ;;  %s4295_s28 = smov 0  }
   0x9   :  { %s4297_s29 = smov 0   ;;  %s4299_s30 = smov 0  }
   0xa LB: > { %5994 = sst [smem:[#allocation15_spill]] %s4216_s29  ;;  %s4314_s9 = sadd.s32 4294967295, %s4220_s30   ;;  %s4220_s30 = sphi %s4299_s30, %s6139_s30   ;;  %s4216_s29 = sphi %s4297_s29, %s6138_s29   ;;  %s4212_s28 = sphi %s4295_s28, %s6137_s28   ;;  %s4208_s27 = sphi %s4293_s27, %s6136_s27  }
   0xb   : > { %s3054_s10 = sadd.s32 4294967294, %s4220_s30   ;;  %s4318_s11 = sadd.s32 1, %s4220_s30  }
   0xc   : > { %s33_s12 = sadd.s32 1, %s4216_s29  ;;  %s30_s13 = ssub.s32 %s4220_s30, %s4318_s11 }
   0xd   : > { %p40_p0 = scmp.ne.s32.totalorder %s4216_s29, %s4212_s28  ;;  %p31_p1 = scmp.eq.s32.totalorder %s30_s13, 0 }
   0xe   : > { %p41_p2 = scmp.eq.s32.totalorder %s4220_s30, 0  ;;  %p46_p3 = scmp.ne.s32.totalorder %s4212_s28, %s4208_s27 }
   0xf   : > { %p5965_p4 = scmp.eq.s32.totalorder %s4314_s9, 0  ;;  %p217_p7 = scmp.eq.s32.totalorder %s4314_s9, 1 }
  0x10   : > { %s4330_s14 = scalar_select %p31_p1, %s4216_s29, %s33_s12  }
  0x11   : > { %p4332_p5 = por %p41_p2, %p40_p0  ;;  %p4338_p6 = por %p5965_p4, %p46_p3 }
  0x12   : > { %5995 = sst [smem:[#allocation16_spill]] %s4330_s14  ;;  %p223_p8 = scmp.eq.s32.totalorder %s3054_s10, 1 }
  0x13   : > { %s5997_s16 = scalar_select %p4338_p6, 1, 0 }
  0x14   : > { %p3055_p9 = scmp.ge.s32.totalorder %s4220_s30, 1  ;;  %p230_p10 = scmp.lt.s32.totalorder %s4220_s30, 3 }
  0x15   : > { %p4345_p11 = por %p217_p7, %p40_p0  ;;  %p4349_p12 = por %p223_p8, %p46_p3 }
  0x16   : > { %p4353_p13 = pnand %p3055_p9, %p230_p10  ;;  %s4222_s20 = smov [#allocation5]  }
  0x17   : > { %s5998_s17 = scalar_select %p4345_p11, 1, 0 }
  0x18   : > { %s5999_s18 = scalar_select %p4349_p12, 1, 0 }
  0x19   : > { %s6000_s19 = scalar_select %p4353_p13, 1, 0 }
  0x1a   : > { %p3636_p1 = pneg %p4353_p13  ;;  %s242_s21 = sshll.u32 %s4222_s20, 4  ;;  %s243_s21 = int_to_ptr.vmem [resolvable:$true] %s242_s21 }
  0x1b   : > { %p3657_p3 = scmp.lt.s32.totalorder %s4220_s30, 2  ;;  %s4223_s23 = smov [#allocation7]  }
  0x1c   : > { %p4361_p2 = pnand %p3636_p1, %p5965_p4  ;;  %s255_s24 = sshll.u32 %s4223_s23, 4  ;;  %s256_s24 = int_to_ptr.vmem [resolvable:$true] %s255_s24 }
  0x1d   : > { %s4053_s25 = scalar_lea.vmem %s243_s21, 2048  ;;  %p4061_p12 = scmp.lt.s32.totalorder %s243_s21, %s243_s21 }
  0x1e   : > { %p4044_p7 = pneg %p4361_p2  ;;  %p4054_p8 = scmp.ne.s32.totalorder %s243_s21, %s4053_s25 }
  0x1f   : > { %p4062_p11 = scmp.lt.s32.totalorder %s4053_s25, %s4053_s25 }
  0x20   : > { %p4056_p9 = pnand %p4054_p8, %p4044_p7 }
  0x21   : > { %p4063_p1 = por %p4062_p11, %p4061_p12 }
  0x22   : > { %p4057_p10 = pneg %p4056_p9 }
  0x24   : > { %p4064_p4 = pnand %p4063_p1, %p4057_p10 }
  0x26   : > { %4067 = shalt.err (!%p4064_p4)
}
  0x27   : > { %s5966_s26 = smov 128   ;;  %s5967_s10 = smov 8  }
  0x28   : > { %s6002_s1 = sld [smem:[#allocation76_spill]]  ;;  %p4384_p8 = pnand %p3657_p3, %p4332_p5 }
  0x29   : > { %s4079_s23 = scalar_lea.vmem %s256_s24, 256  ;;  %p4087_p9 = scmp.lt.s32.totalorder %s256_s24, %s256_s24 }
  0x2a   : > { %p4080_p4 = scmp.ne.s32.totalorder %s256_s24, %s4079_s23  ;;  %p4088_p10 = scmp.lt.s32.totalorder %s4079_s23, %s4079_s23 }
  0x2c   : > { %p4082_p11 = pnand %p4080_p4, %p4044_p7  ;;  %p4089_p1 = por %p4088_p10, %p4087_p9 }
  0x2e   : > { %3639 = dma.hbm_to_vmem [thread:$0]  (!%p4361_p2), %s6002_s1, 2048, %s243_s21, [#allocation6], %s5966_s26, %s5966_s26, %s5967_s10  }
  0x2f   : > { %p4083_p12 = pneg %p4082_p11 }
  0x31   : > { %p4090_p0 = pnand %p4089_p1, %p4083_p12 }
  0x33   : > { %4093 = shalt.err (!%p4090_p0)
}
  0x34   : > { %s4226_s25 = smov 64   ;;  %s4227_s15 = smov 4  }
  0x35   : > { %s6004_s2 = sld [smem:[#allocation77_spill]]  ;;  %s4228_s13 = smov [#allocation8]  }
  0x36   : > { %s271_s26 = sshll.u32 %s4228_s13, 4  ;;  %s294_s10 = sand.u32 1, %s4216_s29   ;;  %s272_s26 = int_to_ptr.vmem [resolvable:$true] %s271_s26 }
  0x37   : > { %s4105_s1 = scalar_lea.vmem %s272_s26, 256  ;;  %p4113_p4 = scmp.lt.s32.totalorder %s272_s26, %s272_s26 }
  0x38   : > { %p4106_p5 = scmp.ne.s32.totalorder %s272_s26, %s4105_s1  ;;  %p4114_p11 = scmp.lt.s32.totalorder %s4105_s1, %s4105_s1 }
  0x3a   : > { %p4108_p3 = pnand %p4106_p5, %p4044_p7  ;;  %p4115_p12 = por %p4114_p11, %p4113_p4 }
  0x3b   : > { %3642 = dma.hbm_to_vmem [thread:$0]  (!%p4361_p2), %s6004_s2, 256, %s256_s24, [#allocation6], %s4226_s25, %s4226_s25, %s4227_s15  }
  0x3c   : > { %p4109_p0 = pneg %p4108_p3 }
  0x3e   : > { %p4116_p9 = pnand %p4115_p12, %p4109_p0 }
  0x40   : > { %4119 = shalt.err (!%p4116_p9)
}
  0x41   : > { %3645 = dma.hbm_to_vmem [thread:$0]  (!%p4361_p2), %s5959_s4, 256, %s272_s26, [#allocation9], %s4226_s25, %s4226_s25, %s4227_s15  }
  0x42   : > { %s3060_s24 = sshll.u32 %s294_s10, 7  ;;  %s3061_s12 = sshll.u32 %s4220_s30, 7 }
  0x43   : > { %s4409_s14 = scalar_lea.hbm %s5955_s0, %s3061_s12  ;;  %s298_s1 = scalar_lea.vmem [#allocation2], %s3060_s24 }
  0x44   : > { %s304_s29 = sshll.u32 %s298_s1, 4  ;;  %s4413_s22 = scalar_lea.sflag [#allocation3], %s294_s10  ;;  %s4411_s29 = int_to_ptr.vmem [resolvable:$true] %s304_s29 }
  0x45   : > { %s4120_s23 = scalar_lea.hbm %s4409_s14, 2048  ;;  %p4122_p2 = pneg %p4384_p8 }
  0x46   : > { %p4121_p7 = scmp.ne.s32.totalorder %s4409_s14, %s4120_s23  ;;  %s4125_s2 = scalar_lea.hbm %s5955_s0, 4096 }
  0x47   : > { %p4126_p5 = scmp.lt.s32.totalorder %s4409_s14, %s5955_s0  ;;  %p4127_p3 = scmp.lt.s32.totalorder %s4125_s2, %s4120_s23 }
  0x48   : > { %p4123_p10 = pnand %p4122_p2, %p4121_p7 }
  0x49   : > { %p4128_p0 = por %p4127_p3, %p4126_p5 }
  0x4a   : > { %p4124_p1 = pneg %p4123_p10 }
  0x4c   : > { %p4129_p4 = pnand %p4128_p0, %p4124_p1 }
  0x4e   : > { %4132 = shalt.err (!%p4129_p4)
}
  0x4f   : > { %s4133_s10 = scalar_lea.vmem %s4411_s29, 2048  ;;  %s4229_s24 = smov [#allocation2]  }
  0x50   : > { %p4134_p11 = scmp.ne.s32.totalorder %s4411_s29, %s4133_s10  ;;  %s4138_s12 = sshll.u32 %s4229_s24, 4  ;;  %s4139_s12 = int_to_ptr.vmem [resolvable:$false] %s4138_s12 }
  0x51   : > { %s4140_s13 = scalar_lea.vmem %s4139_s12, 4096  ;;  %p4141_p7 = scmp.lt.s32.totalorder %s4411_s29, %s4139_s12 }
  0x52   : > { %p4136_p12 = pnand %p4134_p11, %p4122_p2  ;;  %p4142_p10 = scmp.lt.s32.totalorder %s4140_s13, %s4133_s10 }
  0x54   : > { %p4137_p9 = pneg %p4136_p12  ;;  %p4143_p6 = por %p4142_p10, %p4141_p7 }
  0x56   : > { %p4144_p13 = pnand %p4143_p6, %p4137_p9 }
  0x58   : > { %4147 = shalt.err (!%p4144_p13)
}
  0x59   : > { %s4230_s1 = smov 256   ;;  %s6005_s23 = smov 8  }
  0x5a   : > { %s6006_s26 = smov 128   ;;  %p6007_p2 = scmp.ne.s32.totalorder %s6000_s19, 0 }
  0x5b   : > { %3649 = dma.hbm_to_vmem [thread:$0]  (!%p4384_p8), %s4409_s14, 2048, %s4411_s29, %s4413_s22, %s4230_s1, %s6006_s26, %s6005_s23  }
  0x5c   : > { %316 = sbr.rel (%p6007_p2) target bundleno = 3113 (0xc29), region = 52 }
  0x61   : > { %s4439_s25 = sand.u32 1, %s4212_s28   ;;  %p6008_p6 = scmp.ne.s32.totalorder %s5997_s16, 0 }
  0x62   : > { %s3063_s2 = sshll.u32 %s4439_s25, 7  ;;  %s319_s15 = scalar_lea.sflag [#allocation3], %s4439_s25 }
  0x63   : > { %s4445_s20 = scalar_lea.vmem [#allocation2], %s3063_s2 }
  0x64   : > { %4191 = dma.done.wait (%p6008_p6), %s319_s15, 2048  }
  0x65   : > { %4193 = vsyncadd (%p6008_p6), %s319_s15, 4294965248  ;;  %p6009_p13 = scmp.eq.s32.totalorder %s4314_s9, 0 }
  0x67   : > { %4195 = dma.done.wait (%p6009_p13), [#allocation6], 2304   ;;  %p6010_p8 = pmov %p6009_p13 }
  0x69   : > { %4197 = vsyncadd (%p6010_p8), [#allocation6], 4294964992  ;;  %p6011_p1 = pmov %p6010_p8 }
  0x6b   : > { %4199 = dma.done.wait (%p6011_p1), [#allocation9], 256   ;;  %p6012_p5 = pmov %p6011_p1 }
  0x6c   : > { %v3718_v0 = vld [vmem:[#allocation7 + $0x8] sm:$0xff]   ;;  %v3719_v1 = vld [vmem:[#allocation7] sm:$0xff]   ;;  %vm415_vm0 = vcmask 261120   ;;  %v370_v5 = vld [vmem:[%s4445_s20 + $0x10] sm:$0xff]  ;;  %vm585_vm1 = vcmask 64512   ;;  %s4231_s16 = smov 96  }
  0x6d   : > { %4201 = vsyncadd (%p6012_p5), [#allocation9], 4294967040  ;;  %3276 = vmatprep.subr.bf16.mxu0 %v3718_v0  ;;  %v368_v2 = vld [vmem:[%s4445_s20] sm:$0xff]  ;;  %v369_v3 = vld [vmem:[%s4445_s20 + $0x8] sm:$0xff]  ;;  %s4232_s19 = smov 64   ;;  %s4233_s22 = smov 88  }
  0x6e   : > { %3277 = vmatpush3.bf16.msra.mxu0 %v3718_v0  ;;  %v384_v4 = vpack.c.bf16 %v369_v3, %v368_v2  ;;  %v371_v6 = vld [vmem:[%s4445_s20 + $0x18] sm:$0xff]  ;;  %v372_v7 = vld [vmem:[%s4445_s20 + $0x20] sm:$0xff]  ;;  %v373_v8 = vld [vmem:[%s4445_s20 + $0x28] sm:$0xff]  ;;  %s4234_s21 = smov 120   ;;  %s4235_s10 = smov 56   ;;  %vm2482_vm2 = vcmask 130048  }
  0x6f   : > { %3278 = vmatprep.subr.bf16.mxu0 %v3719_v1  ;;  %v385_v9 = vpack.c.bf16 %v371_v6, %v370_v5  ;;  %v386_v10 = vpack.c.bf16 %v373_v8, %v372_v7  ;;  %v374_v11 = vld [vmem:[%s4445_s20 + $0x30] sm:$0xff]  ;;  %v375_v12 = vld [vmem:[%s4445_s20 + $0x38] sm:$0xff]  ;;  %v376_v13 = vld [vmem:[%s4445_s20 + $0x40] sm:$0xff]  ;;  %s4236_s24 = smov 80   ;;  %s4237_s12 = smov 112   ;;  %vm2499_vm3 = vcmask 195584  }
  0x70   : > { %3280 = vmatprep.mubr.msk.bf16.mxu0 %vm415_vm0, %v384_v4  ;;  %v377_v14 = vld [vmem:[%s4445_s20 + $0x48] sm:$0xff]  ;;  %v387_v15 = vpack.c.bf16 %v375_v12, %v374_v11  ;;  %v378_v17 = vld [vmem:[%s4445_s20 + $0x50] sm:$0xff]  ;;  %v379_v18 = vld [vmem:[%s4445_s20 + $0x58] sm:$0xff]  ;;  %s4238_s13 = smov 48   ;;  %s4239_s1 = smov 72  }
  0x71   : > { %v388_v16 = vpack.c.bf16 %v377_v14, %v376_v13  ;;  %v380_v19 = vld [vmem:[%s4445_s20 + $0x60] sm:$0xff]  ;;  %v381_v20 = vld [vmem:[%s4445_s20 + $0x68] sm:$0xff]  ;;  %v389_v21 = vpack.c.bf16 %v379_v18, %v378_v17  ;;  %v382_v23 = vld [vmem:[%s4445_s20 + $0x70] sm:$0xff]  ;;  %s4240_s23 = smov 104   ;;  %s4241_s26 = smov 40  }
  0x72   : > { %3279 = vmatpush3.bf16.msra.mxu0 %v3719_v1  ;;  %v390_v22 = vpack.c.bf16 %v381_v20, %v380_v19  ;;  %v383_v24 = vld [vmem:[%s4445_s20 + $0x78] sm:$0xff]  ;;  %v3068_v29 = vld [vmem:[%s5958_s3] ss:$0 sm:$0xff]  ;;  %s4242_s15 = smov 8   ;;  %s4243_s29 = smov 16  }
  0x73   : > { %v391_v25 = vpack.c.bf16 %v383_v24, %v382_v23  ;;  %s4244_s14 = smov 24   ;;  %p6131_p0 = scmp.ne.s32.totalorder %s5998_s17, 0 }
  0x75   : > { %3281 = vmatmul.mubr.msk.bf16.vlgmr.msra.gmra.mxu0 %vm415_vm0, %v385_v9 }
  0x76   : > { %3284 = vmatprep.mubr.msk.bf16.mxu0 %vm415_vm0, %v386_v10 }
  0x7d   : > { %3285 = vmatmul.mubr.msk.bf16.gmra.mxu0 %vm415_vm0, %v387_v15 }
  0x7e   : > { %3288 = vmatprep.mubr.msk.bf16.mxu0 %vm415_vm0, %v388_v16 }
  0x85   : > { %3289 = vmatmul.mubr.msk.bf16.gmra.mxu0 %vm415_vm0, %v389_v21 }
  0x86   : > { %3292 = vmatprep.mubr.msk.bf16.mxu0 %vm415_vm0, %v390_v22 }
  0x8d   : > { %3293 = vmatmul.mubr.msk.bf16.gmra.mxu0 %vm415_vm0, %v391_v25 }
 0x135   : > { %v3282_v26 = vpop.f32.mrf.mxu0 }
 0x136   : > { %v483_v1 = vadd.f32 %v3282_v26, %v3068_v29 }
 0x137   : > { %v474_v27 = vpop.f32.mrf.mxu0 }
 0x138   : > { %v475_v31 = vadd.f32 %v3068_v29, %v474_v27 }
 0x139   : > { %v3283_v28 = vpop.f32.mrf.mxu0 }
 0x13a   : > { %v486_v63 = vadd.f32 %v3283_v28, %v3068_v29 }
 0x13b   : > { %v477_v30 = vpop.f32.mrf.mxu0 }
 0x13c   : > { %v478_v32 = vadd.f32 %v3068_v29, %v477_v30  ;;  %v4510_v2 = vpack.c.bf16 %v486_v63, %v483_v1  ;;  %v4617_v63 = vld [vmem:[#allocation5 + $0x40] sm:$0xff] }
 0x13d   : > { %v3286_v33 = vpop.f32.mrf.mxu0 }
 0x13e   : > { %v4486_v34 = vpack.c.bf16 %v478_v32, %v475_v31  ;;  %v499_v62 = vadd.f32 %v3286_v33, %v3068_v29  ;;  %v4566_v31 = vld [vmem:[#allocation5] sm:$0xff] }
 0x13f   : > { %v490_v35 = vpop.f32.mrf.mxu0 }
 0x140   : > { %3312 = vmatprep.mubr.msk.bf16.mxu1 %vm585_vm1, %v4486_v34  ;;  %v491_v52 = vadd.f32 %v3068_v29, %v490_v35  ;;  %v4571_v35 = vld [vmem:[#allocation5 + $0x18] sm:$0xff] }
 0x141   : > { %v3287_v36 = vpop.f32.mrf.mxu0 }
 0x142   : > { %v502_v60 = vadd.f32 %v3287_v36, %v3068_v29 }
 0x143   : > { %v493_v37 = vpop.f32.mrf.mxu0 }
 0x144   : > { %v494_v49 = vadd.f32 %v3068_v29, %v493_v37  ;;  %v4506_v0 = vpack.c.bf16 %v502_v60, %v499_v62 }
 0x145   : > { %v3290_v38 = vpop.f32.mrf.mxu0 }
 0x146   : > { %v515_v41 = vadd.f32 %v3290_v38, %v3068_v29  ;;  %v4496_v56 = vpack.c.bf16 %v494_v49, %v491_v52  ;;  %v4596_v49 = vld [vmem:[#allocation5 + $0x28] sm:$0xff]  ;;  %v4601_v52 = vld [vmem:[#allocation5 + $0x38] sm:$0xff] }
 0x147   : > { %v506_v39 = vpop.f32.mrf.mxu0 }
 0x148   : > { %v507_v47 = vadd.f32 %v3068_v29, %v506_v39 }
 0x149   : > { %v3291_v40 = vpop.f32.mrf.mxu0 }
 0x14a   : > { %v518_v42 = vadd.f32 %v3291_v40, %v3068_v29  ;;  %v4581_v40 = vld [vmem:[#allocation5 + $0x8] sm:$0xff] }
 0x14b   : > { %v509_v43 = vpop.f32.mrf.mxu0 }
 0x14c   : > { %v4490_v44 = vpack.c.bf16 %v518_v42, %v515_v41  ;;  %v510_v45 = vadd.f32 %v3068_v29, %v509_v43  ;;  %v4583_v41 = vld [vmem:[#allocation5 + $0x30] sm:$0xff] }
 0x14d   : > { %v3294_v46 = vpop.f32.mrf.mxu0 }
 0x14e   : > { %579 = vrot.lane.b32.xlu1 %v4490_v44, %s4231_s16  ;;  %v4493_v50 = vpack.c.bf16 %v510_v45, %v507_v47  ;;  %v531_v53 = vadd.f32 %v3294_v46, %v3068_v29  ;;  %v4592_v47 = vld [vmem:[#allocation5 + $0x20] sm:$0xff] }
 0x14f   : > { %v522_v48 = vpop.f32.mrf.mxu0 }
 0x150   : > { %v523_v59 = vadd.f32 %v3068_v29, %v522_v48 }
 0x151   : > { %v3295_v51 = vpop.f32.mrf.mxu0 }
 0x152   : > { %v534_v54 = vadd.f32 %v3295_v51, %v3068_v29  ;;  %577 = vrot.lane.b32.xlu1 %v4493_v50, %s4231_s16 }
 0x153   : > { %v525_v55 = vpop.f32.mrf.mxu0 }
 0x154   : > { %v4498_v57 = vpack.c.bf16 %v534_v54, %v531_v53  ;;  %v526_v58 = vadd.f32 %v3068_v29, %v525_v55  ;;  %v4564_v29 = vld [vmem:[#allocation5 + $0x10] sm:$0xff] }
 0x156   : > { %583 = vrot.lane.b32.xlu0 %v4498_v57, %s4231_s16  ;;  %573 = vrot.lane.b32.xlu1 %v4496_v56, %s4231_s16  ;;  %v4502_v61 = vpack.c.bf16 %v526_v58, %v523_v59  ;;  %v4611_v58 = vld [vmem:[#allocation5 + $0x50] sm:$0xff] }
 0x15a   : > { %581 = vrot.lane.b32.xlu0 %v4502_v61, %s4231_s16  ;;  %569 = vrot.lane.b32.xlu1 %v4486_v34, %s4231_s16 }
 0x15e   : > { %575 = vrot.lane.b32.xlu0 %v4506_v0, %s4231_s16  ;;  %855 = vrot.lane.b32.xlu1 %v4496_v56, %s4232_s19 }
 0x162   : > { %571 = vrot.lane.b32.xlu0 %v4510_v2, %s4231_s16  ;;  %851 = vrot.lane.b32.xlu1 %v4486_v34, %s4232_s19 }
 0x166   : > { %865 = vrot.lane.b32.xlu0 %v4498_v57, %s4232_s19  ;;  %1038 = vrot.lane.b32.xlu1 %v4490_v44, %s4233_s22 }
 0x16a   : > { %861 = vrot.lane.b32.xlu0 %v4490_v44, %s4232_s19  ;;  %863 = vrot.lane.b32.xlu1 %v4502_v61, %s4232_s19 }
 0x16e   : > { %859 = vrot.lane.b32.xlu0 %v4493_v50, %s4232_s19 }
 0x172   : > { %857 = vrot.lane.b32.xlu0 %v4506_v0, %s4232_s19 }
 0x176   : > { %853 = vrot.lane.b32.xlu0 %v4510_v2, %s4232_s19 }
 0x17a   : > { %1042 = vrot.lane.b32.xlu0 %v4498_v57, %s4233_s22 }
 0x17e   : > { %1036 = vrot.lane.b32.xlu0 %v4493_v50, %s4233_s22 }
 0x182   : > { %1040 = vrot.lane.b32.xlu0 %v4502_v61, %s4233_s22 }
 0x1c0   : > { %v580_v3 = vpop.permute.xlu1 %579 }
 0x1c1   : > { %v626_v17 = vsel %vm585_vm1, %v580_v3, 0 }
 0x1c4   : > { %v578_v4 = vpop.permute.xlu1 %577 }
 0x1c5   : > { %v623_v21 = vsel %vm585_vm1, %v578_v4, 0 }
 0x1c8   : > { %v584_v5 = vpop.permute.xlu0 %583  ;;  %v574_v6 = vpop.permute.xlu1 %573 }
 0x1c9   : > { %3588 = vmatprep.subr.msk.bf16.mxu1 %vm585_vm1, %v584_v5  ;;  %v632_v7 = vsel %vm585_vm1, %v584_v5, 0  ;;  %v617_v25 = vsel %vm585_vm1, %v574_v6, 0 }
 0x1ca   : > { %3297 = vmatpush3.bf16.xpose.msra.mxu1 %v632_v7  ;;  %v4629_v7 = vld [vmem:[#allocation5 + $0x48] sm:$0xff] }
 0x1cc   : > { %v582_v8 = vpop.permute.xlu0 %581  ;;  %v570_v9 = vpop.permute.xlu1 %569 }
 0x1cd   : > { %3589 = vmatprep.subr.msk.bf16.mxu1 %vm585_vm1, %v582_v8  ;;  %v629_v12 = vsel %vm585_vm1, %v582_v8, 0  ;;  %v611_v28 = vsel %vm585_vm1, %v570_v9, 0 }
 0x1d0   : > { %v576_v10 = vpop.permute.xlu0 %575  ;;  %v856_v11 = vpop.permute.xlu1 %855 }
 0x1d1   : > { %v620_v23 = vsel %vm585_vm1, %v576_v10, 0 }
 0x1d2   : > { %3299 = vmatpush3.bf16.xpose.msra.mxu1 %v629_v12 }
 0x1d3   : > { %3590 = vmatprep.subr.msk.bf16.mxu1 %vm585_vm1, %v580_v3  ;;  %v4623_v3 = vld [vmem:[#allocation5 + $0x58] sm:$0xff] }
 0x1d4   : > { %v572_v13 = vpop.permute.xlu0 %571  ;;  %v852_v14 = vpop.permute.xlu1 %851 }
 0x1d5   : > { %v614_v27 = vsel %vm585_vm1, %v572_v13, 0 }
 0x1d8   : > { %v866_v15 = vpop.permute.xlu0 %865  ;;  %v4533_v16 = vpop.permute.xlu1 %1038 }
 0x1d9   : > { %3328 = vmatprep.subr.bf16.mxu0 %v866_v15 }
 0x1da   : > { %3301 = vmatpush3.bf16.xpose.msra.mxu1 %v626_v17  ;;  %3329 = vmatpush3.bf16.msra.mxu0 %v866_v15  ;;  %v4651_v15 = vld [vmem:[#allocation5 + $0x78] sm:$0xff] }
 0x1db   : > { %3591 = vmatprep.subr.msk.bf16.mxu1 %vm585_vm1, %v578_v4 }
 0x1dc   : > { %v862_v18 = vpop.permute.xlu0 %861  ;;  %v864_v19 = vpop.permute.xlu1 %863 }
 0x1dd   : > { %3330 = vmatprep.subr.bf16.mxu0 %v864_v19 }
 0x1de   : > { %3331 = vmatpush3.bf16.msra.mxu0 %v864_v19 }
 0x1df   : > { %3332 = vmatprep.subr.bf16.mxu0 %v862_v18 }
 0x1e0   : > { %v860_v20 = vpop.permute.xlu0 %859 }
 0x1e2   : > { %3303 = vmatpush3.bf16.xpose.msra.mxu1 %v623_v21  ;;  %3333 = vmatpush3.bf16.msra.mxu0 %v862_v18 }
 0x1e3   : > { %3592 = vmatprep.subr.msk.bf16.mxu1 %vm585_vm1, %v576_v10  ;;  %3334 = vmatprep.subr.bf16.mxu0 %v860_v20 }
 0x1e4   : > { %v858_v22 = vpop.permute.xlu0 %857 }
 0x1e6   : > { %3335 = vmatpush3.bf16.msra.mxu0 %v860_v20  ;;  %v4658_v20 = vld [vmem:[#allocation5 + $0x68] sm:$0xff] }
 0x1e7   : > { %3336 = vmatprep.subr.bf16.mxu0 %v858_v22 }
 0x1e8   : > { %v854_v24 = vpop.permute.xlu0 %853 }
 0x1ea   : > { %3305 = vmatpush3.bf16.xpose.msra.mxu1 %v620_v23  ;;  %3337 = vmatpush3.bf16.msra.mxu0 %v858_v22 }
 0x1eb   : > { %3593 = vmatprep.subr.msk.bf16.mxu1 %vm585_vm1, %v574_v6  ;;  %3338 = vmatprep.subr.bf16.mxu0 %v856_v11 }
 0x1ec   : > { %v4543_v26 = vpop.permute.xlu0 %1042 }
 0x1ee   : > { %3339 = vmatpush3.bf16.msra.mxu0 %v856_v11 }
 0x1ef   : > { %3340 = vmatprep.subr.bf16.mxu0 %v854_v24 }
 0x1f0   : > { %v4681_v22 = vpop.permute.xlu0 %1036 }
 0x1f2   : > { %3307 = vmatpush3.bf16.xpose.msra.mxu1 %v617_v25  ;;  %3341 = vmatpush3.bf16.msra.mxu0 %v854_v24 }
 0x1f3   : > { %3594 = vmatprep.subr.msk.bf16.mxu1 %vm585_vm1, %v572_v13  ;;  %3342 = vmatprep.subr.bf16.mxu0 %v852_v14  ;;  %v4645_v13 = vld [vmem:[#allocation5 + $0x60] sm:$0xff] }
 0x1f4   : > { %v4688_v23 = vpop.permute.xlu0 %1040 }
 0x1f6   : > { %3343 = vmatpush3.bf16.msra.mxu0 %v852_v14 }
 0x1f7   : > { %3596 = vmatprep.subr.msk.bf16.mxu0 %vm585_vm1, %v4543_v26 }
 0x1fa   : > { %3309 = vmatpush3.bf16.xpose.msra.mxu1 %v614_v27 }
 0x1fb   : > { %3595 = vmatprep.subr.msk.bf16.mxu1 %vm585_vm1, %v570_v9  ;;  %v4640_v9 = vld [vmem:[#allocation5 + $0x70] sm:$0xff] }
 0x202   : > { %3311 = vmatpush3.bf16.xpose.msra.mxu1 %v611_v28 }
 0x209   : > { %3313 = vmatmul.mubr.msk.bf16.vlgmr.msra.gmra.mxu1 %vm585_vm1, %v4510_v2 }
 0x20a   : > { %3316 = vmatprep.mubr.msk.bf16.mxu1 %vm585_vm1, %v4496_v56 }
 0x211   : > { %3317 = vmatmul.mubr.msk.bf16.gmra.mxu1 %vm585_vm1, %v4506_v0 }
 0x212   : > { %3320 = vmatprep.mubr.msk.bf16.mxu1 %vm585_vm1, %v4493_v50 }
 0x219   : > { %3321 = vmatmul.mubr.msk.bf16.gmra.mxu1 %vm585_vm1, %v4490_v44 }
 0x21a   : > { %3324 = vmatprep.mubr.msk.bf16.mxu1 %vm585_vm1, %v4502_v61 }
 0x221   : > { %3325 = vmatmul.mubr.msk.bf16.gmra.mxu1 %vm585_vm1, %v4498_v57 }
 0x2c9   : > { %v3314_v30 = vpop.f32.mrf.mxu1 }
 0x2ca   : > { %v4569_v32 = vadd.f32 %v3314_v30, %v4564_v29 }
 0x2cb   : > { %v668_v33 = vpop.f32.mrf.mxu1 }
 0x2cc   : > { %v4574_v36 = vadd.f32 %v668_v33, %v4566_v31  ;;  %735 = vmax.xlane.f32.xlu1 %v4569_v32 }
 0x2cd   : > { %v3315_v37 = vpop.f32.mrf.mxu1 }
 0x2ce   : > { %v4578_v38 = vadd.f32 %v3315_v37, %v4571_v35  ;;  %731 = vmax.xlane.f32.xlu0 %v4574_v36 }
 0x2cf   : > { %v671_v39 = vpop.f32.mrf.mxu1 }
 0x2d0   : > { %737 = vmax.xlane.f32.xlu1 %v4578_v38  ;;  %v4587_v43 = vadd.f32 %v671_v39, %v4581_v40 }
 0x2d1   : > { %v3318_v42 = vpop.f32.mrf.mxu1 }
 0x2d2   : > { %v4590_v45 = vadd.f32 %v3318_v42, %v4583_v41 }
 0x2d3   : > { %v684_v46 = vpop.f32.mrf.mxu1 }
 0x2d4   : > { %733 = vmax.xlane.f32.xlu1 %v4587_v43  ;;  %743 = vmax.xlane.f32.xlu0 %v4590_v45  ;;  %v4599_v51 = vadd.f32 %v684_v46, %v4592_v47 }
 0x2d5   : > { %v3319_v48 = vpop.f32.mrf.mxu1 }
 0x2d6   : > { %v4608_v55 = vadd.f32 %v3319_v48, %v4601_v52 }
 0x2d7   : > { %v687_v53 = vpop.f32.mrf.mxu1 }
 0x2d8   : > { %v4604_v54 = vadd.f32 %v687_v53, %v4596_v49  ;;  %739 = vmax.xlane.f32.xlu1 %v4599_v51 }
 0x2d9   : > { %v3322_v59 = vpop.f32.mrf.mxu1 }
 0x2da   : > { %741 = vmax.xlane.f32.xlu0 %v4604_v54  ;;  %v4615_v60 = vadd.f32 %v3322_v59, %v4611_v58 }
 0x2db   : > { %v700_v62 = vpop.f32.mrf.mxu1 }
 0x2dc   : > { %745 = vmax.xlane.f32.xlu1 %v4608_v55  ;;  %v4621_v1 = vadd.f32 %v700_v62, %v4617_v63 }
 0x2dd   : > { %v3323_v4 = vpop.f32.mrf.mxu1 }
 0x2de   : > { %v4627_v5 = vadd.f32 %v3323_v4, %v4623_v3 }
 0x2df   : > { %v703_v6 = vpop.f32.mrf.mxu1 }
 0x2e0   : > { %751 = vmax.xlane.f32.xlu1 %v4615_v60  ;;  %v4633_v8 = vadd.f32 %v703_v6, %v4629_v7 }
 0x2e1   : > { %v3326_v10 = vpop.f32.mrf.mxu1 }
 0x2e2   : > { %v4643_v11 = vadd.f32 %v3326_v10, %v4640_v9 }
 0x2e3   : > { %v716_v12 = vpop.f32.mrf.mxu1 }
 0x2e4   : > { %747 = vmax.xlane.f32.xlu1 %v4621_v1  ;;  %v4649_v14 = vadd.f32 %v716_v12, %v4645_v13 }
 0x2e5   : > { %v3327_v17 = vpop.f32.mrf.mxu1 }
 0x2e6   : > { %v4655_v18 = vadd.f32 %v3327_v17, %v4651_v15 }
 0x2e7   : > { %v719_v19 = vpop.f32.mrf.mxu1 }
 0x2e8   : > { %753 = vmax.xlane.f32.xlu1 %v4627_v5  ;;  %v4661_v21 = vadd.f32 %v719_v19, %v4658_v20 }
 0x2ec   : > { %749 = vmax.xlane.f32.xlu1 %v4633_v8 }
 0x2f0   : > { %1032 = vrot.lane.b32.xlu0 %v4496_v56, %s4233_s22 }
 0x2fd   : > { %1034 = vrot.lane.b32.xlu1 %v4506_v0, %s4233_s22 }
 0x30f   : > { %759 = vmax.xlane.f32.xlu0 %v4643_v11 }
 0x313   : > { %755 = vmax.xlane.f32.xlu0 %v4649_v14 }
 0x317   : > { %761 = vmax.xlane.f32.xlu0 %v4655_v18 }
 0x321   : > { %757 = vmax.xlane.f32.xlu1 %v4661_v21 }
 0x32d   : > { %1030 = vrot.lane.b32.xlu0 %v4510_v2, %s4233_s22 }
 0x331   : > { %1012 = vrot.lane.b32.xlu0 %v4486_v34, %s4234_s21 }
 0x332   : > { %1028 = vrot.lane.b32.xlu1 %v4486_v34, %s4233_s22 }
 0x335   : > { %1016 = vrot.lane.b32.xlu0 %v4496_v56, %s4234_s21 }
 0x336   : > { %1014 = vrot.lane.b32.xlu1 %v4510_v2, %s4234_s21 }
 0x339   : > { %1020 = vrot.lane.b32.xlu0 %v4493_v50, %s4234_s21 }
 0x33a   : > { %1018 = vrot.lane.b32.xlu1 %v4506_v0, %s4234_s21 }
 0x33d   : > { %1024 = vrot.lane.b32.xlu0 %v4502_v61, %s4234_s21 }
 0x33e   : > { %1022 = vrot.lane.b32.xlu1 %v4490_v44, %s4234_s21 }
 0x341   : > { %1323 = vrot.lane.b32.xlu0 %v4498_v57, %s4235_s10 }
 0x342   : > { %1026 = vrot.lane.b32.xlu1 %v4498_v57, %s4234_s21 }
 0x345   : > { %1319 = vrot.lane.b32.xlu0 %v4490_v44, %s4235_s10 }
 0x346   : > { %1321 = vrot.lane.b32.xlu1 %v4502_v61, %s4235_s10 }
 0x349   : > { %1317 = vrot.lane.b32.xlu0 %v4493_v50, %s4235_s10 }
 0x34a   : > { %1313 = vrot.lane.b32.xlu1 %v4496_v56, %s4235_s10 }
 0x34d   : > { %1315 = vrot.lane.b32.xlu0 %v4506_v0, %s4235_s10 }
 0x34e   : > { %1309 = vrot.lane.b32.xlu1 %v4486_v34, %s4235_s10 }
 0x351   : > { %1311 = vrot.lane.b32.xlu0 %v4510_v2, %s4235_s10 }
 0x352   : > { %1496 = vrot.lane.b32.xlu1 %v4490_v44, %s4236_s24 }
 0x355   : > { %v736_v24 = vpop.xlane.xlu1 %735  ;;  %1500 = vrot.lane.b32.xlu0 %v4498_v57, %s4236_s24 }
 0x356   : > { %v765_v33 = vsub.f32 %v4569_v32, %v736_v24 }
 0x357   : > { %v732_v25 = vpop.xlane.xlu0 %731 }
 0x358   : > { %v763_v27 = vsub.f32 %v4574_v36, %v732_v25  ;;  %v783_v53 = vmul.f32 1.442695, %v765_v33 }
 0x359   : > { %v738_v28 = vpop.xlane.xlu1 %737  ;;  %1498 = vrot.lane.b32.xlu0 %v4502_v61, %s4236_s24 }
 0x35a   : > { %v766_v30 = vsub.f32 %v4578_v38, %v738_v28  ;;  %v779_v37 = vmul.f32 1.442695, %v763_v27 }
 0x35c   : > { %v785_v39 = vmul.f32 1.442695, %v766_v30  ;;  %3722 = vpow2.f32 %v779_v37 }
 0x35d   : > { %v734_v42 = vpop.xlane.xlu1 %733  ;;  %1494 = vrot.lane.b32.xlu0 %v4493_v50, %s4236_s24  ;;  %v744_v48 = vpop.xlane.xlu0 %743 }
 0x35e   : > { %v764_v46 = vsub.f32 %v4587_v43, %v734_v42  ;;  %3724 = vpow2.f32 %v785_v39  ;;  %v769_v59 = vsub.f32 %v4590_v45, %v744_v48  ;;  %v1090_v42 = vsel %vm585_vm1, %v4543_v26, 0 }
 0x360   : > { %v781_v36 = vmul.f32 1.442695, %v764_v46  ;;  %v791_v10 = vmul.f32 1.442695, %v769_v59 }
 0x361   : > { %v740_v62 = vpop.xlane.xlu1 %739 }
 0x362   : > { %3726 = vpow2.f32 %v781_v36  ;;  %v767_v38 = vsub.f32 %v4599_v51, %v740_v62 }
 0x363   : > { %3728 = vpow2.f32 %v783_v53  ;;  %v742_v32 = vpop.xlane.xlu0 %741 }
 0x364   : > { %v787_v4 = vmul.f32 1.442695, %v767_v38  ;;  %v768_v6 = vsub.f32 %v4604_v54, %v742_v32 }
 0x365   : > { %v746_v12 = vpop.xlane.xlu1 %745 }
 0x366   : > { %v789_v17 = vmul.f32 1.442695, %v768_v6  ;;  %v770_v43 = vsub.f32 %v4608_v55, %v746_v12  ;;  %3730 = vpow2.f32 %v787_v4  ;;  %v1087_v4 = vsel %vm585_vm1, %v4688_v23, 0 }
 0x368   : > { %3732 = vpow2.f32 %v789_v17  ;;  %v793_v19 = vmul.f32 1.442695, %v770_v43 }
 0x369   : > { %3734 = vpow2.f32 %v791_v10  ;;  %v752_v24 = vpop.xlane.xlu1 %751  ;;  %v4704_v45 = vpop.eup %3722 }
 0x36a   : > { %3736 = vpow2.f32 %v793_v19  ;;  %6013 = vst [vmem:[#allocation17_spill] sm:$0xff] %v4704_v45  ;;  %v773_v39 = vsub.f32 %v4615_v60, %v752_v24 }
 0x36b   : > { %v4706_v51 = vpop.eup %3724 }
 0x36c   : > { %6014 = vst [vmem:[#allocation18_spill] sm:$0xff] %v4706_v51  ;;  %v799_v26 = vmul.f32 1.442695, %v773_v39 }
 0x36d   : > { %v748_v25 = vpop.xlane.xlu1 %747 }
 0x36e   : > { %v771_v54 = vsub.f32 %v4621_v1, %v748_v25  ;;  %v1033_v25 = vpop.permute.xlu0 %1032 }
 0x36f   : > { %v4708_v27 = vpop.eup %3726 }
 0x370   : > { %6015 = vst [vmem:[#allocation19_spill] sm:$0xff] %v4708_v27  ;;  %v4710_v28 = vpop.eup %3728  ;;  %v843_v55 = vpack.c.bf16 %v4708_v27, %v4704_v45  ;;  %v795_v48 = vmul.f32 1.442695, %v771_v54 }
 0x371   : > { %6016 = vst [vmem:[#allocation20_spill] sm:$0xff] %v4710_v28  ;;  %v754_v30 = vpop.xlane.xlu1 %753  ;;  %v844_v33 = vpack.c.bf16 %v4706_v51, %v4710_v28 }
 0x372   : > { %v774_v37 = vsub.f32 %v4627_v5, %v754_v30  ;;  %3344 = vmatprep.mubr.bf16.mxu0 %v843_v55  ;;  %3738 = vpow2.f32 %v795_v48  ;;  %v1075_v55 = vsel %vm585_vm1, %v1033_v25, 0 }
 0x373   : > { %3345 = vmatmul.mubr.bf16.vlgmr.msra.gmra.mxu0 %v844_v33  ;;  %v4721_v46 = vpop.eup %3730 }
 0x374   : > { %6017 = vst [vmem:[#allocation21_spill] sm:$0xff] %v4721_v46  ;;  %3361 = vmatpush3.bf16.xpose.msra.mxu0 %v1090_v42  ;;  %v801_v53 = vmul.f32 1.442695, %v774_v37 }
 0x375   : > { %v4723_v1 = vpop.eup %3732  ;;  %3597 = vmatprep.subr.msk.bf16.mxu0 %vm585_vm1, %v4688_v23  ;;  %v750_v36 = vpop.xlane.xlu1 %749 }
 0x376   : > { %6018 = vst [vmem:[#allocation22_spill] sm:$0xff] %v4723_v1  ;;  %v4727_v59 = vpop.eup %3734  ;;  %v772_v5 = vsub.f32 %v4633_v8, %v750_v36  ;;  %v845_v60 = vpack.c.bf16 %v4723_v1, %v4721_v46  ;;  %3740 = vpow2.f32 %v801_v53  ;;  %v1084_v8 = vsel %vm585_vm1, %v4533_v16, 0  ;;  %v5152_v1 = vld [vmem:[#allocation5 + $0x68] sm:$0xff] }
 0x377   : > { %6019 = vst [vmem:[#allocation23_spill] sm:$0xff] %v4727_v59  ;;  %v4732_v62 = vpop.eup %3736 }
 0x378   : > { %6020 = vst [vmem:[#allocation24_spill] sm:$0xff] %v4732_v62  ;;  %v797_v38 = vmul.f32 1.442695, %v772_v5  ;;  %3348 = vmatprep.mubr.bf16.mxu0 %v845_v60  ;;  %v846_v32 = vpack.c.bf16 %v4732_v62, %v4727_v59 }
 0x379   : > { %v1035_v19 = vpop.permute.xlu1 %1034 }
 0x37a   : > { %3742 = vpow2.f32 %v797_v38  ;;  %v1078_v24 = vsel %vm585_vm1, %v1035_v19, 0 }
 0x37b   : > { %3744 = vpow2.f32 %v799_v26  ;;  %3349 = vmatmul.mubr.bf16.gmra.mxu0 %v846_v32 }
 0x37c   : > { %3363 = vmatpush3.bf16.xpose.msra.mxu0 %v1087_v4 }
 0x37d   : > { %3598 = vmatprep.subr.msk.bf16.mxu0 %vm585_vm1, %v4533_v16  ;;  %v1081_v16 = vsel %vm585_vm1, %v4681_v22, 0 }
 0x37f   : > { %v4742_v6 = vpop.eup %3738 }
 0x380   : > { %6021 = vst [vmem:[#allocation25_spill] sm:$0xff] %v4742_v6 }
 0x383   : > { %v4746_v10 = vpop.eup %3740 }
 0x384   : > { %3365 = vmatpush3.bf16.xpose.msra.mxu0 %v1084_v8  ;;  %6022 = vst [vmem:[#allocation26_spill] sm:$0xff] %v4746_v10 }
 0x385   : > { %3599 = vmatprep.subr.msk.bf16.mxu0 %vm585_vm1, %v4681_v22 }
 0x387   : > { %v4748_v12 = vpop.eup %3742 }
 0x388   : > { %6023 = vst [vmem:[#allocation27_spill] sm:$0xff] %v4748_v12  ;;  %v4750_v17 = vpop.eup %3744  ;;  %v847_v23 = vpack.c.bf16 %v4748_v12, %v4742_v6  ;;  %v5146_v6 = vld [vmem:[#allocation5 + $0x78] sm:$0xff] }
 0x389   : > { %6024 = vst [vmem:[#allocation28_spill] sm:$0xff] %v4750_v17  ;;  %v848_v43 = vpack.c.bf16 %v4746_v10, %v4750_v17  ;;  %v5140_v17 = vld [vmem:[#allocation5 + $0x60] sm:$0xff] }
 0x38a   : > { %3352 = vmatprep.mubr.bf16.mxu0 %v847_v23 }
 0x38b   : > { %3353 = vmatmul.mubr.bf16.gmra.mxu0 %v848_v43 }
 0x38c   : > { %3367 = vmatpush3.bf16.xpose.msra.mxu0 %v1081_v16 }
 0x38d   : > { %3600 = vmatprep.subr.msk.bf16.mxu0 %vm585_vm1, %v1035_v19 }
 0x394   : > { %3369 = vmatpush3.bf16.xpose.msra.mxu0 %v1078_v24 }
 0x395   : > { %3601 = vmatprep.subr.msk.bf16.mxu0 %vm585_vm1, %v1033_v25 }
 0x398   : > { %v760_v54 = vpop.xlane.xlu0 %759 }
 0x399   : > { %v777_v48 = vsub.f32 %v4643_v11, %v760_v54 }
 0x39b   : > { %v807_v38 = vmul.f32 1.442695, %v777_v48 }
 0x39c   : > { %3371 = vmatpush3.bf16.xpose.msra.mxu0 %v1075_v55  ;;  %v756_v30 = vpop.xlane.xlu0 %755 }
 0x39d   : > { %v775_v39 = vsub.f32 %v4649_v14, %v756_v30 }
 0x39f   : > { %v803_v36 = vmul.f32 1.442695, %v775_v39 }
 0x3a0   : > { %v762_v33 = vpop.xlane.xlu0 %761 }
 0x3a1   : > { %v778_v42 = vsub.f32 %v4655_v18, %v762_v33  ;;  %3746 = vpow2.f32 %v803_v36 }
 0x3a3   : > { %v809_v5 = vmul.f32 1.442695, %v778_v42 }
 0x3a4   : > { %v1031_v37 = vpop.permute.xlu0 %1030 }
 0x3a5   : > { %3602 = vmatprep.subr.msk.bf16.mxu0 %vm585_vm1, %v1031_v37  ;;  %v1072_v22 = vsel %vm585_vm1, %v1031_v37, 0  ;;  %3748 = vpow2.f32 %v809_v5 }
 0x3a6   : > { %3373 = vmatpush3.bf16.xpose.msra.mxu0 %v1072_v22 }
 0x3a8   : > { %v1013_v53 = vpop.permute.xlu0 %1012 }
 0x3aa   : > { %v758_v60 = vpop.xlane.xlu1 %757 }
 0x3ab   : > { %v776_v26 = vsub.f32 %v4661_v21, %v758_v60 }
 0x3ac   : > { %v1017_v32 = vpop.permute.xlu0 %1016 }
 0x3ad   : > { %v805_v4 = vmul.f32 1.442695, %v776_v26 }
 0x3ae   : > { %v1029_v14 = vpop.permute.xlu1 %1028  ;;  %v4770_v21 = vpop.eup %3746 }
 0x3af   : > { %3750 = vpow2.f32 %v805_v4  ;;  %3603 = vmatprep.subr.msk.bf16.mxu0 %vm585_vm1, %v1029_v14  ;;  %v1069_v18 = vsel %vm585_vm1, %v1029_v14, 0  ;;  %6025 = vst [vmem:[#allocation29_spill] sm:$0xff] %v4770_v21 }
 0x3b0   : > { %3752 = vpow2.f32 %v807_v38  ;;  %3375 = vmatpush3.bf16.xpose.msra.mxu0 %v1069_v18  ;;  %v1021_v11 = vpop.permute.xlu0 %1020 }
 0x3b2   : > { %v1015_v8 = vpop.permute.xlu1 %1014  ;;  %v4772_v24 = vpop.eup %3748 }
 0x3b3   : > { %6026 = vst [vmem:[#allocation30_spill] sm:$0xff] %v4772_v24 }
 0x3b4   : > { %v1025_v23 = vpop.permute.xlu0 %1024 }
 0x3b6   : > { %v1019_v43 = vpop.permute.xlu1 %1018 }
 0x3b8   : > { %v1324_v16 = vpop.permute.xlu0 %1323 }
 0x3b9   : > { %3392 = vmatprep.subr.bf16.mxu1 %v1324_v16 }
 0x3ba   : > { %v1023_v19 = vpop.permute.xlu1 %1022  ;;  %3393 = vmatpush3.bf16.msra.mxu1 %v1324_v16 }
 0x3bc   : > { %v4774_v25 = vpop.eup %3750  ;;  %v1320_v37 = vpop.permute.xlu0 %1319 }
 0x3bd   : > { %6027 = vst [vmem:[#allocation31_spill] sm:$0xff] %v4774_v25  ;;  %v4776_v54 = vpop.eup %3752  ;;  %v849_v55 = vpack.c.bf16 %v4774_v25, %v4770_v21  ;;  %v5134_v21 = vld [vmem:[#allocation5 + $0x70] sm:$0xff] }
 0x3be   : > { %6028 = vst [vmem:[#allocation32_spill] sm:$0xff] %v4776_v54  ;;  %v1027_v30 = vpop.permute.xlu1 %1026  ;;  %v850_v33 = vpack.c.bf16 %v4772_v24, %v4776_v54  ;;  %v5118_v24 = vld [vmem:[#allocation5 + $0x58] sm:$0xff] }
 0x3bf   : > { %3356 = vmatprep.mubr.bf16.mxu0 %v849_v55 }
 0x3c0   : > { %3357 = vmatmul.mubr.bf16.gmra.mxu0 %v850_v33  ;;  %v1318_v22 = vpop.permute.xlu0 %1317 }
 0x3c1   : > { %3376 = vmatprep.mubr.msk.bf16.mxu0 %vm585_vm1, %v1013_v53 }
 0x3c2   : > { %v1322_v39 = vpop.permute.xlu1 %1321 }
 0x3c3   : > { %3394 = vmatprep.subr.bf16.mxu1 %v1322_v39 }
 0x3c4   : > { %3395 = vmatpush3.bf16.msra.mxu1 %v1322_v39  ;;  %v1316_v42 = vpop.permute.xlu0 %1315 }
 0x3c5   : > { %3396 = vmatprep.subr.bf16.mxu1 %v1320_v37 }
 0x3c6   : > { %v1314_v48 = vpop.permute.xlu1 %1313 }
 0x3c8   : > { %3377 = vmatmul.mubr.msk.bf16.vlgmr.msra.gmra.mxu0 %vm585_vm1, %v1015_v8  ;;  %3397 = vmatpush3.bf16.msra.mxu1 %v1320_v37  ;;  %v1312_v53 = vpop.permute.xlu0 %1311 }
 0x3c9   : > { %3380 = vmatprep.mubr.msk.bf16.mxu0 %vm585_vm1, %v1017_v32  ;;  %3398 = vmatprep.subr.bf16.mxu1 %v1318_v22 }
 0x3ca   : > { %v1310_v36 = vpop.permute.xlu1 %1309 }
 0x3cc   : > { %3399 = vmatpush3.bf16.msra.mxu1 %v1318_v22  ;;  %v4789_v5 = vpop.permute.xlu0 %1500 }
 0x3cd   : > { %3400 = vmatprep.subr.bf16.mxu1 %v1316_v42 }
 0x3d0   : > { %3381 = vmatmul.mubr.msk.bf16.gmra.mxu0 %vm585_vm1, %v1019_v43  ;;  %3401 = vmatpush3.bf16.msra.mxu1 %v1316_v42 }
 0x3d1   : > { %3384 = vmatprep.mubr.msk.bf16.mxu0 %vm585_vm1, %v1021_v11  ;;  %3402 = vmatprep.subr.bf16.mxu1 %v1314_v48 }
 0x3d4   : > { %3403 = vmatpush3.bf16.msra.mxu1 %v1314_v48 }
 0x3d5   : > { %3404 = vmatprep.subr.bf16.mxu1 %v1312_v53 }
 0x3d8   : > { %3385 = vmatmul.mubr.msk.bf16.gmra.mxu0 %vm585_vm1, %v1023_v19  ;;  %3405 = vmatpush3.bf16.msra.mxu1 %v1312_v53 }
 0x3d9   : > { %3388 = vmatprep.mubr.msk.bf16.mxu0 %vm585_vm1, %v1025_v23  ;;  %3406 = vmatprep.subr.bf16.mxu1 %v1310_v36 }
 0x3dc   : > { %3407 = vmatpush3.bf16.msra.mxu1 %v1310_v36 }
 0x3dd   : > { %3604 = vmatprep.subr.msk.bf16.mxu1 %vm585_vm1, %v4789_v5 }
 0x3e0   : > { %3389 = vmatmul.mubr.msk.bf16.gmra.mxu0 %vm585_vm1, %v1027_v30 }
 0x433   : > { %v4794_v60 = vpop.f32.mrf.mxu0 }
 0x434   : > { %6029 = vst [vmem:[#allocation33_spill] sm:$0xff] %v4794_v60  ;;  %v5063_v60 = vld [vmem:[#allocation5] sm:$0xff] }
 0x435   : > { %v4796_v26 = vpop.f32.mrf.mxu0 }
 0x436   : > { %6030 = vst [vmem:[#allocation34_spill] sm:$0xff] %v4796_v26  ;;  %v5076_v26 = vld [vmem:[#allocation5 + $0x8] sm:$0xff] }
 0x437   : > { %v4798_v38 = vpop.f32.mrf.mxu0 }
 0x438   : > { %6031 = vst [vmem:[#allocation35_spill] sm:$0xff] %v4798_v38 }
 0x439   : > { %v4800_v32 = vpop.f32.mrf.mxu0 }
 0x43a   : > { %6032 = vst [vmem:[#allocation36_spill] sm:$0xff] %v4800_v32 }
 0x43b   : > { %v4802_v4 = vpop.f32.mrf.mxu0 }
 0x43c   : > { %6033 = vst [vmem:[#allocation37_spill] sm:$0xff] %v4802_v4 }
 0x43d   : > { %v4804_v14 = vpop.f32.mrf.mxu0 }
 0x43e   : > { %6034 = vst [vmem:[#allocation38_spill] sm:$0xff] %v4804_v14 }
 0x43f   : > { %v4806_v18 = vpop.f32.mrf.mxu0 }
 0x440   : > { %6035 = vst [vmem:[#allocation39_spill] sm:$0xff] %v4806_v18 }
 0x441   : > { %v4808_v11 = vpop.f32.mrf.mxu0 }
 0x442   : > { %6036 = vst [vmem:[#allocation40_spill] sm:$0xff] %v4808_v11  ;;  %v5058_v11 = vld [vmem:[#allocation5 + $0x10] sm:$0xff] }
 0x44b   : > { %v4810_v8 = vpop.f32.mrf.mxu0 }
 0x44c   : > { %6037 = vst [vmem:[#allocation41_spill] sm:$0xff] %v4810_v8 }
 0x44d   : > { %v4812_v23 = vpop.f32.mrf.mxu0 }
 0x44e   : > { %6038 = vst [vmem:[#allocation42_spill] sm:$0xff] %v4812_v23 }
 0x44f   : > { %v4814_v43 = vpop.f32.mrf.mxu0 }
 0x450   : > { %6039 = vst [vmem:[#allocation43_spill] sm:$0xff] %v4814_v43 }
 0x451   : > { %v4816_v16 = vpop.f32.mrf.mxu0 }
 0x452   : > { %6040 = vst [vmem:[#allocation44_spill] sm:$0xff] %v4816_v16 }
 0x480   : > { %v4818_v19 = vpop.f32.mrf.mxu0 }
 0x481   : > { %6041 = vst [vmem:[#allocation45_spill] sm:$0xff] %v4818_v19 }
 0x482   : > { %v4820_v55 = vpop.f32.mrf.mxu0 }
 0x483   : > { %6042 = vst [vmem:[#allocation46_spill] sm:$0xff] %v4820_v55 }
 0x484   : > { %v4822_v30 = vpop.f32.mrf.mxu0 }
 0x485   : > { %6043 = vst [vmem:[#allocation47_spill] sm:$0xff] %v4822_v30 }
 0x486   : > { %v4824_v33 = vpop.f32.mrf.mxu0 }
 0x487   : > { %6044 = vst [vmem:[#allocation48_spill] sm:$0xff] %v4824_v33 }
 0x488   : > { %v3378_v37 = vpop.f32.mrf.mxu0 }
 0x489   : > { %v4827_v39 = vadd.f32 %v3378_v37, %v4564_v29 }
 0x48a   : > { %v1126_v22 = vpop.f32.mrf.mxu0 }
 0x48b   : > { %v4830_v42 = vadd.f32 %v1126_v22, %v4566_v31  ;;  %1193 = vmax.xlane.f32.xlu1 %v4827_v39 }
 0x48c   : > { %v3379_v48 = vpop.f32.mrf.mxu0 }
 0x48d   : > { %v4834_v53 = vadd.f32 %v3379_v48, %v4571_v35  ;;  %1189 = vmax.xlane.f32.xlu0 %v4830_v42 }
 0x48e   : > { %v1129_v36 = vpop.f32.mrf.mxu0 }
 0x48f   : > { %1195 = vmax.xlane.f32.xlu1 %v4834_v53  ;;  %v4839_v55 = vadd.f32 %v1129_v36, %v4581_v40 }
 0x490   : > { %v3382_v19 = vpop.f32.mrf.mxu0 }
 0x491   : > { %v4842_v29 = vadd.f32 %v3382_v19, %v4583_v41 }
 0x492   : > { %v1142_v31 = vpop.f32.mrf.mxu0 }
 0x493   : > { %1191 = vmax.xlane.f32.xlu1 %v4839_v55  ;;  %1201 = vmax.xlane.f32.xlu0 %v4842_v29  ;;  %v4847_v35 = vadd.f32 %v1142_v31, %v4592_v47 }
 0x494   : > { %v3383_v37 = vpop.f32.mrf.mxu0 }
 0x495   : > { %v4854_v40 = vadd.f32 %v3383_v37, %v4601_v52 }
 0x496   : > { %v1145_v22 = vpop.f32.mrf.mxu0 }
 0x497   : > { %v4850_v48 = vadd.f32 %v1145_v22, %v4596_v49  ;;  %1197 = vmax.xlane.f32.xlu1 %v4847_v35 }
 0x498   : > { %v3386_v41 = vpop.f32.mrf.mxu0 }
 0x499   : > { %1199 = vmax.xlane.f32.xlu0 %v4850_v48  ;;  %v4859_v19 = vadd.f32 %v3386_v41, %v4611_v58 }
 0x49a   : > { %v1158_v36 = vpop.f32.mrf.mxu0 }
 0x49b   : > { %1203 = vmax.xlane.f32.xlu1 %v4854_v40  ;;  %v4863_v47 = vadd.f32 %v1158_v36, %v4617_v63 }
 0x49c   : > { %v3387_v49 = vpop.f32.mrf.mxu0 }
 0x49d   : > { %v4867_v52 = vadd.f32 %v3387_v49, %v4623_v3 }
 0x49e   : > { %v1161_v31 = vpop.f32.mrf.mxu0 }
 0x49f   : > { %1209 = vmax.xlane.f32.xlu1 %v4859_v19  ;;  %v4871_v37 = vadd.f32 %v1161_v31, %v4629_v7 }
 0x4a0   : > { %v3390_v58 = vpop.f32.mrf.mxu0 }
 0x4a1   : > { %v4879_v63 = vadd.f32 %v3390_v58, %v4640_v9  ;;  %v4911_v9 = vpop.permute.xlu0 %1498 }
 0x4a2   : > { %v1174_v3 = vpop.f32.mrf.mxu0 }
 0x4a3   : > { %1205 = vmax.xlane.f32.xlu1 %v4863_v47  ;;  %v4883_v22 = vadd.f32 %v1174_v3, %v4645_v13  ;;  %v4915_v13 = vpop.permute.xlu1 %1496 }
 0x4a4   : > { %v3391_v7 = vpop.f32.mrf.mxu0 }
 0x4a5   : > { %v4887_v41 = vadd.f32 %v3391_v7, %v4651_v15  ;;  %v4920_v15 = vpop.permute.xlu0 %1494 }
 0x4a6   : > { %v1177_v36 = vpop.f32.mrf.mxu0 }
 0x4a7   : > { %1211 = vmax.xlane.f32.xlu1 %v4867_v52  ;;  %v4891_v49 = vadd.f32 %v1177_v36, %v4658_v20 }
 0x4ab   : > { %1207 = vmax.xlane.f32.xlu1 %v4871_v37 }
 0x4af   : > { %1490 = vrot.lane.b32.xlu0 %v4496_v56, %s4236_s24 }
 0x4bc   : > { %1492 = vrot.lane.b32.xlu1 %v4506_v0, %s4236_s24 }
 0x4ce   : > { %1217 = vmax.xlane.f32.xlu0 %v4879_v63 }
 0x4d2   : > { %1213 = vmax.xlane.f32.xlu0 %v4883_v22 }
 0x4d6   : > { %1219 = vmax.xlane.f32.xlu0 %v4887_v41 }
 0x4e0   : > { %1215 = vmax.xlane.f32.xlu1 %v4891_v49 }
 0x4ec   : > { %1488 = vrot.lane.b32.xlu0 %v4510_v2, %s4236_s24 }
 0x4f0   : > { %1470 = vrot.lane.b32.xlu0 %v4486_v34, %s4237_s12 }
 0x4f1   : > { %1486 = vrot.lane.b32.xlu1 %v4486_v34, %s4236_s24  ;;  %s5826_s24 = scalar_lea.vmem [#allocation10], %s3063_s2  ;;  %s3125_s2 = sshll.u32 %s4314_s9, 7 }
 0x4f2   : > { %s2940_s9 = scalar_lea.sflag [#allocation4], %s4439_s25 }
 0x4f4   : > { %1474 = vrot.lane.b32.xlu0 %v4496_v56, %s4237_s12 }
 0x4f5   : > { %1472 = vrot.lane.b32.xlu1 %v4510_v2, %s4237_s12 }
 0x4f8   : > { %1478 = vrot.lane.b32.xlu0 %v4493_v50, %s4237_s12 }
 0x4f9   : > { %1476 = vrot.lane.b32.xlu1 %v4506_v0, %s4237_s12 }
 0x4fc   : > { %1482 = vrot.lane.b32.xlu0 %v4502_v61, %s4237_s12 }
 0x4fd   : > { %1480 = vrot.lane.b32.xlu1 %v4490_v44, %s4237_s12 }
 0x500   : > { %1781 = vrot.lane.b32.xlu0 %v4498_v57, %s4238_s13 }
 0x501   : > { %1484 = vrot.lane.b32.xlu1 %v4498_v57, %s4237_s12  ;;  %s2952_s12 = sshll.u32 %s5826_s24, 4  ;;  %s5908_s12 = int_to_ptr.vmem [resolvable:$true] %s2952_s12 }
 0x504   : > { %1777 = vrot.lane.b32.xlu0 %v4490_v44, %s4238_s13 }
 0x505   : > { %1779 = vrot.lane.b32.xlu1 %v4502_v61, %s4238_s13 }
 0x508   : > { %1775 = vrot.lane.b32.xlu0 %v4493_v50, %s4238_s13 }
 0x509   : > { %1771 = vrot.lane.b32.xlu1 %v4496_v56, %s4238_s13 }
 0x50c   : > { %1773 = vrot.lane.b32.xlu0 %v4506_v0, %s4238_s13 }
 0x50d   : > { %1767 = vrot.lane.b32.xlu1 %v4486_v34, %s4238_s13 }
 0x510   : > { %1769 = vrot.lane.b32.xlu0 %v4510_v2, %s4238_s13 }
 0x511   : > { %1954 = vrot.lane.b32.xlu1 %v4490_v44, %s4239_s1 }
 0x514   : > { %v1194_v20 = vpop.xlane.xlu1 %1193  ;;  %1958 = vrot.lane.b32.xlu0 %v4498_v57, %s4239_s1 }
 0x515   : > { %v1223_v36 = vsub.f32 %v4827_v39, %v1194_v20 }
 0x516   : > { %v1190_v31 = vpop.xlane.xlu0 %1189 }
 0x517   : > { %v1221_v58 = vsub.f32 %v4830_v42, %v1190_v31  ;;  %v1241_v16 = vmul.f32 1.442695, %v1223_v36 }
 0x518   : > { %v1196_v3 = vpop.xlane.xlu1 %1195  ;;  %1956 = vrot.lane.b32.xlu0 %v4502_v61, %s4239_s1 }
 0x519   : > { %v1224_v7 = vsub.f32 %v4834_v53, %v1196_v3  ;;  %v1237_v30 = vmul.f32 1.442695, %v1221_v58 }
 0x51b   : > { %v1243_v33 = vmul.f32 1.442695, %v1224_v7  ;;  %3754 = vpow2.f32 %v1237_v30 }
 0x51c   : > { %v1192_v8 = vpop.xlane.xlu1 %1191  ;;  %1952 = vrot.lane.b32.xlu0 %v4493_v50, %s4239_s1  ;;  %v1202_v43 = vpop.xlane.xlu0 %1201 }
 0x51d   : > { %v1222_v23 = vsub.f32 %v4839_v55, %v1192_v8  ;;  %3756 = vpow2.f32 %v1243_v33  ;;  %v1227_v31 = vsub.f32 %v4842_v29, %v1202_v43 }
 0x51f   : > { %v1239_v42 = vmul.f32 1.442695, %v1222_v23  ;;  %v1249_v3 = vmul.f32 1.442695, %v1227_v31 }
 0x520   : > { %v1198_v4 = vpop.xlane.xlu1 %1197 }
 0x521   : > { %3758 = vpow2.f32 %v1239_v42  ;;  %v1225_v53 = vsub.f32 %v4847_v35, %v1198_v4  ;;  %v1548_v42 = vsel %vm585_vm1, %v4789_v5, 0 }
 0x522   : > { %3760 = vpow2.f32 %v1241_v16  ;;  %v1200_v39 = vpop.xlane.xlu0 %1199 }
 0x523   : > { %v1245_v20 = vmul.f32 1.442695, %v1225_v53  ;;  %v1226_v58 = vsub.f32 %v4850_v48, %v1200_v39 }
 0x524   : > { %v1204_v7 = vpop.xlane.xlu1 %1203 }
 0x525   : > { %v1247_v18 = vmul.f32 1.442695, %v1226_v58  ;;  %v1228_v8 = vsub.f32 %v4854_v40, %v1204_v7  ;;  %3762 = vpow2.f32 %v1245_v20 }
 0x527   : > { %3764 = vpow2.f32 %v1247_v18  ;;  %v1251_v23 = vmul.f32 1.442695, %v1228_v8 }
 0x528   : > { %3766 = vpow2.f32 %v1249_v3  ;;  %v1210_v55 = vpop.xlane.xlu1 %1209  ;;  %v4936_v43 = vpop.eup %3754 }
 0x529   : > { %3768 = vpow2.f32 %v1251_v23  ;;  %v1231_v36 = vsub.f32 %v4859_v19, %v1210_v55  ;;  %v1545_v23 = vsel %vm585_vm1, %v4911_v9, 0 }
 0x52a   : > { %v4938_v4 = vpop.eup %3756 }
 0x52b   : > { %v1257_v5 = vmul.f32 1.442695, %v1231_v36  ;;  %v1491_v36 = vpop.permute.xlu0 %1490 }
 0x52c   : > { %v1206_v30 = vpop.xlane.xlu1 %1205 }
 0x52d   : > { %v1229_v29 = vsub.f32 %v4863_v47, %v1206_v30 }
 0x52e   : > { %v4940_v16 = vpop.eup %3758 }
 0x52f   : > { %v4942_v33 = vpop.eup %3760  ;;  %v1301_v35 = vpack.c.bf16 %v4940_v16, %v4936_v43  ;;  %v1253_v53 = vmul.f32 1.442695, %v1229_v29 }
 0x530   : > { %v1212_v48 = vpop.xlane.xlu1 %1211  ;;  %v1302_v18 = vpack.c.bf16 %v4938_v4, %v4942_v33 }
 0x531   : > { %v1232_v40 = vsub.f32 %v4867_v52, %v1212_v48  ;;  %3408 = vmatprep.mubr.bf16.mxu1 %v1301_v35  ;;  %3770 = vpow2.f32 %v1253_v53  ;;  %v1533_v53 = vsel %vm585_vm1, %v1491_v36, 0 }
 0x532   : > { %3409 = vmatmul.mubr.bf16.vlgmr.msra.gmra.mxu1 %v1302_v18  ;;  %v4953_v31 = vpop.eup %3762 }
 0x533   : > { %3425 = vmatpush3.bf16.xpose.msra.mxu1 %v1548_v42  ;;  %v1259_v39 = vmul.f32 1.442695, %v1232_v40 }
 0x534   : > { %v4955_v47 = vpop.eup %3764  ;;  %3605 = vmatprep.subr.msk.bf16.mxu1 %vm585_vm1, %v4911_v9  ;;  %v1208_v20 = vpop.xlane.xlu1 %1207 }
 0x535   : > { %v4959_v58 = vpop.eup %3766  ;;  %v1230_v52 = vsub.f32 %v4871_v37, %v1208_v20  ;;  %v1303_v19 = vpack.c.bf16 %v4955_v47, %v4953_v31  ;;  %3772 = vpow2.f32 %v1259_v39  ;;  %v1542_v37 = vsel %vm585_vm1, %v4915_v13, 0 }
 0x536   : > { %v4964_v3 = vpop.eup %3768 }
 0x537   : > { %v1255_v7 = vmul.f32 1.442695, %v1230_v52  ;;  %3412 = vmatprep.mubr.bf16.mxu1 %v1303_v19  ;;  %v1304_v8 = vpack.c.bf16 %v4964_v3, %v4959_v58 }
 0x538   : > { %v1493_v18 = vpop.permute.xlu1 %1492 }
 0x539   : > { %3774 = vpow2.f32 %v1255_v7  ;;  %v1536_v40 = vsel %vm585_vm1, %v1493_v18, 0 }
 0x53a   : > { %3776 = vpow2.f32 %v1257_v5  ;;  %3413 = vmatmul.mubr.bf16.gmra.mxu1 %v1304_v8 }
 0x53b   : > { %3427 = vmatpush3.bf16.xpose.msra.mxu1 %v1545_v23 }
 0x53c   : > { %3606 = vmatprep.subr.msk.bf16.mxu1 %vm585_vm1, %v4915_v13  ;;  %v1539_v13 = vsel %vm585_vm1, %v4920_v15, 0 }
 0x53e   : > { %v4974_v55 = vpop.eup %3770 }
 0x542   : > { %v4978_v30 = vpop.eup %3772 }
 0x543   : > { %3429 = vmatpush3.bf16.xpose.msra.mxu1 %v1542_v37  ;;  %6045 = vst [vmem:[#allocation49_spill] sm:$0xff] %v4978_v30 }
 0x544   : > { %3607 = vmatprep.subr.msk.bf16.mxu1 %vm585_vm1, %v4920_v15 }
 0x546   : > { %v4980_v29 = vpop.eup %3774 }
 0x547   : > { %v4982_v35 = vpop.eup %3776  ;;  %v1305_v9 = vpack.c.bf16 %v4980_v29, %v4974_v55 }
 0x548   : > { %v1306_v48 = vpack.c.bf16 %v4978_v30, %v4982_v35 }
 0x549   : > { %3416 = vmatprep.mubr.bf16.mxu1 %v1305_v9 }
 0x54a   : > { %3417 = vmatmul.mubr.bf16.gmra.mxu1 %v1306_v48 }
 0x54b   : > { %3431 = vmatpush3.bf16.xpose.msra.mxu1 %v1539_v13 }
 0x54c   : > { %3608 = vmatprep.subr.msk.bf16.mxu1 %vm585_vm1, %v1493_v18 }
 0x553   : > { %3433 = vmatpush3.bf16.xpose.msra.mxu1 %v1536_v40 }
 0x554   : > { %3609 = vmatprep.subr.msk.bf16.mxu1 %vm585_vm1, %v1491_v36 }
 0x557   : > { %v1218_v42 = vpop.xlane.xlu0 %1217 }
 0x558   : > { %v1235_v7 = vsub.f32 %v4879_v63, %v1218_v42 }
 0x55a   : > { %v1265_v13 = vmul.f32 1.442695, %v1235_v7 }
 0x55b   : > { %3435 = vmatpush3.bf16.xpose.msra.mxu1 %v1533_v53  ;;  %v1214_v39 = vpop.xlane.xlu0 %1213 }
 0x55c   : > { %v1233_v19 = vsub.f32 %v4883_v22, %v1214_v39 }
 0x55e   : > { %v1261_v23 = vmul.f32 1.442695, %v1233_v19 }
 0x55f   : > { %v1220_v20 = vpop.xlane.xlu0 %1219 }
 0x560   : > { %v1236_v5 = vsub.f32 %v4887_v41, %v1220_v20  ;;  %3778 = vpow2.f32 %v1261_v23 }
 0x562   : > { %v1267_v37 = vmul.f32 1.442695, %v1236_v5 }
 0x563   : > { %v1489_v52 = vpop.permute.xlu0 %1488 }
 0x564   : > { %3610 = vmatprep.subr.msk.bf16.mxu1 %vm585_vm1, %v1489_v52  ;;  %v1530_v15 = vsel %vm585_vm1, %v1489_v52, 0  ;;  %3780 = vpow2.f32 %v1267_v37 }
 0x565   : > { %3437 = vmatpush3.bf16.xpose.msra.mxu1 %v1530_v15 }
 0x567   : > { %v1471_v8 = vpop.permute.xlu0 %1470 }
 0x569   : > { %v1216_v9 = vpop.xlane.xlu1 %1215 }
 0x56a   : > { %v1234_v48 = vsub.f32 %v4891_v49, %v1216_v9 }
 0x56b   : > { %v1475_v18 = vpop.permute.xlu0 %1474 }
 0x56c   : > { %v1263_v40 = vmul.f32 1.442695, %v1234_v48 }
 0x56d   : > { %v1487_v22 = vpop.permute.xlu1 %1486  ;;  %v5002_v49 = vpop.eup %3778 }
 0x56e   : > { %3782 = vpow2.f32 %v1263_v40  ;;  %3611 = vmatprep.subr.msk.bf16.mxu1 %vm585_vm1, %v1487_v22  ;;  %v1527_v41 = vsel %vm585_vm1, %v1487_v22, 0  ;;  %6046 = vst [vmem:[#allocation50_spill] sm:$0xff] %v5002_v49 }
 0x56f   : > { %3784 = vpow2.f32 %v1265_v13  ;;  %3439 = vmatpush3.bf16.xpose.msra.mxu1 %v1527_v41  ;;  %v1479_v63 = vpop.permute.xlu0 %1478 }
 0x571   : > { %v1473_v36 = vpop.permute.xlu1 %1472  ;;  %v5004_v52 = vpop.eup %3780 }
 0x572   : > { %6047 = vst [vmem:[#allocation51_spill] sm:$0xff] %v5004_v52 }
 0x573   : > { %v1483_v42 = vpop.permute.xlu0 %1482 }
 0x575   : > { %v1477_v53 = vpop.permute.xlu1 %1476 }
 0x577   : > { %v1782_v39 = vpop.permute.xlu0 %1781 }
 0x578   : > { %3456 = vmatprep.subr.bf16.mxu0 %v1782_v39 }
 0x579   : > { %v1481_v20 = vpop.permute.xlu1 %1480  ;;  %3457 = vmatpush3.bf16.msra.mxu0 %v1782_v39 }
 0x57b   : > { %v5006_v19 = vpop.eup %3782  ;;  %v1778_v37 = vpop.permute.xlu0 %1777 }
 0x57c   : > { %6048 = vst [vmem:[#allocation52_spill] sm:$0xff] %v5006_v19  ;;  %v5008_v15 = vpop.eup %3784  ;;  %v1307_v5 = vpack.c.bf16 %v5006_v19, %v5002_v49 }
 0x57d   : > { %6049 = vst [vmem:[#allocation53_spill] sm:$0xff] %v5008_v15  ;;  %v1485_v7 = vpop.permute.xlu1 %1484  ;;  %v1308_v23 = vpack.c.bf16 %v5004_v52, %v5008_v15 }
 0x57e   : > { %3420 = vmatprep.mubr.bf16.mxu1 %v1307_v5 }
 0x57f   : > { %3421 = vmatmul.mubr.bf16.gmra.mxu1 %v1308_v23  ;;  %v1776_v48 = vpop.permute.xlu0 %1775 }
 0x580   : > { %3440 = vmatprep.mubr.msk.bf16.mxu1 %vm585_vm1, %v1471_v8 }
 0x581   : > { %v1780_v9 = vpop.permute.xlu1 %1779 }
 0x582   : > { %3458 = vmatprep.subr.bf16.mxu0 %v1780_v9 }
 0x583   : > { %3459 = vmatpush3.bf16.msra.mxu0 %v1780_v9  ;;  %v1774_v13 = vpop.permute.xlu0 %1773 }
 0x584   : > { %3460 = vmatprep.subr.bf16.mxu0 %v1778_v37 }
 0x585   : > { %v1772_v40 = vpop.permute.xlu1 %1771 }
 0x587   : > { %3441 = vmatmul.mubr.msk.bf16.vlgmr.msra.gmra.mxu1 %vm585_vm1, %v1473_v36  ;;  %3461 = vmatpush3.bf16.msra.mxu0 %v1778_v37  ;;  %v1770_v8 = vpop.permute.xlu0 %1769 }
 0x588   : > { %3444 = vmatprep.mubr.msk.bf16.mxu1 %vm585_vm1, %v1475_v18  ;;  %3462 = vmatprep.subr.bf16.mxu0 %v1776_v48 }
 0x589   : > { %v1768_v22 = vpop.permute.xlu1 %1767 }
 0x58b   : > { %3463 = vmatpush3.bf16.msra.mxu0 %v1776_v48  ;;  %v5021_v18 = vpop.permute.xlu0 %1958 }
 0x58c   : > { %3464 = vmatprep.subr.bf16.mxu0 %v1774_v13 }
 0x58f   : > { %3445 = vmatmul.mubr.msk.bf16.gmra.mxu1 %vm585_vm1, %v1477_v53  ;;  %3465 = vmatpush3.bf16.msra.mxu0 %v1774_v13 }
 0x590   : > { %3448 = vmatprep.mubr.msk.bf16.mxu1 %vm585_vm1, %v1479_v63  ;;  %3466 = vmatprep.subr.bf16.mxu0 %v1772_v40 }
 0x593   : > { %3467 = vmatpush3.bf16.msra.mxu0 %v1772_v40 }
 0x594   : > { %3468 = vmatprep.subr.bf16.mxu0 %v1770_v8 }
 0x597   : > { %3449 = vmatmul.mubr.msk.bf16.gmra.mxu1 %vm585_vm1, %v1481_v20  ;;  %3469 = vmatpush3.bf16.msra.mxu0 %v1770_v8 }
 0x598   : > { %3452 = vmatprep.mubr.msk.bf16.mxu1 %vm585_vm1, %v1483_v42  ;;  %3470 = vmatprep.subr.bf16.mxu0 %v1768_v22 }
 0x59b   : > { %3471 = vmatpush3.bf16.msra.mxu0 %v1768_v22 }
 0x59c   : > { %3612 = vmatprep.subr.msk.bf16.mxu0 %vm585_vm1, %v5021_v18 }
 0x59f   : > { %3453 = vmatmul.mubr.msk.bf16.gmra.mxu1 %vm585_vm1, %v1485_v7 }
 0x5f2   : > { %v5026_v41 = vpop.f32.mrf.mxu1 }
 0x5f3   : > { %6050 = vst [vmem:[#allocation54_spill] sm:$0xff] %v5026_v41 }
 0x5f4   : > { %v5028_v63 = vpop.f32.mrf.mxu1 }
 0x5f5   : > { %6051 = vst [vmem:[#allocation55_spill] sm:$0xff] %v5028_v63 }
 0x5f6   : > { %v5030_v36 = vpop.f32.mrf.mxu1 }
 0x5f7   : > { %6052 = vst [vmem:[#allocation56_spill] sm:$0xff] %v5030_v36 }
 0x5f8   : > { %v5032_v53 = vpop.f32.mrf.mxu1 }
 0x5f9   : > { %6053 = vst [vmem:[#allocation57_spill] sm:$0xff] %v5032_v53 }
 0x5fa   : > { %v5034_v39 = vpop.f32.mrf.mxu1 }
 0x5fb   : > { %6054 = vst [vmem:[#allocation58_spill] sm:$0xff] %v5034_v39 }
 0x5fc   : > { %v5036_v42 = vpop.f32.mrf.mxu1 }
 0x5fd   : > { %6055 = vst [vmem:[#allocation59_spill] sm:$0xff] %v5036_v42 }
 0x5fe   : > { %v5038_v20 = vpop.f32.mrf.mxu1 }
 0x5ff   : > { %6056 = vst [vmem:[#allocation60_spill] sm:$0xff] %v5038_v20 }
 0x600   : > { %v5040_v5 = vpop.f32.mrf.mxu1 }
 0x601   : > { %6057 = vst [vmem:[#allocation61_spill] sm:$0xff] %v5040_v5  ;;  %v5093_v5 = vld [vmem:[#allocation5 + $0x28] sm:$0xff] }
 0x60a   : > { %v5042_v23 = vpop.f32.mrf.mxu1 }
 0x60b   : > { %6058 = vst [vmem:[#allocation62_spill] sm:$0xff] %v5042_v23 }
 0x60c   : > { %v5044_v37 = vpop.f32.mrf.mxu1 }
 0x60d   : > { %6059 = vst [vmem:[#allocation63_spill] sm:$0xff] %v5044_v37  ;;  %v5088_v37 = vld [vmem:[#allocation5 + $0x20] sm:$0xff] }
 0x60e   : > { %v5046_v7 = vpop.f32.mrf.mxu1 }
 0x60f   : > { %6060 = vst [vmem:[#allocation64_spill] sm:$0xff] %v5046_v7 }
 0x610   : > { %v5048_v9 = vpop.f32.mrf.mxu1 }
 0x611   : > { %6061 = vst [vmem:[#allocation65_spill] sm:$0xff] %v5048_v9 }
 0x63f   : > { %v5050_v48 = vpop.f32.mrf.mxu1 }
 0x640   : > { %6062 = vst [vmem:[#allocation66_spill] sm:$0xff] %v5050_v48 }
 0x641   : > { %v5052_v13 = vpop.f32.mrf.mxu1 }
 0x642   : > { %6063 = vst [vmem:[#allocation67_spill] sm:$0xff] %v5052_v13  ;;  %v5069_v13 = vld [vmem:[#allocation5 + $0x18] sm:$0xff] }
 0x643   : > { %v5054_v40 = vpop.f32.mrf.mxu1 }
 0x644   : > { %6064 = vst [vmem:[#allocation68_spill] sm:$0xff] %v5054_v40 }
 0x645   : > { %v5056_v8 = vpop.f32.mrf.mxu1 }
 0x646   : > { %6065 = vst [vmem:[#allocation69_spill] sm:$0xff] %v5056_v8 }
 0x647   : > { %v3442_v22 = vpop.f32.mrf.mxu1 }
 0x648   : > { %v5061_v14 = vadd.f32 %v5058_v11, %v3442_v22 }
 0x649   : > { %v1584_v38 = vpop.f32.mrf.mxu1 }
 0x64a   : > { %v5066_v32 = vadd.f32 %v5063_v60, %v1584_v38  ;;  %1651 = vmax.xlane.f32.xlu1 %v5061_v14  ;;  %v5081_v38 = vld [vmem:[#allocation5 + $0x30] sm:$0xff] }
 0x64b   : > { %v3443_v48 = vpop.f32.mrf.mxu1 }
 0x64c   : > { %v5072_v40 = vadd.f32 %v5069_v13, %v3443_v48  ;;  %1647 = vmax.xlane.f32.xlu0 %v5066_v32 }
 0x64d   : > { %v1587_v8 = vpop.f32.mrf.mxu1 }
 0x64e   : > { %1653 = vmax.xlane.f32.xlu1 %v5072_v40  ;;  %v5079_v7 = vadd.f32 %v5076_v26, %v1587_v8 }
 0x64f   : > { %v3446_v22 = vpop.f32.mrf.mxu1 }
 0x650   : > { %v5084_v23 = vadd.f32 %v5081_v38, %v3446_v22  ;;  %v5099_v22 = vld [vmem:[#allocation5 + $0x38] sm:$0xff] }
 0x651   : > { %v1600_v9 = vpop.f32.mrf.mxu1 }
 0x652   : > { %1649 = vmax.xlane.f32.xlu1 %v5079_v7  ;;  %1659 = vmax.xlane.f32.xlu0 %v5084_v23  ;;  %v5091_v20 = vadd.f32 %v5088_v37, %v1600_v9  ;;  %v5106_v9 = vld [vmem:[#allocation5 + $0x50] sm:$0xff] }
 0x653   : > { %v3447_v48 = vpop.f32.mrf.mxu1 }
 0x654   : > { %v5102_v42 = vadd.f32 %v5099_v22, %v3447_v48 }
 0x655   : > { %v1603_v39 = vpop.f32.mrf.mxu1 }
 0x656   : > { %v5096_v8 = vadd.f32 %v5093_v5, %v1603_v39  ;;  %1655 = vmax.xlane.f32.xlu1 %v5091_v20  ;;  %v5112_v39 = vld [vmem:[#allocation5 + $0x40] sm:$0xff] }
 0x657   : > { %v3450_v36 = vpop.f32.mrf.mxu1 }
 0x658   : > { %1657 = vmax.xlane.f32.xlu0 %v5096_v8  ;;  %v5109_v41 = vadd.f32 %v5106_v9, %v3450_v36  ;;  %v5124_v36 = vld [vmem:[#allocation5 + $0x48] sm:$0xff] }
 0x659   : > { %v1616_v53 = vpop.f32.mrf.mxu1 }
 0x65a   : > { %1661 = vmax.xlane.f32.xlu1 %v5102_v42  ;;  %v5115_v63 = vadd.f32 %v5112_v39, %v1616_v53 }
 0x65b   : > { %v3451_v48 = vpop.f32.mrf.mxu1 }
 0x65c   : > { %v5121_v25 = vadd.f32 %v5118_v24, %v3451_v48 }
 0x65d   : > { %v1619_v54 = vpop.f32.mrf.mxu1 }
 0x65e   : > { %1667 = vmax.xlane.f32.xlu1 %v5109_v41  ;;  %v5127_v10 = vadd.f32 %v5124_v36, %v1619_v54 }
 0x65f   : > { %v3454_v53 = vpop.f32.mrf.mxu1 }
 0x660   : > { %v5137_v48 = vadd.f32 %v5134_v21, %v3454_v53 }
 0x661   : > { %v1632_v12 = vpop.f32.mrf.mxu1 }
 0x662   : > { %1663 = vmax.xlane.f32.xlu1 %v5115_v63  ;;  %v5143_v54 = vadd.f32 %v5140_v17, %v1632_v12 }
 0x663   : > { %v3455_v62 = vpop.f32.mrf.mxu1 }
 0x664   : > { %v5149_v59 = vadd.f32 %v5146_v6, %v3455_v62  ;;  %v5180_v62 = vpop.permute.xlu0 %1956 }
 0x665   : > { %v1635_v53 = vpop.f32.mrf.mxu1 }
 0x666   : > { %1669 = vmax.xlane.f32.xlu1 %v5121_v25  ;;  %v5155_v46 = vadd.f32 %v5152_v1, %v1635_v53 }
 0x668   : > { %v5186_v12 = vpop.permute.xlu0 %1952 }
 0x66a   : > { %1665 = vmax.xlane.f32.xlu1 %v5127_v10 }
 0x66e   : > { %1948 = vrot.lane.b32.xlu0 %v4496_v56, %s4239_s1 }
 0x67b   : > { %1950 = vrot.lane.b32.xlu1 %v4506_v0, %s4239_s1 }
 0x68d   : > { %1675 = vmax.xlane.f32.xlu0 %v5137_v48 }
 0x691   : > { %1671 = vmax.xlane.f32.xlu0 %v5143_v54 }
 0x695   : > { %1677 = vmax.xlane.f32.xlu0 %v5149_v59 }
 0x69f   : > { %1673 = vmax.xlane.f32.xlu1 %v5155_v46 }
 0x6ab   : > { %1946 = vrot.lane.b32.xlu0 %v4510_v2, %s4239_s1 }
 0x6af   : > { %1928 = vrot.lane.b32.xlu0 %v4486_v34, %s4240_s23 }
 0x6b0   : > { %1944 = vrot.lane.b32.xlu1 %v4486_v34, %s4239_s1 }
 0x6b3   : > { %1932 = vrot.lane.b32.xlu0 %v4496_v56, %s4240_s23 }
 0x6b4   : > { %1930 = vrot.lane.b32.xlu1 %v4510_v2, %s4240_s23 }
 0x6b7   : > { %1936 = vrot.lane.b32.xlu0 %v4493_v50, %s4240_s23 }
 0x6b8   : > { %1934 = vrot.lane.b32.xlu1 %v4506_v0, %s4240_s23 }
 0x6bb   : > { %1940 = vrot.lane.b32.xlu0 %v4502_v61, %s4240_s23 }
 0x6bc   : > { %1938 = vrot.lane.b32.xlu1 %v4490_v44, %s4240_s23 }
 0x6bf   : > { %2237 = vrot.lane.b32.xlu0 %v4502_v61, %s4241_s26  ;;  %v5184_v61 = vpop.permute.xlu1 %1954 }
 0x6c0   : > { %1942 = vrot.lane.b32.xlu1 %v4498_v57, %s4240_s23  ;;  %s5906_s23 = scalar_lea.hbm %s5963_s8, %s3125_s2 }
 0x6c3   : > { %2233 = vrot.lane.b32.xlu0 %v4493_v50, %s4241_s26 }
 0x6c4   : > { %2239 = vrot.lane.b32.xlu1 %v4498_v57, %s4241_s26 }
 0x6c7   : > { %2229 = vrot.lane.b32.xlu0 %v4496_v56, %s4241_s26 }
 0x6c8   : > { %2235 = vrot.lane.b32.xlu1 %v4490_v44, %s4241_s26 }
 0x6cc   : > { %2231 = vrot.lane.b32.xlu1 %v4506_v0, %s4241_s26 }
 0x6d3   : > { %v1652_v53 = vpop.xlane.xlu1 %1651 }
 0x6d4   : > { %v1681_v56 = vsub.f32 %v5061_v14, %v1652_v53 }
 0x6d5   : > { %v1648_v50 = vpop.xlane.xlu0 %1647 }
 0x6d6   : > { %v1679_v51 = vsub.f32 %v5066_v32, %v1648_v50  ;;  %v1699_v0 = vmul.f32 1.442695, %v1681_v56 }
 0x6d7   : > { %v1654_v57 = vpop.xlane.xlu1 %1653 }
 0x6d8   : > { %v1682_v28 = vsub.f32 %v5072_v40, %v1654_v57  ;;  %v1695_v27 = vmul.f32 1.442695, %v1679_v51 }
 0x6da   : > { %v1701_v44 = vmul.f32 1.442695, %v1682_v28  ;;  %3786 = vpow2.f32 %v1695_v27 }
 0x6db   : > { %v1650_v45 = vpop.xlane.xlu1 %1649  ;;  %v1660_v15 = vpop.xlane.xlu0 %1659 }
 0x6dc   : > { %v1680_v52 = vsub.f32 %v5079_v7, %v1650_v45  ;;  %3788 = vpow2.f32 %v1701_v44  ;;  %v1685_v49 = vsub.f32 %v5084_v23, %v1660_v15  ;;  %v2006_v44 = vsel %vm585_vm1, %v5021_v18, 0 }
 0x6de   : > { %v1697_v19 = vmul.f32 1.442695, %v1680_v52  ;;  %v1707_v28 = vmul.f32 1.442695, %v1685_v49 }
 0x6df   : > { %v1656_v30 = vpop.xlane.xlu1 %1655 }
 0x6e0   : > { %3790 = vpow2.f32 %v1697_v19  ;;  %v1683_v32 = vsub.f32 %v5091_v20, %v1656_v30 }
 0x6e1   : > { %3792 = vpow2.f32 %v1699_v0  ;;  %v1658_v40 = vpop.xlane.xlu0 %1657 }
 0x6e2   : > { %v1703_v50 = vmul.f32 1.442695, %v1683_v32  ;;  %v1684_v51 = vsub.f32 %v5096_v8, %v1658_v40 }
 0x6e3   : > { %v1662_v14 = vpop.xlane.xlu1 %1661 }
 0x6e4   : > { %v1705_v53 = vmul.f32 1.442695, %v1684_v51  ;;  %v1686_v45 = vsub.f32 %v5102_v42, %v1662_v14  ;;  %3794 = vpow2.f32 %v1703_v50 }
 0x6e6   : > { %3796 = vpow2.f32 %v1705_v53  ;;  %v1709_v27 = vmul.f32 1.442695, %v1686_v45  ;;  %v2003_v45 = vsel %vm585_vm1, %v5180_v62, 0 }
 0x6e7   : > { %3798 = vpow2.f32 %v1707_v28  ;;  %v1668_v52 = vpop.xlane.xlu1 %1667  ;;  %v5196_v15 = vpop.eup %3786 }
 0x6e8   : > { %3800 = vpow2.f32 %v1709_v27  ;;  %v1689_v56 = vsub.f32 %v5109_v41, %v1668_v52 }
 0x6e9   : > { %v5198_v30 = vpop.eup %3788 }
 0x6ea   : > { %v1715_v18 = vmul.f32 1.442695, %v1689_v56 }
 0x6eb   : > { %v1664_v19 = vpop.xlane.xlu1 %1663 }
 0x6ec   : > { %v1687_v49 = vsub.f32 %v5115_v63, %v1664_v19 }
 0x6ed   : > { %v5200_v20 = vpop.eup %3790 }
 0x6ee   : > { %v5202_v23 = vpop.eup %3792  ;;  %v1759_v42 = vpack.c.bf16 %v5200_v20, %v5196_v15  ;;  %v1711_v32 = vmul.f32 1.442695, %v1687_v49 }
 0x6ef   : > { %v1670_v7 = vpop.xlane.xlu1 %1669  ;;  %v1760_v8 = vpack.c.bf16 %v5198_v30, %v5202_v23 }
 0x6f0   : > { %v1690_v57 = vsub.f32 %v5121_v25, %v1670_v7  ;;  %3472 = vmatprep.mubr.bf16.mxu0 %v1759_v42  ;;  %3802 = vpow2.f32 %v1711_v32 }
 0x6f1   : > { %3473 = vmatmul.mubr.bf16.vlgmr.msra.gmra.mxu0 %v1760_v8  ;;  %v5213_v0 = vpop.eup %3794 }
 0x6f2   : > { %3489 = vmatpush3.bf16.xpose.msra.mxu0 %v2006_v44  ;;  %v1717_v40 = vmul.f32 1.442695, %v1690_v57  ;;  %v1949_v57 = vpop.permute.xlu0 %1948 }
 0x6f3   : > { %v5215_v63 = vpop.eup %3796  ;;  %3613 = vmatprep.subr.msk.bf16.mxu0 %vm585_vm1, %v5180_v62  ;;  %v1666_v50 = vpop.xlane.xlu1 %1665  ;;  %v1991_v44 = vsel %vm585_vm1, %v1949_v57, 0 }
 0x6f4   : > { %v5219_v51 = vpop.eup %3798  ;;  %v1688_v25 = vsub.f32 %v5127_v10, %v1666_v50  ;;  %v1761_v41 = vpack.c.bf16 %v5215_v63, %v5213_v0  ;;  %3804 = vpow2.f32 %v1717_v40  ;;  %v2000_v10 = vsel %vm585_vm1, %v5184_v61, 0 }
 0x6f5   : > { %v5224_v28 = vpop.eup %3800 }
 0x6f6   : > { %v1713_v14 = vmul.f32 1.442695, %v1688_v25  ;;  %3476 = vmatprep.mubr.bf16.mxu0 %v1761_v41  ;;  %v1762_v53 = vpack.c.bf16 %v5224_v28, %v5219_v51 }
 0x6f7   : > { %v1951_v7 = vpop.permute.xlu1 %1950 }
 0x6f8   : > { %3806 = vpow2.f32 %v1713_v14  ;;  %v1994_v8 = vsel %vm585_vm1, %v1951_v7, 0 }
 0x6f9   : > { %3808 = vpow2.f32 %v1715_v18  ;;  %3477 = vmatmul.mubr.bf16.gmra.mxu0 %v1762_v53 }
 0x6fa   : > { %3491 = vmatpush3.bf16.xpose.msra.mxu0 %v2003_v45 }
 0x6fb   : > { %3614 = vmatprep.subr.msk.bf16.mxu0 %vm585_vm1, %v5184_v61  ;;  %v1997_v61 = vsel %vm585_vm1, %v5186_v12, 0 }
 0x6fd   : > { %v5234_v27 = vpop.eup %3802 }
 0x701   : > { %v5238_v52 = vpop.eup %3804 }
 0x702   : > { %3493 = vmatpush3.bf16.xpose.msra.mxu0 %v2000_v10 }
 0x703   : > { %3615 = vmatprep.subr.msk.bf16.mxu0 %vm585_vm1, %v5186_v12 }
 0x705   : > { %v5240_v19 = vpop.eup %3806 }
 0x706   : > { %v5242_v49 = vpop.eup %3808  ;;  %v1763_v62 = vpack.c.bf16 %v5240_v19, %v5234_v27 }
 0x707   : > { %v1764_v42 = vpack.c.bf16 %v5238_v52, %v5242_v49 }
 0x708   : > { %3480 = vmatprep.mubr.bf16.mxu0 %v1763_v62 }
 0x709   : > { %3481 = vmatmul.mubr.bf16.gmra.mxu0 %v1764_v42 }
 0x70a   : > { %3495 = vmatpush3.bf16.xpose.msra.mxu0 %v1997_v61 }
 0x70b   : > { %3616 = vmatprep.subr.msk.bf16.mxu0 %vm585_vm1, %v1951_v7 }
 0x712   : > { %3497 = vmatpush3.bf16.xpose.msra.mxu0 %v1994_v8 }
 0x713   : > { %3617 = vmatprep.subr.msk.bf16.mxu0 %vm585_vm1, %v1949_v57 }
 0x716   : > { %v1676_v56 = vpop.xlane.xlu0 %1675 }
 0x717   : > { %v1693_v18 = vsub.f32 %v5137_v48, %v1676_v56 }
 0x719   : > { %v1723_v62 = vmul.f32 1.442695, %v1693_v18 }
 0x71a   : > { %3499 = vmatpush3.bf16.xpose.msra.mxu0 %v1991_v44  ;;  %v1672_v32 = vpop.xlane.xlu0 %1671 }
 0x71b   : > { %v1691_v25 = vsub.f32 %v5143_v54, %v1672_v32 }
 0x71d   : > { %v1719_v14 = vmul.f32 1.442695, %v1691_v25 }
 0x71e   : > { %v1678_v40 = vpop.xlane.xlu0 %1677 }
 0x71f   : > { %v1694_v41 = vsub.f32 %v5149_v59, %v1678_v40  ;;  %3810 = vpow2.f32 %v1719_v14 }
 0x721   : > { %v1725_v53 = vmul.f32 1.442695, %v1694_v41 }
 0x722   : > { %v1947_v50 = vpop.permute.xlu0 %1946 }
 0x723   : > { %3618 = vmatprep.subr.msk.bf16.mxu0 %vm585_vm1, %v1947_v50  ;;  %v1988_v12 = vsel %vm585_vm1, %v1947_v50, 0  ;;  %3812 = vpow2.f32 %v1725_v53 }
 0x724   : > { %3501 = vmatpush3.bf16.xpose.msra.mxu0 %v1988_v12 }
 0x726   : > { %v1929_v42 = vpop.permute.xlu0 %1928 }
 0x728   : > { %v1674_v45 = vpop.xlane.xlu1 %1673 }
 0x729   : > { %v1692_v10 = vsub.f32 %v5155_v46, %v1674_v45 }
 0x72a   : > { %v1933_v59 = vpop.permute.xlu0 %1932 }
 0x72b   : > { %v1721_v61 = vmul.f32 1.442695, %v1692_v10 }
 0x72c   : > { %v1945_v54 = vpop.permute.xlu1 %1944  ;;  %v5262_v56 = vpop.eup %3810 }
 0x72d   : > { %3814 = vpow2.f32 %v1721_v61  ;;  %3619 = vmatprep.subr.msk.bf16.mxu0 %vm585_vm1, %v1945_v54  ;;  %v1985_v7 = vsel %vm585_vm1, %v1945_v54, 0 }
 0x72e   : > { %3816 = vpow2.f32 %v1723_v62  ;;  %3503 = vmatpush3.bf16.xpose.msra.mxu0 %v1985_v7  ;;  %v1937_v57 = vpop.permute.xlu0 %1936 }
 0x730   : > { %v1931_v48 = vpop.permute.xlu1 %1930  ;;  %v5264_v44 = vpop.eup %3812 }
 0x732   : > { %v1941_v25 = vpop.permute.xlu0 %1940 }
 0x734   : > { %v1935_v8 = vpop.permute.xlu1 %1934 }
 0x736   : > { %v2238_v14 = vpop.permute.xlu0 %2237 }
 0x738   : > { %v1939_v46 = vpop.permute.xlu1 %1938 }
 0x73a   : > { %v5266_v32 = vpop.eup %3814  ;;  %v2234_v45 = vpop.permute.xlu0 %2233 }
 0x73b   : > { %v5268_v40 = vpop.eup %3816  ;;  %v1765_v50 = vpack.c.bf16 %v5266_v32, %v5262_v56 }
 0x73c   : > { %v1943_v12 = vpop.permute.xlu1 %1942  ;;  %v1766_v41 = vpack.c.bf16 %v5264_v44, %v5268_v40 }
 0x73d   : > { %3484 = vmatprep.mubr.bf16.mxu0 %v1765_v50 }
 0x73e   : > { %3485 = vmatmul.mubr.bf16.gmra.mxu0 %v1766_v41  ;;  %v2230_v62 = vpop.permute.xlu0 %2229 }
 0x73f   : > { %3504 = vmatprep.mubr.msk.bf16.mxu0 %vm585_vm1, %v1929_v42 }
 0x740   : > { %v2240_v18 = vpop.permute.xlu1 %2239 }
 0x741   : > { %3520 = vmatprep.subr.bf16.mxu0 %v2240_v18  ;;  %3572 = vmatprep.subr.bf16.mxu1 %v2240_v18 }
 0x742   : > { %3580 = vmatpush3.bf16.msra.mxu1 %v2240_v18 }
 0x743   : > { %3573 = vmatprep.subr.bf16.mxu1 %v2238_v14 }
 0x744   : > { %v2236_v53 = vpop.permute.xlu1 %2235 }
 0x746   : > { %3505 = vmatmul.mubr.msk.bf16.vlgmr.msra.gmra.mxu0 %vm585_vm1, %v1931_v48  ;;  %3581 = vmatpush3.bf16.msra.mxu1 %v2238_v14 }
 0x747   : > { %3521 = vmatpush3.bf16.msra.mxu0 %v2240_v18  ;;  %3508 = vmatprep.mubr.msk.bf16.mxu0 %vm585_vm1, %v1933_v59 }
 0x748   : > { %3522 = vmatprep.subr.bf16.mxu0 %v2238_v14  ;;  %3574 = vmatprep.subr.bf16.mxu1 %v2236_v53  ;;  %v2232_v10 = vpop.permute.xlu1 %2231 }
 0x74a   : > { %3582 = vmatpush3.bf16.msra.mxu1 %v2236_v53 }
 0x74b   : > { %3523 = vmatpush3.bf16.msra.mxu0 %v2238_v14  ;;  %3575 = vmatprep.subr.bf16.mxu1 %v2234_v45 }
 0x74c   : > { %3524 = vmatprep.subr.bf16.mxu0 %v2236_v53 }
 0x74e   : > { %3509 = vmatmul.mubr.msk.bf16.gmra.mxu0 %vm585_vm1, %v1935_v8  ;;  %3583 = vmatpush3.bf16.msra.mxu1 %v2234_v45 }
 0x74f   : > { %3525 = vmatpush3.bf16.msra.mxu0 %v2236_v53  ;;  %3512 = vmatprep.mubr.msk.bf16.mxu0 %vm585_vm1, %v1937_v57 }
 0x750   : > { %3526 = vmatprep.subr.bf16.mxu0 %v2234_v45  ;;  %3576 = vmatprep.subr.bf16.mxu1 %v2232_v10 }
 0x752   : > { %3584 = vmatpush3.bf16.msra.mxu1 %v2232_v10 }
 0x753   : > { %3527 = vmatpush3.bf16.msra.mxu0 %v2234_v45  ;;  %3577 = vmatprep.subr.bf16.mxu1 %v2230_v62 }
 0x754   : > { %3528 = vmatprep.subr.bf16.mxu0 %v2232_v10 }
 0x756   : > { %3513 = vmatmul.mubr.msk.bf16.gmra.mxu0 %vm585_vm1, %v1939_v46  ;;  %3585 = vmatpush3.bf16.msra.mxu1 %v2230_v62 }
 0x757   : > { %3529 = vmatpush3.bf16.msra.mxu0 %v2232_v10  ;;  %3516 = vmatprep.mubr.msk.bf16.mxu0 %vm585_vm1, %v1941_v25 }
 0x758   : > { %3530 = vmatprep.subr.bf16.mxu0 %v2230_v62 }
 0x75b   : > { %3531 = vmatpush3.bf16.msra.mxu0 %v2230_v62 }
 0x75e   : > { %3517 = vmatmul.mubr.msk.bf16.gmra.mxu0 %vm585_vm1, %v1943_v12 }
 0x7b1   : > { %v5282_v42 = vpop.f32.mrf.mxu0 }
 0x7b3   : > { %v5284_v61 = vpop.f32.mrf.mxu0 }
 0x7b5   : > { %v5286_v54 = vpop.f32.mrf.mxu0 }
 0x7b7   : > { %v5288_v7 = vpop.f32.mrf.mxu0 }
 0x7b9   : > { %v5290_v59 = vpop.f32.mrf.mxu0 }
 0x7bb   : > { %v5292_v48 = vpop.f32.mrf.mxu0 }
 0x7bd   : > { %v5294_v8 = vpop.f32.mrf.mxu0 }
 0x7bf   : > { %v5296_v57 = vpop.f32.mrf.mxu0 }
 0x7c9   : > { %v5298_v46 = vpop.f32.mrf.mxu0 }
 0x7ca   : > { %6066 = vst [vmem:[#allocation70_spill] sm:$0xff] %v5298_v46 }
 0x7cb   : > { %v5300_v50 = vpop.f32.mrf.mxu0 }
 0x7cc   : > { %6067 = vst [vmem:[#allocation71_spill] sm:$0xff] %v5300_v50 }
 0x7cd   : > { %v5302_v25 = vpop.f32.mrf.mxu0 }
 0x7cf   : > { %v5304_v12 = vpop.f32.mrf.mxu0 }
 0x7d0   : > { %6068 = vst [vmem:[#allocation72_spill] sm:$0xff] %v5304_v12 }
 0x7fe   : > { %v5306_v41 = vpop.f32.mrf.mxu0 }
 0x7ff   : > { %6069 = vst [vmem:[#allocation73_spill] sm:$0xff] %v5306_v41 }
 0x800   : > { %v5308_v18 = vpop.f32.mrf.mxu0 }
 0x801   : > { %6070 = vst [vmem:[#allocation74_spill] sm:$0xff] %v5308_v18 }
 0x802   : > { %v5310_v14 = vpop.f32.mrf.mxu0 }
 0x804   : > { %v5312_v53 = vpop.f32.mrf.mxu0 }
 0x805   : > { %6071 = vst [vmem:[#allocation75_spill] sm:$0xff] %v5312_v53 }
 0x806   : > { %v3506_v45 = vpop.f32.mrf.mxu0 }
 0x807   : > { %v5315_v10 = vadd.f32 %v5058_v11, %v3506_v45 }
 0x808   : > { %v2042_v62 = vpop.f32.mrf.mxu0 }
 0x809   : > { %2109 = vmax.xlane.f32.xlu0 %v5315_v10  ;;  %v5319_v46 = vadd.f32 %v5063_v60, %v2042_v62 }
 0x80a   : > { %v3507_v50 = vpop.f32.mrf.mxu0 }
 0x80b   : > { %v5326_v53 = vadd.f32 %v5069_v13, %v3507_v50 }
 0x80c   : > { %v2045_v12 = vpop.f32.mrf.mxu0 }
 0x80d   : > { %v5322_v41 = vadd.f32 %v5076_v26, %v2045_v12  ;;  %2105 = vmax.xlane.f32.xlu0 %v5319_v46 }
 0x80e   : > { %v3510_v18 = vpop.f32.mrf.mxu0 }
 0x80f   : > { %2107 = vmax.xlane.f32.xlu1 %v5322_v41  ;;  %v5330_v45 = vadd.f32 %v5081_v38, %v3510_v18 }
 0x810   : > { %v2058_v11 = vpop.f32.mrf.mxu0 }
 0x811   : > { %2111 = vmax.xlane.f32.xlu0 %v5326_v53  ;;  %v5338_v12 = vadd.f32 %v5088_v37, %v2058_v11 }
 0x812   : > { %v3511_v60 = vpop.f32.mrf.mxu0 }
 0x813   : > { %v5334_v62 = vadd.f32 %v5099_v22, %v3511_v60  ;;  %2117 = vmax.xlane.f32.xlu1 %v5330_v45 }
 0x814   : > { %v2061_v26 = vpop.f32.mrf.mxu0 }
 0x815   : > { %2119 = vmax.xlane.f32.xlu0 %v5334_v62  ;;  %v5342_v50 = vadd.f32 %v5093_v5, %v2061_v26 }
 0x816   : > { %v3514_v13 = vpop.f32.mrf.mxu0 }
 0x817   : > { %2113 = vmax.xlane.f32.xlu1 %v5338_v12  ;;  %v5346_v18 = vadd.f32 %v5106_v9, %v3514_v13 }
 0x818   : > { %v2074_v38 = vpop.f32.mrf.mxu0 }
 0x819   : > { %2115 = vmax.xlane.f32.xlu0 %v5342_v50  ;;  %v5354_v11 = vadd.f32 %v5112_v39, %v2074_v38 }
 0x81a   : > { %v3515_v22 = vpop.f32.mrf.mxu0 }
 0x81b   : > { %v5350_v60 = vadd.f32 %v5118_v24, %v3515_v22  ;;  %2125 = vmax.xlane.f32.xlu1 %v5346_v18 }
 0x81c   : > { %v2077_v37 = vpop.f32.mrf.mxu0 }
 0x81d   : > { %2127 = vmax.xlane.f32.xlu0 %v5350_v60  ;;  %v5358_v26 = vadd.f32 %v5124_v36, %v2077_v37  ;;  %v6083_v37 = vld [vmem:[#allocation23_spill] sm:$0xff] }
 0x81e   : > { %v3518_v5 = vpop.f32.mrf.mxu0 }
 0x81f   : > { %2121 = vmax.xlane.f32.xlu1 %v5354_v11  ;;  %v5362_v13 = vadd.f32 %v5134_v21, %v3518_v5 }
 0x820   : > { %v2090_v9 = vpop.f32.mrf.mxu0 }
 0x821   : > { %2123 = vmax.xlane.f32.xlu0 %v5358_v26  ;;  %v5370_v38 = vadd.f32 %v5140_v17, %v2090_v9  ;;  %v6076_v17 = vld [vmem:[#allocation51_spill] sm:$0xff] }
 0x822   : > { %v3519_v24 = vpop.f32.mrf.mxu0 }
 0x823   : > { %v5366_v22 = vadd.f32 %v5146_v6, %v3519_v24  ;;  %2133 = vmax.xlane.f32.xlu1 %v5362_v13  ;;  %v6075_v6 = vld [vmem:[#allocation53_spill] sm:$0xff] }
 0x824   : > { %v2093_v39 = vpop.f32.mrf.mxu0 }
 0x825   : > { %2135 = vmax.xlane.f32.xlu0 %v5366_v22  ;;  %v5374_v36 = vadd.f32 %v5152_v1, %v2093_v39  ;;  %v6074_v1 = vld [vmem:[#allocation52_spill] sm:$0xff] }
 0x827   : > { %2129 = vmax.xlane.f32.xlu1 %v5370_v38 }
 0x829   : > { %2131 = vmax.xlane.f32.xlu0 %v5374_v36 }
 0x838   : > { %2227 = vrot.lane.b32.xlu1 %v4510_v2, %s4241_s26  ;;  %v6073_v2 = vld [vmem:[#allocation50_spill] sm:$0xff] }
 0x83f   : > { %2225 = vrot.lane.b32.xlu0 %v4486_v34, %s4241_s26  ;;  %v6072_v34 = vld [vmem:[#allocation49_spill] sm:$0xff]  ;;  %s4148_s26 = scalar_lea.vmem %s5908_s12, 2048 }
 0x840   : > { %p4149_p3 = scmp.ne.s32.totalorder %s5908_s12, %s4148_s26 }
 0x842   : > { %p4150_p4 = pnand %p4149_p3, %p6131_p0 }
 0x844   : > { %p4151_p11 = pneg %p4150_p4 }
 0x85c   : > { %1269 = vadd.xlane.f32.xlu1 %v4936_v43 }
 0x85e   : > { %1271 = vadd.xlane.f32.xlu0 %v4940_v16 }
 0x860   : > { %1273 = vadd.xlane.f32.xlu1 %v4942_v33 }
 0x862   : > { %1275 = vadd.xlane.f32.xlu0 %v4938_v4 }
 0x864   : > { %1727 = vadd.xlane.f32.xlu1 %v5196_v15  ;;  %v6077_v15 = vld [vmem:[#allocation17_spill] sm:$0xff] }
 0x866   : > { %1729 = vadd.xlane.f32.xlu0 %v5200_v20 }
 0x868   : > { %1731 = vadd.xlane.f32.xlu1 %v5202_v23  ;;  %v6078_v23 = vld [vmem:[#allocation19_spill] sm:$0xff] }
 0x86a   : > { %1733 = vadd.xlane.f32.xlu0 %v5198_v30 }
 0x86c   : > { %1277 = vadd.xlane.f32.xlu1 %v4953_v31 }
 0x86e   : > { %1279 = vadd.xlane.f32.xlu0 %v4955_v47 }
 0x870   : > { %1281 = vadd.xlane.f32.xlu1 %v4959_v58 }
 0x872   : > { %1283 = vadd.xlane.f32.xlu0 %v4964_v3 }
 0x874   : > { %1735 = vadd.xlane.f32.xlu1 %v5213_v0 }
 0x876   : > { %1737 = vadd.xlane.f32.xlu0 %v5215_v63 }
 0x878   : > { %1739 = vadd.xlane.f32.xlu1 %v5219_v51 }
 0x87a   : > { %1741 = vadd.xlane.f32.xlu0 %v5224_v28  ;;  %v6079_v28 = vld [vmem:[#allocation20_spill] sm:$0xff] }
 0x87c   : > { %1285 = vadd.xlane.f32.xlu1 %v4974_v55 }
 0x87e   : > { %1287 = vadd.xlane.f32.xlu0 %v4980_v29 }
 0x880   : > { %1289 = vadd.xlane.f32.xlu1 %v4982_v35 }
 0x882   : > { %1291 = vadd.xlane.f32.xlu0 %v6072_v34 }
 0x884   : > { %1743 = vadd.xlane.f32.xlu1 %v5234_v27 }
 0x886   : > { %1745 = vadd.xlane.f32.xlu0 %v5240_v19  ;;  %v6080_v19 = vld [vmem:[#allocation18_spill] sm:$0xff] }
 0x888   : > { %1747 = vadd.xlane.f32.xlu1 %v5242_v49 }
 0x88a   : > { %1749 = vadd.xlane.f32.xlu0 %v5238_v52 }
 0x88c   : > { %1293 = vadd.xlane.f32.xlu1 %v6073_v2 }
 0x88e   : > { %1295 = vadd.xlane.f32.xlu0 %v6074_v1 }
 0x890   : > { %1297 = vadd.xlane.f32.xlu1 %v6075_v6 }
 0x892   : > { %1299 = vadd.xlane.f32.xlu0 %v6076_v17  ;;  %v2110_v21 = vpop.xlane.xlu0 %2109 }
 0x893   : > { %v2139_v43 = vsub.f32 %v5315_v10, %v2110_v21  ;;  %v6082_v10 = vld [vmem:[#allocation22_spill] sm:$0xff] }
 0x894   : > { %1751 = vadd.xlane.f32.xlu1 %v5262_v56 }
 0x895   : > { %v2157_v58 = vmul.f32 1.442695, %v2139_v43 }
 0x896   : > { %1753 = vadd.xlane.f32.xlu0 %v5266_v32  ;;  %v2106_v4 = vpop.xlane.xlu0 %2105 }
 0x897   : > { %v2137_v16 = vsub.f32 %v5319_v46, %v2106_v4  ;;  %v6081_v46 = vld [vmem:[#allocation21_spill] sm:$0xff] }
 0x898   : > { %v2108_v33 = vpop.xlane.xlu1 %2107  ;;  %1755 = vadd.xlane.f32.xlu1 %v5268_v40 }
 0x899   : > { %v2153_v31 = vmul.f32 1.442695, %v2137_v16  ;;  %v2138_v47 = vsub.f32 %v5322_v41, %v2108_v33 }
 0x89a   : > { %1757 = vadd.xlane.f32.xlu0 %v5264_v44  ;;  %v2112_v3 = vpop.xlane.xlu0 %2111 }
 0x89b   : > { %v2155_v55 = vmul.f32 1.442695, %v2138_v47  ;;  %v2140_v29 = vsub.f32 %v5326_v53, %v2112_v3  ;;  %3818 = vpow2.f32 %v2153_v31 }
 0x89c   : > { %v2118_v35 = vpop.xlane.xlu1 %2117  ;;  %811 = vadd.xlane.f32.xlu1 %v6077_v15 }
 0x89d   : > { %3820 = vpow2.f32 %v2155_v55  ;;  %v2159_v30 = vmul.f32 1.442695, %v2140_v29  ;;  %v2143_v20 = vsub.f32 %v5330_v45, %v2118_v35 }
 0x89e   : > { %3822 = vpow2.f32 %v2157_v58  ;;  %813 = vadd.xlane.f32.xlu0 %v6078_v23  ;;  %v2120_v0 = vpop.xlane.xlu0 %2119 }
 0x89f   : > { %3824 = vpow2.f32 %v2159_v30  ;;  %v2144_v63 = vsub.f32 %v5334_v62, %v2120_v0  ;;  %v2165_v27 = vmul.f32 1.442695, %v2143_v20 }
 0x8a0   : > { %v2114_v51 = vpop.xlane.xlu1 %2113  ;;  %815 = vadd.xlane.f32.xlu1 %v6079_v28 }
 0x8a1   : > { %v2141_v52 = vsub.f32 %v5338_v12, %v2114_v51  ;;  %v2167_v32 = vmul.f32 1.442695, %v2144_v63  ;;  %3826 = vpow2.f32 %v2165_v27 }
 0x8a2   : > { %817 = vadd.xlane.f32.xlu0 %v6080_v19  ;;  %v2116_v49 = vpop.xlane.xlu0 %2115 }
 0x8a3   : > { %v2161_v56 = vmul.f32 1.442695, %v2141_v52  ;;  %v2142_v44 = vsub.f32 %v5342_v50, %v2116_v49 }
 0x8a4   : > { %v2126_v40 = vpop.xlane.xlu1 %2125  ;;  %819 = vadd.xlane.f32.xlu1 %v6081_v46  ;;  %v6085_v46 = vld [vmem:[#allocation24_spill] sm:$0xff] }
 0x8a5   : > { %v2163_v41 = vmul.f32 1.442695, %v2142_v44  ;;  %v2147_v53 = vsub.f32 %v5346_v18, %v2126_v40  ;;  %3828 = vpow2.f32 %v2161_v56  ;;  %v6084_v40 = vld [vmem:[#allocation25_spill] sm:$0xff] }
 0x8a6   : > { %821 = vadd.xlane.f32.xlu0 %v6082_v10  ;;  %v2128_v45 = vpop.xlane.xlu0 %2127  ;;  %v6088_v10 = vld [vmem:[#allocation29_spill] sm:$0xff] }
 0x8a7   : > { %3830 = vpow2.f32 %v2163_v41  ;;  %v2148_v62 = vsub.f32 %v5350_v60, %v2128_v45  ;;  %v2173_v5 = vmul.f32 1.442695, %v2147_v53  ;;  %v6086_v41 = vld [vmem:[#allocation28_spill] sm:$0xff]  ;;  %v6087_v53 = vld [vmem:[#allocation27_spill] sm:$0xff]  ;;  %v6089_v45 = vld [vmem:[#allocation26_spill] sm:$0xff] }
 0x8a8   : > { %3832 = vpow2.f32 %v2167_v32  ;;  %v2122_v12 = vpop.xlane.xlu1 %2121  ;;  %823 = vadd.xlane.f32.xlu1 %v6083_v37  ;;  %v3819_v50 = vpop.eup %3818  ;;  %v6092_v37 = vld [vmem:[#allocation30_spill] sm:$0xff] }
 0x8a9   : > { %v2145_v9 = vsub.f32 %v5354_v11, %v2122_v12  ;;  %v2175_v17 = vmul.f32 1.442695, %v2148_v62  ;;  %3834 = vpow2.f32 %v2173_v5  ;;  %v6090_v62 = vld [vmem:[#allocation32_spill] sm:$0xff]  ;;  %v6091_v12 = vld [vmem:[#allocation31_spill] sm:$0xff] }
 0x8aa   : > { %v3821_v24 = vpop.eup %3820  ;;  %v2124_v39 = vpop.xlane.xlu0 %2123 }
 0x8ab   : > { %v3823_v34 = vpop.eup %3822  ;;  %v2169_v2 = vmul.f32 1.442695, %v2145_v9  ;;  %v2146_v18 = vsub.f32 %v5358_v26, %v2124_v39  ;;  %v2217_v1 = vpack.c.bf16 %v3821_v24, %v3819_v50 }
 0x8ac   : > { %v3825_v6 = vpop.eup %3824  ;;  %v2134_v21 = vpop.xlane.xlu1 %2133  ;;  %2189 = vadd.xlane.f32.xlu1 %v3823_v34 }
 0x8ad   : > { %v2171_v60 = vmul.f32 1.442695, %v2146_v18  ;;  %v2151_v43 = vsub.f32 %v5362_v13, %v2134_v21  ;;  %3536 = vmatprep.mubr.bf16.mxu0 %v2217_v1  ;;  %2191 = vadd.xlane.f32.xlu0 %v3825_v6  ;;  %3836 = vpow2.f32 %v2169_v2  ;;  %v2218_v23 = vpack.c.bf16 %v3825_v6, %v3823_v34  ;;  %v6093_v21 = vld [vmem:[#allocation55_spill] sm:$0xff] }
 0x8ae   : > { %v2136_v4 = vpop.xlane.xlu0 %2135  ;;  %v3827_v31 = vpop.eup %3826 }
 0x8af   : > { %3838 = vpow2.f32 %v2171_v60  ;;  %v2152_v11 = vsub.f32 %v5366_v22, %v2136_v4  ;;  %v2181_v26 = vmul.f32 1.442695, %v2151_v43  ;;  %v6094_v43 = vld [vmem:[#allocation57_spill] sm:$0xff] }
 0x8b0   : > { %3840 = vpow2.f32 %v2175_v17  ;;  %v2130_v16 = vpop.xlane.xlu1 %2129  ;;  %2185 = vadd.xlane.f32.xlu1 %v3819_v50 }
 0x8b1   : > { %v2149_v33 = vsub.f32 %v5370_v38, %v2130_v16  ;;  %2187 = vadd.xlane.f32.xlu0 %v3821_v24  ;;  %v2183_v29 = vmul.f32 1.442695, %v2152_v11  ;;  %3842 = vpow2.f32 %v2181_v26 }
 0x8b2   : > { %v2132_v47 = vpop.xlane.xlu0 %2131  ;;  %v3829_v58 = vpop.eup %3828 }
 0x8b3   : > { %v2177_v3 = vmul.f32 1.442695, %v2149_v33  ;;  %v2150_v13 = vsub.f32 %v5374_v36, %v2132_v47  ;;  %v6095_v47 = vld [vmem:[#allocation54_spill] sm:$0xff] }
 0x8b4   : > { %v3831_v55 = vpop.eup %3830  ;;  %v2228_v35 = vpop.permute.xlu1 %2227  ;;  %2197 = vadd.xlane.f32.xlu1 %v3827_v31 }
 0x8b5   : > { %v3833_v15 = vpop.eup %3832  ;;  %v2179_v30 = vmul.f32 1.442695, %v2150_v13  ;;  %3532 = vmatprep.subr.bf16.mxu0 %v2228_v35  ;;  %3578 = vmatprep.subr.bf16.mxu1 %v2228_v35  ;;  %v2219_v22 = vpack.c.bf16 %v3831_v55, %v3829_v58  ;;  %3844 = vpow2.f32 %v2177_v3  ;;  %v6096_v3 = vld [vmem:[#allocation56_spill] sm:$0xff] }
 0x8b6   : > { %2199 = vadd.xlane.f32.xlu0 %v3833_v15  ;;  %3533 = vmatpush3.bf16.msra.mxu0 %v2228_v35  ;;  %v2226_v38 = vpop.permute.xlu0 %2225  ;;  %v3835_v36 = vpop.eup %3834  ;;  %v2220_v63 = vpack.c.bf16 %v3833_v15, %v3827_v31 }
 0x8b7   : > { %3846 = vpow2.f32 %v2179_v30  ;;  %3586 = vmatpush3.bf16.msra.mxu1 %v2228_v35  ;;  %3534 = vmatprep.subr.bf16.mxu0 %v2226_v38 }
 0x8b8   : > { %3848 = vpow2.f32 %v2183_v29  ;;  %3579 = vmatprep.subr.bf16.mxu1 %v2226_v38  ;;  %3540 = vmatprep.mubr.bf16.mxu1 %v2219_v22 }
 0x8b9   : > { %2193 = vadd.xlane.f32.xlu1 %v3829_v58 }
 0x8ba   : > { %2195 = vadd.xlane.f32.xlu0 %v3831_v55  ;;  %3535 = vmatpush3.bf16.msra.mxu0 %v2226_v38  ;;  %v3837_v20 = vpop.eup %3836 }
 0x8bb   : > { %3587 = vmatpush3.bf16.msra.mxu1 %v2226_v38 }
 0x8bc   : > { %v3839_v0 = vpop.eup %3838 }
 0x8bd   : > { %v3841_v51 = vpop.eup %3840  ;;  %2205 = vadd.xlane.f32.xlu1 %v3835_v36  ;;  %3537 = vmatmul.mubr.bf16.vlgmr.msra.gmra.mxu0 %v2218_v23  ;;  %v2221_v28 = vpack.c.bf16 %v3839_v0, %v3837_v20 }
 0x8be   : > { %2207 = vadd.xlane.f32.xlu0 %v3841_v51  ;;  %3541 = vmatmul.mubr.bf16.vlgmr.msra.gmra.mxu1 %v2220_v63  ;;  %v3843_v27 = vpop.eup %3842  ;;  %v2222_v49 = vpack.c.bf16 %v3841_v51, %v3835_v36 }
 0x8bf   : > { %3544 = vmatprep.mubr.bf16.mxu1 %v2221_v28 }
 0x8c1   : > { %2201 = vadd.xlane.f32.xlu1 %v3837_v20 }
 0x8c2   : > { %2203 = vadd.xlane.f32.xlu0 %v3839_v0  ;;  %v3845_v52 = vpop.eup %3844 }
 0x8c4   : > { %v3847_v19 = vpop.eup %3846 }
 0x8c5   : > { %v3849_v56 = vpop.eup %3848  ;;  %2213 = vadd.xlane.f32.xlu1 %v3843_v27  ;;  %v2223_v44 = vpack.c.bf16 %v3847_v19, %v3845_v52 }
 0x8c6   : > { %2215 = vadd.xlane.f32.xlu0 %v3849_v56  ;;  %3545 = vmatmul.mubr.bf16.gmra.mxu1 %v2222_v49  ;;  %v2224_v32 = vpack.c.bf16 %v3849_v56, %v3843_v27  ;;  %v6097_v49 = vld [vmem:[#allocation59_spill] sm:$0xff] }
 0x8c7   : > { %3548 = vmatprep.mubr.bf16.mxu1 %v2223_v44  ;;  %v6098_v44 = vld [vmem:[#allocation61_spill] sm:$0xff] }
 0x8c9   : > { %2209 = vadd.xlane.f32.xlu1 %v3845_v52 }
 0x8ca   : > { %2211 = vadd.xlane.f32.xlu0 %v3847_v19 }
 0x8cd   : > { %827 = vadd.xlane.f32.xlu1 %v6084_v40 }
 0x8ce   : > { %825 = vadd.xlane.f32.xlu0 %v6085_v46  ;;  %3549 = vmatmul.mubr.bf16.gmra.mxu1 %v2224_v32 }
 0x8d1   : > { %831 = vadd.xlane.f32.xlu1 %v6086_v41 }
 0x8d2   : > { %829 = vadd.xlane.f32.xlu0 %v6087_v53 }
 0x8d5   : > { %835 = vadd.xlane.f32.xlu1 %v6088_v10 }
 0x8d6   : > { %833 = vadd.xlane.f32.xlu0 %v6089_v45  ;;  %v6100_v45 = vld [vmem:[#allocation60_spill] sm:$0xff] }
 0x8d9   : > { %839 = vadd.xlane.f32.xlu1 %v6090_v62 }
 0x8da   : > { %837 = vadd.xlane.f32.xlu0 %v6091_v12 }
 0x8de   : > { %841 = vadd.xlane.f32.xlu0 %v6092_v37 }
 0x8e5   : > { %v1270_v50 = vpop.xlane.xlu1 %1269 }
 0x8e6   : > { %3850 = vrcp.f32 %v1270_v50 }
 0x8e7   : > { %v1272_v5 = vpop.xlane.xlu0 %1271 }
 0x8e8   : > { %3852 = vrcp.f32 %v1272_v5 }
 0x8e9   : > { %v1274_v9 = vpop.xlane.xlu1 %1273 }
 0x8ea   : > { %3854 = vrcp.f32 %v1274_v9 }
 0x8eb   : > { %v1276_v24 = vpop.xlane.xlu0 %1275 }
 0x8ec   : > { %3856 = vrcp.f32 %v1276_v24 }
 0x8ed   : > { %v1728_v39 = vpop.xlane.xlu1 %1727 }
 0x8ee   : > { %3858 = vrcp.f32 %v1728_v39 }
 0x8ef   : > { %v1730_v34 = vpop.xlane.xlu0 %1729 }
 0x8f0   : > { %3860 = vrcp.f32 %v1730_v34 }
 0x8f1   : > { %v1732_v2 = vpop.xlane.xlu1 %1731 }
 0x8f2   : > { %3862 = vrcp.f32 %v1732_v2 }
 0x8f3   : > { %v3851_v18 = vpop.eup %3850  ;;  %v1734_v1 = vpop.xlane.xlu0 %1733 }
 0x8f4   : > { %3864 = vrcp.f32 %v1734_v1  ;;  %v1446_v60 = vmul.f32 %v3851_v18, %v6093_v21 }
 0x8f5   : > { %v3853_v6 = vpop.eup %3852  ;;  %v1278_v17 = vpop.xlane.xlu1 %1277 }
 0x8f6   : > { %3866 = vrcp.f32 %v1278_v17  ;;  %v1447_v4 = vmul.f32 %v3853_v6, %v6094_v43 }
 0x8f7   : > { %v3855_v11 = vpop.eup %3854  ;;  %v1280_v16 = vpop.xlane.xlu0 %1279 }
 0x8f8   : > { %3868 = vrcp.f32 %v1280_v16  ;;  %v1462_v26 = vpack.c.bf16 %v1447_v4, %v1446_v60  ;;  %v1448_v58 = vmul.f32 %v3855_v11, %v6095_v47 }
 0x8f9   : > { %v3857_v33 = vpop.eup %3856  ;;  %v1282_v31 = vpop.xlane.xlu1 %1281 }
 0x8fa   : > { %3870 = vrcp.f32 %v1282_v31  ;;  %2394 = vrot.lane.b32.xlu1 %v1462_v26, %s4242_s15  ;;  %v1449_v13 = vmul.f32 %v3857_v33, %v6096_v3  ;;  %v6102_v26 = vld [vmem:[#allocation65_spill] sm:$0xff] }
 0x8fb   : > { %v3859_v55 = vpop.eup %3858  ;;  %v1284_v29 = vpop.xlane.xlu0 %1283 }
 0x8fc   : > { %3872 = vrcp.f32 %v1284_v29  ;;  %v1463_v35 = vpack.c.bf16 %v1449_v13, %v1448_v58  ;;  %v1904_v22 = vmul.f32 %v3859_v55, %v5284_v61  ;;  %v6104_v55 = vld [vmem:[#allocation64_spill] sm:$0xff] }
 0x8fd   : > { %v3861_v15 = vpop.eup %3860  ;;  %v1736_v30 = vpop.xlane.xlu1 %1735 }
 0x8fe   : > { %3874 = vrcp.f32 %v1736_v30  ;;  %2396 = vrot.lane.b32.xlu0 %v1463_v35, %s4242_s15  ;;  %v1905_v38 = vmul.f32 %v3861_v15, %v5288_v7 }
 0x8ff   : > { %v3863_v36 = vpop.eup %3862  ;;  %v1738_v20 = vpop.xlane.xlu0 %1737 }
 0x900   : > { %3876 = vrcp.f32 %v1738_v20  ;;  %v1920_v23 = vpack.c.bf16 %v1905_v38, %v1904_v22  ;;  %v1906_v51 = vmul.f32 %v3863_v36, %v5282_v42  ;;  %v3720_v38 = vld [vmem:[#allocation8 + $0x8] sm:$0xff]   ;;  %v3721_v36 = vld [vmem:[#allocation8] sm:$0xff]  }
 0x901   : > { %v3865_v0 = vpop.eup %3864  ;;  %v1740_v63 = vpop.xlane.xlu1 %1739  ;;  %3552 = vmatprep.subr.bf16.mxu1 %v3720_v38 }
 0x902   : > { %3878 = vrcp.f32 %v1740_v63  ;;  %2418 = vrot.lane.b32.xlu1 %v1920_v23, %s4243_s29  ;;  %v1907_v28 = vmul.f32 %v3865_v0, %v5286_v54  ;;  %v6099_v54 = vld [vmem:[#allocation58_spill] sm:$0xff]  ;;  %3553 = vmatpush3.bf16.msra.mxu1 %v3720_v38 }
 0x903   : > { %v3867_v27 = vpop.eup %3866  ;;  %v1742_v52 = vpop.xlane.xlu0 %1741  ;;  %3554 = vmatprep.subr.bf16.mxu1 %v3721_v36 }
 0x904   : > { %3880 = vrcp.f32 %v1742_v52  ;;  %v1921_v61 = vpack.c.bf16 %v1907_v28, %v1906_v51  ;;  %v1450_v56 = vmul.f32 %v3867_v27, %v6097_v49 }
 0x905   : > { %v3869_v19 = vpop.eup %3868  ;;  %v1286_v7 = vpop.xlane.xlu1 %1285 }
 0x906   : > { %3882 = vrcp.f32 %v1286_v7  ;;  %2420 = vrot.lane.b32.xlu1 %v1921_v61, %s4243_s29  ;;  %v1451_v32 = vmul.f32 %v3869_v19, %v6098_v44  ;;  %3555 = vmatpush3.bf16.msra.mxu1 %v3721_v36  ;;  %v6105_v7 = vld [vmem:[#allocation34_spill] sm:$0xff] }
 0x907   : > { %v3871_v40 = vpop.eup %3870  ;;  %v1288_v46 = vpop.xlane.xlu0 %1287 }
 0x908   : > { %3884 = vrcp.f32 %v1288_v46  ;;  %v1464_v41 = vpack.c.bf16 %v1451_v32, %v1450_v56  ;;  %v1452_v10 = vmul.f32 %v3871_v40, %v6099_v54  ;;  %v6106_v56 = vld [vmem:[#allocation36_spill] sm:$0xff] }
 0x909   : > { %v3873_v42 = vpop.eup %3872  ;;  %v1290_v53 = vpop.xlane.xlu1 %1289 }
 0x90a   : > { %3886 = vrcp.f32 %v1290_v53  ;;  %2398 = vrot.lane.b32.xlu0 %v1464_v41, %s4242_s15  ;;  %v1453_v62 = vmul.f32 %v3873_v42, %v6100_v45  ;;  %v6107_v41 = vld [vmem:[#allocation33_spill] sm:$0xff]  ;;  %v6108_v53 = vld [vmem:[#allocation35_spill] sm:$0xff] }
 0x90b   : > { %v3875_v12 = vpop.eup %3874  ;;  %v1292_v37 = vpop.xlane.xlu0 %1291 }
 0x90c   : > { %3888 = vrcp.f32 %v1292_v37  ;;  %v1465_v50 = vpack.c.bf16 %v1453_v62, %v1452_v10  ;;  %v1908_v24 = vmul.f32 %v3875_v12, %v5292_v48  ;;  %v6109_v12 = vld [vmem:[#allocation38_spill] sm:$0xff] }
 0x90d   : > { %v3877_v5 = vpop.eup %3876  ;;  %v5463_v9 = vpop.xlane.xlu1 %1743 }
 0x90e   : > { %2400 = vrot.lane.b32.xlu1 %v1465_v50, %s4242_s15  ;;  %v1909_v39 = vmul.f32 %v3877_v5, %v5296_v57  ;;  %v6101_v57 = vld [vmem:[#allocation63_spill] sm:$0xff]  ;;  %v6110_v50 = vld [vmem:[#allocation40_spill] sm:$0xff] }
 0x90f   : > { %v3879_v34 = vpop.eup %3878  ;;  %v5468_v2 = vpop.xlane.xlu0 %1745 }
 0x910   : > { %v1922_v18 = vpack.c.bf16 %v1909_v39, %v1908_v24  ;;  %v1910_v17 = vmul.f32 %v3879_v34, %v5290_v59 }
 0x911   : > { %v3881_v1 = vpop.eup %3880  ;;  %v5470_v6 = vpop.xlane.xlu1 %1747 }
 0x912   : > { %2422 = vrot.lane.b32.xlu0 %v1922_v18, %s4243_s29  ;;  %v1911_v21 = vmul.f32 %v3881_v1, %v5294_v8  ;;  %v6103_v8 = vld [vmem:[#allocation62_spill] sm:$0xff] }
 0x913   : > { %v3883_v60 = vpop.eup %3882  ;;  %v5475_v43 = vpop.xlane.xlu0 %1749 }
 0x914   : > { %v1923_v4 = vpack.c.bf16 %v1911_v21, %v1910_v17  ;;  %v1454_v16 = vmul.f32 %v3883_v60, %v6101_v57 }
 0x915   : > { %v3885_v48 = vpop.eup %3884  ;;  %v5477_v11 = vpop.xlane.xlu1 %1293 }
 0x916   : > { %2424 = vrot.lane.b32.xlu1 %v1923_v4, %s4243_s29  ;;  %v1455_v33 = vmul.f32 %v3885_v48, %v6102_v26 }
 0x917   : > { %v3887_v31 = vpop.eup %3886  ;;  %v5482_v47 = vpop.xlane.xlu0 %1295 }
 0x918   : > { %v1466_v58 = vpack.c.bf16 %v1455_v33, %v1454_v16  ;;  %v1456_v13 = vmul.f32 %v3887_v31, %v6103_v8 }
 0x919   : > { %v3889_v59 = vpop.eup %3888  ;;  %v5484_v3 = vpop.xlane.xlu1 %1297 }
 0x91a   : > { %2402 = vrot.lane.b32.xlu0 %v1466_v58, %s4242_s15  ;;  %v1457_v29 = vmul.f32 %v3889_v59, %v6104_v55 }
 0x91b   : > { %v1300_v35 = vpop.xlane.xlu0 %1299 }
 0x91c   : > { %v1467_v15 = vpack.c.bf16 %v1457_v29, %v1456_v13 }
 0x91d   : > { %v5489_v30 = vpop.xlane.xlu1 %1751 }
 0x91e   : > { %2404 = vrot.lane.b32.xlu1 %v1467_v15, %s4242_s15 }
 0x91f   : > { %v5492_v22 = vpop.xlane.xlu0 %1753 }
 0x921   : > { %v5494_v20 = vpop.xlane.xlu1 %1755 }
 0x923   : > { %v5496_v23 = vpop.xlane.xlu0 %1757 }
 0x925   : > { %v812_v0 = vpop.xlane.xlu1 %811 }
 0x926   : > { %3890 = vrcp.f32 %v812_v0 }
 0x927   : > { %v814_v63 = vpop.xlane.xlu0 %813 }
 0x928   : > { %3892 = vrcp.f32 %v814_v63 }
 0x929   : > { %v816_v51 = vpop.xlane.xlu1 %815 }
 0x92a   : > { %3894 = vrcp.f32 %v816_v51 }
 0x92b   : > { %v818_v28 = vpop.xlane.xlu0 %817 }
 0x92c   : > { %3896 = vrcp.f32 %v818_v28 }
 0x92d   : > { %v820_v27 = vpop.xlane.xlu1 %819 }
 0x92e   : > { %3898 = vrcp.f32 %v820_v27 }
 0x92f   : > { %v822_v52 = vpop.xlane.xlu0 %821 }
 0x930   : > { %3900 = vrcp.f32 %v822_v52 }
 0x931   : > { %v5522_v39 = vpop.xlane.xlu1 %823  ;;  %3902 = vrcp.f32 %v5468_v2 }
 0x932   : > { %3904 = vrcp.f32 %v5470_v6 }
 0x933   : > { %v3891_v61 = vpop.eup %3890  ;;  %3906 = vrcp.f32 %v5475_v43 }
 0x934   : > { %v5499_v49 = vmul.f32 %v3891_v61, %v6105_v7  ;;  %v6111_v7 = vld [vmem:[#allocation70_spill] sm:$0xff] }
 0x935   : > { %v3893_v19 = vpop.eup %3892  ;;  %v2190_v18 = vpop.xlane.xlu1 %2189 }
 0x936   : > { %v5502_v44 = vmul.f32 %v3893_v19, %v6106_v56  ;;  %v2192_v34 = vpop.xlane.xlu0 %2191  ;;  %3908 = vrcp.f32 %v2190_v18 }
 0x937   : > { %v3895_v32 = vpop.eup %3894  ;;  %3910 = vrcp.f32 %v2192_v34 }
 0x938   : > { %v1004_v40 = vpack.c.bf16 %v5502_v44, %v5499_v49  ;;  %v5507_v42 = vmul.f32 %v3895_v32, %v6107_v41 }
 0x939   : > { %v3897_v46 = vpop.eup %3896  ;;  %v2186_v17 = vpop.xlane.xlu1 %2185 }
 0x93a   : > { %v5510_v54 = vmul.f32 %v3897_v46, %v6108_v53  ;;  %v2188_v1 = vpop.xlane.xlu0 %2187  ;;  %3912 = vrcp.f32 %v2186_v17 }
 0x93b   : > { %v3899_v10 = vpop.eup %3898  ;;  %3914 = vrcp.f32 %v2188_v1 }
 0x93c   : > { %v1005_v45 = vpack.c.bf16 %v5510_v54, %v5507_v42  ;;  %v5515_v37 = vmul.f32 %v3899_v10, %v6109_v12  ;;  %3916 = vrcp.f32 %v5463_v9  ;;  %v6122_v42 = vld [vmem:[#allocation37_spill] sm:$0xff] }
 0x93d   : > { %v3901_v62 = vpop.eup %3900  ;;  %v2198_v60 = vpop.xlane.xlu1 %2197  ;;  %3918 = vrcp.f32 %v5482_v47 }
 0x93e   : > { %v5518_v5 = vmul.f32 %v3901_v62, %v6110_v50  ;;  %3920 = vrcp.f32 %v1300_v35  ;;  %v3903_v2 = vpop.eup %3902  ;;  %v6113_v62 = vld [vmem:[#allocation71_spill] sm:$0xff] }
 0x93f   : > { %v2200_v21 = vpop.xlane.xlu0 %2199  ;;  %v3905_v26 = vpop.eup %3904 }
 0x940   : > { %v1006_v24 = vpack.c.bf16 %v5518_v5, %v5515_v37  ;;  %3922 = vrcp.f32 %v2200_v21  ;;  %v3907_v31 = vpop.eup %3906  ;;  %v1914_v56 = vmul.f32 %v3905_v26, %v6111_v7  ;;  %v6125_v5 = vld [vmem:[#allocation42_spill] sm:$0xff] }
 0x941   : > { %3924 = vrcp.f32 %v2198_v60 }
 0x942   : > { %v2194_v48 = vpop.xlane.xlu1 %2193 }
 0x943   : > { %v2196_v4 = vpop.xlane.xlu0 %2195  ;;  %v3909_v59 = vpop.eup %3908 }
 0x944   : > { %3926 = vrcp.f32 %v2196_v4  ;;  %v3911_v8 = vpop.eup %3910 }
 0x945   : > { %3928 = vrcp.f32 %v5484_v3 }
 0x946   : > { %v2206_v16 = vpop.xlane.xlu1 %2205  ;;  %3930 = vrcp.f32 %v2194_v48 }
 0x947   : > { %v2208_v57 = vpop.xlane.xlu0 %2207  ;;  %3932 = vrcp.f32 %v5477_v11  ;;  %v3913_v55 = vpop.eup %3912  ;;  %v1915_v11 = vmul.f32 %v3907_v31, %v5302_v25  ;;  %v6112_v25 = vld [vmem:[#allocation72_spill] sm:$0xff] }
 0x948   : > { %3934 = vrcp.f32 %v5492_v22  ;;  %v3915_v15 = vpop.eup %3914  ;;  %v1913_v32 = vmul.f32 %v3903_v2, %v6112_v25 }
 0x949   : > { %3936 = vrcp.f32 %v5496_v23  ;;  %v3917_v0 = vpop.eup %3916 }
 0x94a   : > { %v2202_v9 = vpop.xlane.xlu1 %2201  ;;  %3938 = vrcp.f32 %v2208_v57  ;;  %v3919_v27 = vpop.eup %3918  ;;  %v1912_v12 = vmul.f32 %v3917_v0, %v6113_v62  ;;  %v6120_v62 = vld [vmem:[#allocation74_spill] sm:$0xff] }
 0x94b   : > { %v2204_v6 = vpop.xlane.xlu0 %2203  ;;  %3940 = vrcp.f32 %v2206_v16  ;;  %v3921_v52 = vpop.eup %3920 }
 0x94c   : > { %3942 = vrcp.f32 %v2204_v6  ;;  %v1924_v60 = vpack.c.bf16 %v1913_v32, %v1912_v12  ;;  %v6114_v6 = vld [vmem:[#allocation68_spill] sm:$0xff]  ;;  %v6119_v32 = vld [vmem:[#allocation75_spill] sm:$0xff] }
 0x94d   : > { %3944 = vrcp.f32 %v5494_v20  ;;  %v3923_v46 = vpop.eup %3922  ;;  %v1925_v20 = vpack.c.bf16 %v1915_v11, %v1914_v56  ;;  %v6118_v56 = vld [vmem:[#allocation73_spill] sm:$0xff] }
 0x94e   : > { %v2214_v23 = vpop.xlane.xlu1 %2213  ;;  %3946 = vrcp.f32 %v2202_v9  ;;  %v3925_v41 = vpop.eup %3924 }
 0x94f   : > { %v2216_v38 = vpop.xlane.xlu0 %2215  ;;  %3948 = vrcp.f32 %v5489_v30 }
 0x950   : > { %3950 = vrcp.f32 %v2216_v38 }
 0x951   : > { %v3927_v50 = vpop.eup %3926  ;;  %3952 = vrcp.f32 %v2214_v23 }
 0x952   : > { %v3929_v18 = vpop.eup %3928  ;;  %v2210_v30 = vpop.xlane.xlu1 %2209 }
 0x953   : > { %v2212_v34 = vpop.xlane.xlu0 %2211  ;;  %v3931_v4 = vpop.eup %3930 }
 0x954   : > { %v3933_v48 = vpop.eup %3932  ;;  %3954 = vrcp.f32 %v2212_v34 }
 0x955   : > { %v3935_v26 = vpop.eup %3934  ;;  %3956 = vrcp.f32 %v2210_v30 }
 0x956   : > { %v3937_v31 = vpop.eup %3936 }
 0x957   : > { %v826_v30 = vpop.xlane.xlu0 %825 }
 0x958   : > { %3958 = vrcp.f32 %v826_v30 }
 0x959   : > { %3960 = vrcp.f32 %v5522_v39 }
 0x97d   : > { %v3538_v43 = vpop.f32.mrf.mxu0 }
 0x97e   : > { %v3542_v33 = vpop.f32.mrf.mxu1  ;;  %v2364_v3 = vmul.f32 %v3909_v59, %v3538_v43  ;;  %v1461_v43 = vmul.f32 %v3921_v52, %v6114_v6  ;;  %v1919_v52 = vmul.f32 %v3937_v31, %v5310_v14 }
 0x97f   : > { %v2283_v58 = vpop.f32.mrf.mxu0  ;;  %v2368_v1 = vmul.f32 %v3925_v41, %v3542_v33 }
 0x980   : > { %v2299_v47 = vpop.f32.mrf.mxu1  ;;  %v2362_v63 = vmul.f32 %v3913_v55, %v2283_v58  ;;  %v6115_v58 = vld [vmem:[#allocation66_spill] sm:$0xff]  ;;  %v3939_v55 = vpop.eup %3938 }
 0x981   : > { %v3539_v13 = vpop.f32.mrf.mxu0  ;;  %v2366_v57 = vmul.f32 %v3931_v4, %v2299_v47  ;;  %v1460_v59 = vmul.f32 %v3929_v18, %v6115_v58  ;;  %v828_v4 = vpop.xlane.xlu1 %827 }
 0x982   : > { %v2365_v29 = vmul.f32 %v3911_v8, %v3539_v13  ;;  %v3543_v35 = vpop.f32.mrf.mxu1  ;;  %v6116_v8 = vld [vmem:[#allocation69_spill] sm:$0xff] }
 0x983   : > { %v2286_v36 = vpop.f32.mrf.mxu0  ;;  %v2369_v53 = vmul.f32 %v3923_v46, %v3543_v35  ;;  %v1459_v13 = vmul.f32 %v3919_v27, %v6116_v8  ;;  %v1469_v35 = vpack.c.bf16 %v1461_v43, %v1460_v59 }
 0x984   : > { %v2379_v22 = vpack.c.bf16 %v2365_v29, %v2364_v3  ;;  %v2363_v51 = vmul.f32 %v3915_v15, %v2286_v36  ;;  %v2302_v28 = vpop.f32.mrf.mxu1  ;;  %v3941_v3 = vpop.eup %3940  ;;  %v6117_v15 = vld [vmem:[#allocation67_spill] sm:$0xff] }
 0x985   : > { %v2367_v17 = vmul.f32 %v3927_v50, %v2302_v28  ;;  %v2381_v16 = vpack.c.bf16 %v2369_v53, %v2368_v1  ;;  %v1458_v38 = vmul.f32 %v3933_v48, %v6117_v15  ;;  %v3943_v36 = vpop.eup %3942  ;;  %v832_v48 = vpop.xlane.xlu1 %831 }
 0x986   : > { %v2378_v61 = vpack.c.bf16 %v2363_v51, %v2362_v63  ;;  %v3546_v19 = vpop.f32.mrf.mxu1  ;;  %2444 = vrot.lane.b32.xlu1 %v2379_v22, %s4244_s14  ;;  %v3945_v11 = vpop.eup %3944 }
 0x987   : > { %v2380_v33 = vpack.c.bf16 %v2367_v17, %v2366_v57  ;;  %v2372_v0 = vmul.f32 %v3941_v3, %v3546_v19  ;;  %v1468_v22 = vpack.c.bf16 %v1459_v13, %v1458_v38  ;;  %v3947_v51 = vpop.eup %3946  ;;  %v1918_v25 = vmul.f32 %v3945_v11, %v6118_v56  ;;  %v830_v57 = vpop.xlane.xlu0 %829 }
 0x988   : > { %v2315_v10 = vpop.f32.mrf.mxu1  ;;  %2442 = vrot.lane.b32.xlu0 %v2378_v61, %s4244_s14  ;;  %v3949_v61 = vpop.eup %3948  ;;  %v1917_v19 = vmul.f32 %v3935_v26, %v6119_v32  ;;  %3962 = vrcp.f32 %v830_v57 }
 0x989   : > { %v2370_v23 = vmul.f32 %v3947_v51, %v2315_v10  ;;  %v3951_v46 = vpop.eup %3950  ;;  %v1927_v10 = vpack.c.bf16 %v1919_v52, %v1918_v25  ;;  %v1916_v12 = vmul.f32 %v3949_v61, %v6120_v62 }
 0x98a   : > { %v3547_v21 = vpop.f32.mrf.mxu1  ;;  %2428 = vrot.lane.b32.xlu1 %v1925_v20, %s4243_s29  ;;  %v3953_v53 = vpop.eup %3952 }
 0x98b   : > { %v2373_v47 = vmul.f32 %v3939_v55, %v3547_v21  ;;  %v3955_v50 = vpop.eup %3954  ;;  %v1926_v18 = vpack.c.bf16 %v1917_v19, %v1916_v12  ;;  %v6126_v12 = vld [vmem:[#allocation41_spill] sm:$0xff] }
 0x98c   : > { %v2318_v2 = vpop.f32.mrf.mxu1  ;;  %2426 = vrot.lane.b32.xlu0 %v1924_v60, %s4243_s29  ;;  %v3957_v1 = vpop.eup %3956 }
 0x98d   : > { %v2371_v63 = vmul.f32 %v3943_v36, %v2318_v2  ;;  %v2383_v27 = vpack.c.bf16 %v2373_v47, %v2372_v0  ;;  %v834_v2 = vpop.xlane.xlu0 %833 }
 0x98e   : > { %v3550_v9 = vpop.f32.mrf.mxu1  ;;  %2448 = vrot.lane.b32.xlu1 %v2381_v16, %s4244_s14  ;;  %v836_v16 = vpop.xlane.xlu1 %835  ;;  %3964 = vrcp.f32 %v834_v2 }
 0x98f   : > { %v2382_v7 = vpack.c.bf16 %v2371_v63, %v2370_v23  ;;  %v2376_v34 = vmul.f32 %v3953_v53, %v3550_v9  ;;  %3966 = vrcp.f32 %v828_v4 }
 0x990   : > { %v2331_v29 = vpop.f32.mrf.mxu1  ;;  %2446 = vrot.lane.b32.xlu0 %v2380_v33, %s4244_s14  ;;  %3968 = vrcp.f32 %v832_v48 }
 0x991   : > { %v2374_v17 = vmul.f32 %v3957_v1, %v2331_v29  ;;  %v838_v26 = vpop.xlane.xlu0 %837 }
 0x992   : > { %2408 = vrot.lane.b32.xlu1 %v1469_v35, %s4242_s15  ;;  %v3551_v28 = vpop.f32.mrf.mxu1  ;;  %v840_v6 = vpop.xlane.xlu1 %839  ;;  %3970 = vrcp.f32 %v838_v26 }
 0x993   : > { %v2377_v20 = vmul.f32 %v3951_v46, %v3551_v28  ;;  %v3959_v35 = vpop.eup %3958  ;;  %v6123_v46 = vld [vmem:[#allocation44_spill] sm:$0xff] }
 0x994   : > { %2406 = vrot.lane.b32.xlu0 %v1468_v22, %s4242_s15  ;;  %v2334_v41 = vpop.f32.mrf.mxu1  ;;  %v3961_v11 = vpop.eup %3960  ;;  %v6121_v22 = vld [vmem:[#allocation39_spill] sm:$0xff] }
 0x995   : > { %v2375_v14 = vmul.f32 %v3955_v50, %v2334_v41  ;;  %v2385_v21 = vpack.c.bf16 %v2377_v20, %v2376_v34  ;;  %v842_v33 = vpop.xlane.xlu0 %841  ;;  %v995_v49 = vmul.f32 %v3959_v35, %v6121_v22  ;;  %v994_v54 = vmul.f32 %v3961_v11, %v6122_v42  ;;  %v3963_v51 = vpop.eup %3962  ;;  %v6124_v20 = vld [vmem:[#allocation43_spill] sm:$0xff]  ;;  %v5616_v22 = vld [vmem:[%s5960_s5] ss:$0 sm:$0xff] }
 0x996   : > { %2452 = vrot.lane.b32.xlu1 %v2383_v27, %s4244_s14  ;;  %v2395_v43 = vpop.permute.xlu1 %2394  ;;  %3972 = vrcp.f32 %v842_v33  ;;  %v997_v41 = vmul.f32 %v3963_v51, %v6123_v46  ;;  %v4026_v42 = vld [vmem:[%s4445_s20 + $0x10] sm:$0xff] }
 0x997   : > { %v2384_v60 = vpack.c.bf16 %v2375_v14, %v2374_v17  ;;  %v2460_v15 = vsel %vm585_vm1, %v1004_v40, %v2395_v43  ;;  %3974 = vrcp.f32 %v836_v16  ;;  %v1007_v28 = vpack.c.bf16 %v995_v49, %v994_v54 }
 0x998   : > { %2450 = vrot.lane.b32.xlu0 %v2382_v7, %s4244_s14  ;;  %3976 = vrcp.f32 %v840_v6  ;;  %v6127_v6 = vld [vmem:[#allocation48_spill] sm:$0xff] }
 0x999   : > { %v2397_v58 = vpop.permute.xlu0 %2396 }
 0x99a   : > { %2432 = vrot.lane.b32.xlu1 %v1927_v10, %s4243_s29  ;;  %v2419_v31 = vpop.permute.xlu1 %2418  ;;  %v2463_v39 = vsel %vm585_vm1, %v1005_v45, %v2397_v58 }
 0x99b   : > { %v2484_v38 = vsel %vm2482_vm2, %v2460_v15, %v2419_v31  ;;  %v3965_v27 = vpop.eup %3964  ;;  %v6128_v31 = vld [vmem:[#allocation47_spill] sm:$0xff] }
 0x99c   : > { %2430 = vrot.lane.b32.xlu0 %v1926_v18, %s4243_s29  ;;  %v3967_v61 = vpop.eup %3966  ;;  %v999_v10 = vmul.f32 %v3965_v27, %v6124_v20  ;;  %s4245_s29 = smov [#allocation10]  }
 0x99d   : > { %v2399_v8 = vpop.permute.xlu0 %2398  ;;  %v3969_v32 = vpop.eup %3968 }
 0x99e   : > { %2456 = vrot.lane.b32.xlu1 %v2385_v21, %s4244_s14  ;;  %v2421_v9 = vpop.permute.xlu1 %2420  ;;  %v2466_v52 = vsel %vm585_vm1, %v1006_v24, %v2399_v8  ;;  %v996_v24 = vmul.f32 %v3967_v61, %v6125_v5  ;;  %v998_v50 = vmul.f32 %v3969_v32, %v6126_v12 }
 0x99f   : > { %v2486_v0 = vsel %vm2482_vm2, %v2463_v39, %v2421_v9  ;;  %v3971_v18 = vpop.eup %3970 }
 0x9a0   : > { %2454 = vrot.lane.b32.xlu0 %v2384_v60, %s4244_s14  ;;  %v1008_v14 = vpack.c.bf16 %v997_v41, %v996_v24  ;;  %v1009_v1 = vpack.c.bf16 %v999_v10, %v998_v50  ;;  %v1001_v43 = vmul.f32 %v3971_v18, %v6127_v6  ;;  %v4030_v10 = vld [vmem:[%s4445_s20 + $0x30] sm:$0xff]  ;;  %s4152_s14 = sshll.u32 %s4245_s29, 4  ;;  %s4153_s14 = int_to_ptr.vmem [resolvable:$false] %s4152_s14 }
 0x9a1   : > { %v2423_v55 = vpop.permute.xlu0 %2422  ;;  %v4034_v6 = vld [vmem:[%s4445_s20 + $0x50] sm:$0xff]  ;;  %s4154_s16 = scalar_lea.vmem %s4153_s14, 4096  ;;  %p4155_p12 = scmp.lt.s32.totalorder %s5908_s12, %s4153_s14 }
 0x9a2   : > { %v2401_v59 = vpop.permute.xlu1 %2400  ;;  %v2488_v56 = vsel %vm2482_vm2, %v2466_v52, %v2423_v55  ;;  %p4156_p9 = scmp.lt.s32.totalorder %s4154_s16, %s4148_s26 }
 0x9a3   : > { %v2469_v7 = vsel %vm585_vm1, %v1007_v28, %v2401_v59  ;;  %v3973_v21 = vpop.eup %3972  ;;  %v6129_v59 = vld [vmem:[#allocation46_spill] sm:$0xff]  ;;  %v4027_v28 = vld [vmem:[%s4445_s20] sm:$0xff] }
 0x9a4   : > { %v3975_v4 = vpop.eup %3974  ;;  %v1003_v33 = vmul.f32 %v3973_v21, %v6128_v31  ;;  %p4157_p7 = por %p4156_p9, %p4155_p12 }
 0x9a5   : > { %v2403_v47 = vpop.permute.xlu0 %2402  ;;  %v3977_v16 = vpop.eup %3976  ;;  %v1000_v8 = vmul.f32 %v3975_v4, %v6129_v59 }
 0x9a6   : > { %v2425_v13 = vpop.permute.xlu1 %2424  ;;  %v2472_v60 = vsel %vm585_vm1, %v1008_v14, %v2403_v47  ;;  %v4031_v14 = vld [vmem:[%s4445_s20 + $0x20] sm:$0xff]  ;;  %p4158_p10 = pnand %p4157_p7, %p4151_p11 }
 0x9a7   : > { %v2490_v19 = vsel %vm2482_vm2, %v2469_v7, %v2425_v13  ;;  %v6130_v13 = vld [vmem:[#allocation45_spill] sm:$0xff]  ;;  %v1010_v47 = vpack.c.bf16 %v1001_v43, %v1000_v8 }
 0x9a8   : > { %v1002_v55 = vmul.f32 %v3977_v16, %v6130_v13  ;;  %v4035_v8 = vld [vmem:[%s4445_s20 + $0x40] sm:$0xff] }
 0x9aa   : > { %v2405_v3 = vpop.permute.xlu1 %2404 }
 0x9ab   : > { %v2475_v30 = vsel %vm585_vm1, %v1009_v1, %v2405_v3  ;;  %v4032_v1 = vld [vmem:[%s4445_s20 + $0x38] sm:$0xff] }
 0x9f8   : > { %v2445_v29 = vpop.permute.xlu1 %2444 }
 0x9f9   : > { %v2503_v44 = vsel %vm2499_vm3, %v2486_v0, %v2445_v29  ;;  %v1011_v29 = vpack.c.bf16 %v1003_v33, %v1002_v55  ;;  %v4036_v55 = vld [vmem:[%s4445_s20 + $0x58] sm:$0xff] }
 0x9fa   : > { %v2443_v36 = vpop.permute.xlu0 %2442 }
 0x9fb   : > { %v2501_v63 = vsel %vm2499_vm3, %v2484_v38, %v2443_v36 }
 0x9fc   : > { %v2429_v40 = vpop.permute.xlu1 %2428  ;;  %3556 = vmatprep.mubr.msk.bf16.mxu1 %vm415_vm0, %v2501_v63 }
 0x9fd   : > { %3557 = vmatmul.mubr.msk.bf16.vlgmr.msra.gmra.mxu1 %vm415_vm0, %v2503_v44  ;;  %v2494_v2 = vsel %vm2482_vm2, %v2475_v30, %v2429_v40  ;;  %v4033_v30 = vld [vmem:[%s4445_s20 + $0x28] sm:$0xff] }
 0x9fe   : > { %v2427_v45 = vpop.permute.xlu0 %2426 }
 0x9ff   : > { %v2492_v48 = vsel %vm2482_vm2, %v2472_v60, %v2427_v45 }
 0xa00   : > { %v2449_v23 = vpop.permute.xlu1 %2448 }
 0xa01   : > { %v2507_v62 = vsel %vm2499_vm3, %v2490_v19, %v2449_v23  ;;  %v4029_v19 = vld [vmem:[%s4445_s20 + $0x8] sm:$0xff] }
 0xa02   : > { %v2447_v25 = vpop.permute.xlu0 %2446 }
 0xa03   : > { %v2505_v53 = vsel %vm2499_vm3, %v2488_v56, %v2447_v25  ;;  %v4028_v25 = vld [vmem:[%s4445_s20 + $0x18] sm:$0xff] }
 0xa04   : > { %v2409_v37 = vpop.permute.xlu1 %2408  ;;  %3560 = vmatprep.mubr.msk.bf16.mxu1 %vm415_vm0, %v2505_v53 }
 0xa05   : > { %3561 = vmatmul.mubr.msk.bf16.gmra.mxu1 %vm415_vm0, %v2507_v62  ;;  %v2481_v39 = vsel %vm585_vm1, %v1011_v29, %v2409_v37 }
 0xa06   : > { %v2407_v34 = vpop.permute.xlu0 %2406 }
 0xa07   : > { %v2478_v35 = vsel %vm585_vm1, %v1010_v47, %v2407_v34 }
 0xa08   : > { %v2453_v17 = vpop.permute.xlu1 %2452 }
 0xa09   : > { %v2511_v9 = vsel %vm2499_vm3, %v2494_v2, %v2453_v17 }
 0xa0a   : > { %v2451_v57 = vpop.permute.xlu0 %2450 }
 0xa0b   : > { %v2509_v26 = vsel %vm2499_vm3, %v2492_v48, %v2451_v57 }
 0xa0c   : > { %v2433_v58 = vpop.permute.xlu1 %2432  ;;  %3564 = vmatprep.mubr.msk.bf16.mxu1 %vm415_vm0, %v2509_v26 }
 0xa0d   : > { %3565 = vmatmul.mubr.msk.bf16.gmra.mxu1 %vm415_vm0, %v2511_v9  ;;  %v2498_v11 = vsel %vm2482_vm2, %v2481_v39, %v2433_v58 }
 0xa0e   : > { %v2431_v3 = vpop.permute.xlu0 %2430 }
 0xa0f   : > { %v2496_v38 = vsel %vm2482_vm2, %v2478_v35, %v2431_v3 }
 0xa10   : > { %v2457_v15 = vpop.permute.xlu1 %2456 }
 0xa11   : > { %v2515_v63 = vsel %vm2499_vm3, %v2498_v11, %v2457_v15  ;;  %v4037_v15 = vld [vmem:[%s4445_s20 + $0x48] sm:$0xff] }
 0xa12   : > { %v2455_v36 = vpop.permute.xlu0 %2454 }
 0xa13   : > { %v2513_v0 = vsel %vm2499_vm3, %v2496_v38, %v2455_v36 }
 0xa14   : > { %3568 = vmatprep.mubr.msk.bf16.mxu1 %vm415_vm0, %v2513_v0 }
 0xa15   : > { %3569 = vmatmul.mubr.msk.bf16.gmra.mxu1 %vm415_vm0, %v2515_v63 }
 0xabd   : > { %v3558_v49 = vpop.f32.mrf.mxu1 }
 0xabe   : > { %v2598_v44 = vadd.f32 %v3558_v49, %v5616_v22 }
 0xabf   : > { %v2589_v40 = vpop.f32.mrf.mxu1 }
 0xac0   : > { %v5620_v54 = vadd.f32 %v4026_v42, %v2598_v44  ;;  %v2590_v45 = vadd.f32 %v5616_v22, %v2589_v40  ;;  %v4038_v44 = vld [vmem:[%s4445_s20 + $0x60] sm:$0xff] }
 0xac1   : > { %v3559_v51 = vpop.f32.mrf.mxu1 }
 0xac2   : > { %v5624_v23 = vadd.f32 %v4027_v28, %v2590_v45  ;;  %v2601_v27 = vadd.f32 %v3559_v51, %v5616_v22  ;;  %v2674_v52 = vsel %vm415_vm0, %v5620_v54, 0.0  ;;  %v4039_v51 = vld [vmem:[%s4445_s20 + $0x70] sm:$0xff] }
 0xac3   : > { %2675 = vadd.xlane.f32.xlu0 %v2674_v52  ;;  %v2592_v61 = vpop.f32.mrf.mxu1 }
 0xac4   : > { %v2593_v7 = vadd.f32 %v5616_v22, %v2592_v61  ;;  %v5631_v32 = vadd.f32 %v4028_v25, %v2601_v27  ;;  %v2668_v53 = vsel %vm415_vm0, %v5624_v23, 0.0  ;;  %v4041_v25 = vld [vmem:[%s4445_s20 + $0x78] sm:$0xff] }
 0xac5   : > { %v3562_v56 = vpop.f32.mrf.mxu1 }
 0xac6   : > { %v5634_v46 = vadd.f32 %v4029_v19, %v2593_v7  ;;  %v2614_v41 = vadd.f32 %v3562_v56, %v5616_v22  ;;  %v2677_v50 = vsel %vm415_vm0, %v5631_v32, 0.0  ;;  %v4040_v7 = vld [vmem:[%s4445_s20 + $0x68] sm:$0xff] }
 0xac7   : > { %2669 = vadd.xlane.f32.xlu0 %v2668_v53  ;;  %v2605_v20 = vpop.f32.mrf.mxu1 }
 0xac8   : > { %v5640_v62 = vadd.f32 %v4030_v10, %v2614_v41  ;;  %v2606_v37 = vadd.f32 %v5616_v22, %v2605_v20  ;;  %v2671_v5 = vsel %vm415_vm0, %v5634_v46, 0.0 }
 0xac9   : > { %2672 = vadd.xlane.f32.xlu1 %v2671_v5  ;;  %v3563_v24 = vpop.f32.mrf.mxu1 }
 0xaca   : > { %v2617_v12 = vadd.f32 %v3563_v24, %v5616_v22  ;;  %v5649_v18 = vadd.f32 %v4031_v14, %v2606_v37  ;;  %v2686_v60 = vsel %vm415_vm0, %v5640_v62, 0.0 }
 0xacb   : > { %2678 = vadd.xlane.f32.xlu0 %v2677_v50  ;;  %v2608_v34 = vpop.f32.mrf.mxu1 }
 0xacc   : > { %v5652_v17 = vadd.f32 %v4032_v1, %v2617_v12  ;;  %v2609_v21 = vadd.f32 %v5616_v22, %v2608_v34  ;;  %v2680_v31 = vsel %vm415_vm0, %v5649_v18, 0.0 }
 0xacd   : > { %2687 = vadd.xlane.f32.xlu1 %v2686_v60  ;;  %v3566_v4 = vpop.f32.mrf.mxu1 }
 0xace   : > { %v5658_v48 = vadd.f32 %v4033_v30, %v2609_v21  ;;  %v2630_v57 = vadd.f32 %v3566_v4, %v5616_v22  ;;  %v2689_v16 = vsel %vm415_vm0, %v5652_v17, 0.0 }
 0xacf   : > { %2690 = vadd.xlane.f32.xlu0 %v2689_v16  ;;  %v2621_v2 = vpop.f32.mrf.mxu1 }
 0xad0   : > { %v5664_v43 = vadd.f32 %v4034_v6, %v2630_v57  ;;  %v2622_v26 = vadd.f32 %v5616_v22, %v2621_v2  ;;  %v2683_v58 = vsel %vm415_vm0, %v5658_v48, 0.0 }
 0xad1   : > { %2681 = vadd.xlane.f32.xlu1 %v2680_v31  ;;  %v3567_v33 = vpop.f32.mrf.mxu1 }
 0xad2   : > { %v2633_v9 = vadd.f32 %v3567_v33, %v5616_v22  ;;  %v5673_v13 = vadd.f32 %v4035_v8, %v2622_v26  ;;  %v2698_v29 = vsel %vm415_vm0, %v5664_v43, 0.0 }
 0xad3   : > { %2684 = vadd.xlane.f32.xlu0 %v2683_v58  ;;  %v2624_v59 = vpop.f32.mrf.mxu1 }
 0xad4   : > { %v5676_v3 = vadd.f32 %v4036_v55, %v2633_v9  ;;  %v2625_v47 = vadd.f32 %v5616_v22, %v2624_v59  ;;  %v2692_v63 = vsel %vm415_vm0, %v5673_v13, 0.0 }
 0xad5   : > { %2699 = vadd.xlane.f32.xlu1 %v2698_v29  ;;  %v3570_v35 = vpop.f32.mrf.mxu1 }
 0xad6   : > { %v5682_v39 = vadd.f32 %v4037_v15, %v2625_v47  ;;  %v2701_v38 = vsel %vm415_vm0, %v5676_v3, 0.0  ;;  %v2646_v11 = vadd.f32 %v3570_v35, %v5616_v22 }
 0xad7   : > { %2702 = vadd.xlane.f32.xlu0 %v2701_v38  ;;  %v2637_v36 = vpop.f32.mrf.mxu1 }
 0xad8   : > { %v2638_v0 = vadd.f32 %v5616_v22, %v2637_v36  ;;  %v2695_v42 = vsel %vm415_vm0, %v5682_v39, 0.0  ;;  %v5696_v28 = vadd.f32 %v4039_v51, %v2646_v11 }
 0xad9   : > { %2693 = vadd.xlane.f32.xlu1 %v2692_v63  ;;  %v3571_v49 = vpop.f32.mrf.mxu1 }
 0xada   : > { %v5691_v40 = vadd.f32 %v4038_v44, %v2638_v0  ;;  %v2649_v27 = vadd.f32 %v3571_v49, %v5616_v22  ;;  %v2710_v53 = vsel %vm415_vm0, %v5696_v28, 0.0 }
 0xadb   : > { %2696 = vadd.xlane.f32.xlu0 %v2695_v42  ;;  %v2640_v45 = vpop.f32.mrf.mxu1 }
 0xadc   : > { %v2641_v52 = vadd.f32 %v5616_v22, %v2640_v45  ;;  %v2704_v61 = vsel %vm415_vm0, %v5691_v40, 0.0  ;;  %v5706_v19 = vadd.f32 %v4041_v25, %v2649_v27 }
 0xadd   : > { %2705 = vadd.xlane.f32.xlu1 %v2704_v61 }
 0xade   : > { %v5703_v56 = vadd.f32 %v4040_v7, %v2641_v52  ;;  %v2713_v22 = vsel %vm415_vm0, %v5706_v19, 0.0 }
 0xae0   : > { %v2707_v41 = vsel %vm415_vm0, %v5703_v56, 0.0 }
 0xae1   : > { %2708 = vadd.xlane.f32.xlu0 %v2707_v41  ;;  %2711 = vadd.xlane.f32.xlu1 %v2710_v53 }
 0xae5   : > { %2714 = vadd.xlane.f32.xlu0 %v2713_v22 }
 0xb4c   : > { %v2676_v20 = vpop.xlane.xlu0 %2675 }
 0xb4d   : > { %v2719_v10 = vmul.f32 0.03125, %v2676_v20 }
 0xb4f   : > { %v5715_v37 = vsub.f32 %v5620_v54, %v2719_v10 }
 0xb50   : > { %v2670_v5 = vpop.xlane.xlu0 %2669 }
 0xb51   : > { %v2717_v24 = vmul.f32 0.03125, %v2670_v5  ;;  %v2751_v12 = vmul.f32 %v5715_v37, %v5715_v37 }
 0xb52   : > { %v2673_v50 = vpop.xlane.xlu1 %2672 }
 0xb53   : > { %v5720_v34 = vsub.f32 %v5624_v23, %v2717_v24  ;;  %v2718_v14 = vmul.f32 0.03125, %v2673_v50  ;;  %v2771_v1 = vsel %vm415_vm0, %v2751_v12, 0.0 }
 0xb54   : > { %2772 = vadd.xlane.f32.xlu1 %v2771_v1  ;;  %v2679_v21 = vpop.xlane.xlu0 %2678 }
 0xb55   : > { %v2720_v60 = vmul.f32 0.03125, %v2679_v21  ;;  %v2749_v4 = vmul.f32 %v5720_v34, %v5720_v34  ;;  %v5726_v54 = vsub.f32 %v5634_v46, %v2718_v14 }
 0xb56   : > { %v2688_v30 = vpop.xlane.xlu1 %2687 }
 0xb57   : > { %v5729_v57 = vsub.f32 %v5631_v32, %v2720_v60  ;;  %v2723_v16 = vmul.f32 0.03125, %v2688_v30  ;;  %v2765_v23 = vsel %vm415_vm0, %v2749_v4, 0.0  ;;  %v2750_v46 = vmul.f32 %v5726_v54, %v5726_v54 }
 0xb58   : > { %2766 = vadd.xlane.f32.xlu1 %v2765_v23  ;;  %v2691_v2 = vpop.xlane.xlu0 %2690 }
 0xb59   : > { %v5733_v6 = vsub.f32 %v5640_v62, %v2723_v16  ;;  %v2724_v26 = vmul.f32 0.03125, %v2691_v2  ;;  %v2752_v31 = vmul.f32 %v5729_v57, %v5729_v57  ;;  %v2768_v38 = vsel %vm415_vm0, %v2750_v46, 0.0 }
 0xb5a   : > { %v2682_v33 = vpop.xlane.xlu1 %2681 }
 0xb5b   : > { %v5740_v9 = vsub.f32 %v5652_v17, %v2724_v26  ;;  %v2721_v32 = vmul.f32 0.03125, %v2682_v33  ;;  %v2774_v58 = vsel %vm415_vm0, %v2752_v31, 0.0  ;;  %v2755_v59 = vmul.f32 %v5733_v6, %v5733_v6 }
 0xb5c   : > { %2775 = vadd.xlane.f32.xlu0 %v2774_v58  ;;  %v2685_v62 = vpop.xlane.xlu0 %2684 }
 0xb5d   : > { %v5746_v8 = vsub.f32 %v5649_v18, %v2721_v32  ;;  %v2722_v55 = vmul.f32 0.03125, %v2685_v62  ;;  %v2783_v47 = vsel %vm415_vm0, %v2755_v59, 0.0  ;;  %v2756_v17 = vmul.f32 %v5740_v9, %v5740_v9 }
 0xb5e   : > { %v2700_v29 = vpop.xlane.xlu1 %2699  ;;  %2784 = vadd.xlane.f32.xlu1 %v2783_v47 }
 0xb5f   : > { %v5752_v35 = vsub.f32 %v5658_v48, %v2722_v55  ;;  %v2727_v15 = vmul.f32 0.03125, %v2700_v29  ;;  %v2753_v36 = vmul.f32 %v5746_v8, %v5746_v8  ;;  %v2786_v44 = vsel %vm415_vm0, %v2756_v17, 0.0 }
 0xb60   : > { %2769 = vadd.xlane.f32.xlu0 %v2768_v38  ;;  %v2703_v18 = vpop.xlane.xlu0 %2702 }
 0xb61   : > { %v5758_v11 = vsub.f32 %v5664_v43, %v2727_v15  ;;  %v2728_v0 = vmul.f32 0.03125, %v2703_v18  ;;  %v2777_v63 = vsel %vm415_vm0, %v2753_v36, 0.0  ;;  %v2754_v51 = vmul.f32 %v5752_v35, %v5752_v35 }
 0xb62   : > { %v2694_v49 = vpop.xlane.xlu1 %2693  ;;  %2778 = vadd.xlane.f32.xlu1 %v2777_v63 }
 0xb63   : > { %v5763_v48 = vsub.f32 %v5676_v3, %v2728_v0  ;;  %v2725_v42 = vmul.f32 0.03125, %v2694_v49  ;;  %v2759_v45 = vmul.f32 %v5758_v11, %v5758_v11  ;;  %v2780_v53 = vsel %vm415_vm0, %v2754_v51, 0.0  ;;  %v5813_v51 = vld [vmem:[%s5961_s6] ss:$0 sm:$0xff] }
 0xb64   : > { %2787 = vadd.xlane.f32.xlu0 %v2786_v44  ;;  %v2697_v43 = vpop.xlane.xlu0 %2696 }
 0xb65   : > { %v5770_v27 = vsub.f32 %v5673_v13, %v2725_v42  ;;  %v2726_v52 = vmul.f32 0.03125, %v2697_v43  ;;  %v2795_v61 = vsel %vm415_vm0, %v2759_v45, 0.0  ;;  %v2760_v3 = vmul.f32 %v5763_v48, %v5763_v48 }
 0xb66   : > { %v2706_v7 = vpop.xlane.xlu1 %2705  ;;  %2796 = vadd.xlane.f32.xlu1 %v2795_v61 }
 0xb67   : > { %v5776_v25 = vsub.f32 %v5682_v39, %v2726_v52  ;;  %v2729_v41 = vmul.f32 0.03125, %v2706_v7  ;;  %v2757_v22 = vmul.f32 %v5770_v27, %v5770_v27  ;;  %v2798_v24 = vsel %vm415_vm0, %v2760_v3, 0.0  ;;  %v5819_v3 = vld [vmem:[%s5962_s7] ss:$0 sm:$0xff] }
 0xb68   : > { %2781 = vadd.xlane.f32.xlu0 %v2780_v53 }
 0xb69   : > { %v5782_v13 = vsub.f32 %v5691_v40, %v2729_v41  ;;  %v2789_v20 = vsel %vm415_vm0, %v2757_v22, 0.0  ;;  %v2758_v14 = vmul.f32 %v5776_v25, %v5776_v25 }
 0xb6a   : > { %v2712_v10 = vpop.xlane.xlu1 %2711  ;;  %2790 = vadd.xlane.f32.xlu1 %v2789_v20  ;;  %v2709_v5 = vpop.xlane.xlu0 %2708 }
 0xb6b   : > { %v2731_v12 = vmul.f32 0.03125, %v2712_v10  ;;  %v2730_v39 = vmul.f32 0.03125, %v2709_v5  ;;  %v2761_v50 = vmul.f32 %v5782_v13, %v5782_v13  ;;  %v2792_v30 = vsel %vm415_vm0, %v2758_v14, 0.0 }
 0xb6c   : > { %2799 = vadd.xlane.f32.xlu0 %v2798_v24 }
 0xb6d   : > { %v5791_v1 = vsub.f32 %v5696_v28, %v2731_v12  ;;  %v5794_v40 = vsub.f32 %v5703_v56, %v2730_v39  ;;  %v2801_v21 = vsel %vm415_vm0, %v2761_v50, 0.0 }
 0xb6e   : > { %2802 = vadd.xlane.f32.xlu1 %v2801_v21  ;;  %v2715_v60 = vpop.xlane.xlu0 %2714 }
 0xb6f   : > { %v2732_v4 = vmul.f32 0.03125, %v2715_v60  ;;  %v2763_v16 = vmul.f32 %v5791_v1, %v5791_v1  ;;  %v2762_v23 = vmul.f32 %v5794_v40, %v5794_v40 }
 0xb70   : > { %2793 = vadd.xlane.f32.xlu0 %v2792_v30 }
 0xb71   : > { %v5803_v28 = vsub.f32 %v5706_v19, %v2732_v4  ;;  %v2807_v56 = vsel %vm415_vm0, %v2763_v16, 0.0  ;;  %v2804_v2 = vsel %vm415_vm0, %v2762_v23, 0.0 }
 0xb72   : > { %2808 = vadd.xlane.f32.xlu1 %v2807_v56 }
 0xb73   : > { %v2764_v26 = vmul.f32 %v5803_v28, %v5803_v28 }
 0xb74   : > { %2805 = vadd.xlane.f32.xlu0 %v2804_v2 }
 0xb75   : > { %v2810_v31 = vsel %vm415_vm0, %v2764_v26, 0.0 }
 0xb78   : > { %2811 = vadd.xlane.f32.xlu0 %v2810_v31 }
 0xbdd   : > { %v2773_v33 = vpop.xlane.xlu1 %2772 }
 0xbde   : > { %v2815_v46 = vmul.f32 0.03125, %v2773_v33 }
 0xbe0   : > { %v2831_v32 = vadd.f32 1e-05, %v2815_v46 }
 0xbe1   : > { %v2767_v58 = vpop.xlane.xlu1 %2766 }
 0xbe2   : > { %3978 = vrsqrt.f32 %v2831_v32  ;;  %v2813_v59 = vmul.f32 0.03125, %v2767_v58 }
 0xbe4   : > { %v2829_v19 = vadd.f32 1e-05, %v2813_v59 }
 0xbe5   : > { %v2776_v62 = vpop.xlane.xlu0 %2775 }
 0xbe6   : > { %3980 = vrsqrt.f32 %v2829_v19  ;;  %v2816_v55 = vmul.f32 0.03125, %v2776_v62 }
 0xbe7   : > { %v2785_v47 = vpop.xlane.xlu1 %2784 }
 0xbe8   : > { %v2832_v29 = vadd.f32 1e-05, %v2816_v55  ;;  %v2819_v17 = vmul.f32 0.03125, %v2785_v47 }
 0xbe9   : > { %v2770_v15 = vpop.xlane.xlu0 %2769 }
 0xbea   : > { %3982 = vrsqrt.f32 %v2832_v29  ;;  %v2835_v38 = vadd.f32 1e-05, %v2819_v17  ;;  %v2814_v36 = vmul.f32 0.03125, %v2770_v15 }
 0xbeb   : > { %v2779_v18 = vpop.xlane.xlu1 %2778 }
 0xbec   : > { %3984 = vrsqrt.f32 %v2835_v38  ;;  %v2830_v0 = vadd.f32 1e-05, %v2814_v36  ;;  %v2817_v63 = vmul.f32 0.03125, %v2779_v18 }
 0xbed   : > { %v2788_v49 = vpop.xlane.xlu0 %2787 }
 0xbee   : > { %3986 = vrsqrt.f32 %v2830_v0  ;;  %v2833_v44 = vadd.f32 1e-05, %v2817_v63  ;;  %v2820_v42 = vmul.f32 0.03125, %v2788_v49 }
 0xbef   : > { %v3979_v45 = vpop.eup %3978  ;;  %v2797_v43 = vpop.xlane.xlu1 %2796 }
 0xbf0   : > { %v2863_v52 = vmul.f32 %v3979_v45, %v5715_v37  ;;  %3988 = vrsqrt.f32 %v2833_v44  ;;  %v2836_v61 = vadd.f32 1e-05, %v2820_v42  ;;  %v2823_v7 = vmul.f32 0.03125, %v2797_v43 }
 0xbf1   : > { %v2782_v41 = vpop.xlane.xlu0 %2781 }
 0xbf2   : > { %v2886_v53 = vmul.f32 %v5813_v51, %v2863_v52  ;;  %3990 = vrsqrt.f32 %v2836_v61  ;;  %v2839_v22 = vadd.f32 1e-05, %v2823_v7  ;;  %v2818_v20 = vmul.f32 0.03125, %v2782_v41 }
 0xbf3   : > { %v3981_v10 = vpop.eup %3980  ;;  %v2791_v5 = vpop.xlane.xlu1 %2790 }
 0xbf4   : > { %v2909_v24 = vadd.f32 %v5819_v3, %v2886_v53  ;;  %v2861_v37 = vmul.f32 %v3981_v10, %v5720_v34  ;;  %3992 = vrsqrt.f32 %v2839_v22  ;;  %v2834_v12 = vadd.f32 1e-05, %v2818_v20 }
 0xbf5   : > { %v2821_v39 = vmul.f32 0.03125, %v2791_v5  ;;  %v2800_v50 = vpop.xlane.xlu0 %2799 }
 0xbf6   : > { %2925 = vst.msk [vmem:[%s5826_s24 + $0x10] sm:$0xff] %vm415_vm0, %v2909_v24  ;;  %v2884_v14 = vmul.f32 %v5813_v51, %v2861_v37  ;;  %3994 = vrsqrt.f32 %v2834_v12  ;;  %v2824_v21 = vmul.f32 0.03125, %v2800_v50 }
 0xbf7   : > { %v3983_v60 = vpop.eup %3982  ;;  %v2837_v4 = vadd.f32 1e-05, %v2821_v39  ;;  %v2803_v30 = vpop.xlane.xlu1 %2802 }
 0xbf8   : > { %v2907_v34 = vadd.f32 %v5819_v3, %v2884_v14  ;;  %v2864_v16 = vmul.f32 %v3983_v60, %v5729_v57  ;;  %v2840_v23 = vadd.f32 1e-05, %v2824_v21  ;;  %v2825_v56 = vmul.f32 0.03125, %v2803_v30 }
 0xbf9   : > { %v3985_v2 = vpop.eup %3984  ;;  %3996 = vrsqrt.f32 %v2837_v4  ;;  %v2794_v26 = vpop.xlane.xlu0 %2793 }
 0xbfa   : > { %2923 = vst.msk [vmem:[%s5826_s24] sm:$0xff] %vm415_vm0, %v2907_v34  ;;  %v2887_v31 = vmul.f32 %v5813_v51, %v2864_v16  ;;  %v2867_v33 = vmul.f32 %v3985_v2, %v5733_v6  ;;  %3998 = vrsqrt.f32 %v2840_v23  ;;  %v2841_v46 = vadd.f32 1e-05, %v2825_v56 }
 0xbfb   : > { %v3987_v32 = vpop.eup %3986  ;;  %v2822_v58 = vmul.f32 0.03125, %v2794_v26  ;;  %v2809_v59 = vpop.xlane.xlu1 %2808 }
 0xbfc   : > { %v2910_v19 = vadd.f32 %v5819_v3, %v2887_v31  ;;  %v2890_v57 = vmul.f32 %v5813_v51, %v2867_v33  ;;  %v2862_v62 = vmul.f32 %v3987_v32, %v5726_v54  ;;  %4000 = vrsqrt.f32 %v2841_v46 }
 0xbfd   : > { %v3989_v55 = vpop.eup %3988  ;;  %v2838_v47 = vadd.f32 1e-05, %v2822_v58  ;;  %v2827_v29 = vmul.f32 0.03125, %v2809_v59  ;;  %v2806_v17 = vpop.xlane.xlu0 %2805 }
 0xbfe   : > { %2926 = vst.msk [vmem:[%s5826_s24 + $0x18] sm:$0xff] %vm415_vm0, %v2910_v19  ;;  %v2913_v6 = vadd.f32 %v5819_v3, %v2890_v57  ;;  %v2885_v15 = vmul.f32 %v5813_v51, %v2862_v62  ;;  %v2865_v38 = vmul.f32 %v3989_v55, %v5746_v8  ;;  %v2826_v36 = vmul.f32 0.03125, %v2806_v17 }
 0xbff   : > { %v3991_v18 = vpop.eup %3990  ;;  %4002 = vrsqrt.f32 %v2838_v47  ;;  %v2843_v0 = vadd.f32 1e-05, %v2827_v29 }
 0xc00   : > { %2929 = vst.msk [vmem:[%s5826_s24 + $0x30] sm:$0xff] %vm415_vm0, %v2913_v6  ;;  %v2908_v54 = vadd.f32 %v5819_v3, %v2885_v15  ;;  %v2888_v63 = vmul.f32 %v5813_v51, %v2865_v38  ;;  %v2868_v49 = vmul.f32 %v3991_v18, %v5740_v9  ;;  %v2842_v44 = vadd.f32 1e-05, %v2826_v36 }
 0xc01   : > { %v3993_v42 = vpop.eup %3992  ;;  %4004 = vrsqrt.f32 %v2843_v0  ;;  %v2812_v45 = vpop.xlane.xlu0 %2811 }
 0xc02   : > { %2924 = vst.msk [vmem:[%s5826_s24 + $0x8] sm:$0xff] %vm415_vm0, %v2908_v54  ;;  %v2911_v8 = vadd.f32 %v5819_v3, %v2888_v63  ;;  %v2891_v43 = vmul.f32 %v5813_v51, %v2868_v49  ;;  %v2871_v52 = vmul.f32 %v3993_v42, %v5758_v11  ;;  %4006 = vrsqrt.f32 %v2842_v44 }
 0xc03   : > { %v3995_v61 = vpop.eup %3994  ;;  %v2828_v7 = vmul.f32 0.03125, %v2812_v45 }
 0xc04   : > { %2927 = vst.msk [vmem:[%s5826_s24 + $0x20] sm:$0xff] %vm415_vm0, %v2911_v8  ;;  %v2914_v9 = vadd.f32 %v5819_v3, %v2891_v43  ;;  %v2894_v41 = vmul.f32 %v5813_v51, %v2871_v52  ;;  %v2866_v53 = vmul.f32 %v3995_v61, %v5752_v35 }
 0xc05   : > { %v2844_v22 = vadd.f32 1e-05, %v2828_v7 }
 0xc06   : > { %v3997_v20 = vpop.eup %3996  ;;  %2930 = vst.msk [vmem:[%s5826_s24 + $0x38] sm:$0xff] %vm415_vm0, %v2914_v9  ;;  %v2917_v10 = vadd.f32 %v5819_v3, %v2894_v41  ;;  %v2889_v11 = vmul.f32 %v5813_v51, %v2866_v53 }
 0xc07   : > { %v3999_v5 = vpop.eup %3998  ;;  %v2869_v24 = vmul.f32 %v3997_v20, %v5770_v27  ;;  %4008 = vrsqrt.f32 %v2844_v22 }
 0xc08   : > { %2933 = vst.msk [vmem:[%s5826_s24 + $0x50] sm:$0xff] %vm415_vm0, %v2917_v10  ;;  %v2912_v37 = vadd.f32 %v5819_v3, %v2889_v11  ;;  %v2872_v35 = vmul.f32 %v3999_v5, %v5763_v48 }
 0xc09   : > { %v4001_v12 = vpop.eup %4000  ;;  %v2892_v39 = vmul.f32 %v5813_v51, %v2869_v24 }
 0xc0a   : > { %2928 = vst.msk [vmem:[%s5826_s24 + $0x28] sm:$0xff] %vm415_vm0, %v2912_v37  ;;  %v2895_v50 = vmul.f32 %v5813_v51, %v2872_v35  ;;  %v2873_v14 = vmul.f32 %v4001_v12, %v5782_v13 }
 0xc0b   : > { %v2915_v27 = vadd.f32 %v5819_v3, %v2892_v39 }
 0xc0c   : > { %v4003_v21 = vpop.eup %4002  ;;  %v2918_v60 = vadd.f32 %v5819_v3, %v2895_v50  ;;  %v2896_v4 = vmul.f32 %v5813_v51, %v2873_v14 }
 0xc0d   : > { %2931 = vst.msk [vmem:[%s5826_s24 + $0x40] sm:$0xff] %vm415_vm0, %v2915_v27  ;;  %v2870_v48 = vmul.f32 %v4003_v21, %v5776_v25 }
 0xc0e   : > { %v4005_v30 = vpop.eup %4004  ;;  %2934 = vst.msk [vmem:[%s5826_s24 + $0x58] sm:$0xff] %vm415_vm0, %v2918_v60  ;;  %v2919_v34 = vadd.f32 %v5819_v3, %v2896_v4 }
 0xc0f   : > { %v4007_v13 = vpop.eup %4006  ;;  %v2893_v16 = vmul.f32 %v5813_v51, %v2870_v48  ;;  %v2875_v23 = vmul.f32 %v4005_v30, %v5791_v1 }
 0xc10   : > { %2935 = vst.msk [vmem:[%s5826_s24 + $0x60] sm:$0xff] %vm415_vm0, %v2919_v34  ;;  %v2874_v56 = vmul.f32 %v4007_v13, %v5794_v40 }
 0xc11   : > { %v2916_v25 = vadd.f32 %v5819_v3, %v2893_v16  ;;  %v2898_v2 = vmul.f32 %v5813_v51, %v2875_v23 }
 0xc12   : > { %v2897_v26 = vmul.f32 %v5813_v51, %v2874_v56 }
 0xc13   : > { %2932 = vst.msk [vmem:[%s5826_s24 + $0x48] sm:$0xff] %vm415_vm0, %v2916_v25  ;;  %v2921_v31 = vadd.f32 %v5819_v3, %v2898_v2 }
 0xc14   : > { %v4009_v33 = vpop.eup %4008  ;;  %v2920_v1 = vadd.f32 %v5819_v3, %v2897_v26 }
 0xc15   : > { %2937 = vst.msk [vmem:[%s5826_s24 + $0x70] sm:$0xff] %vm415_vm0, %v2921_v31  ;;  %v2876_v40 = vmul.f32 %v4009_v33, %v5803_v28 }
 0xc16   : > { %2936 = vst.msk [vmem:[%s5826_s24 + $0x68] sm:$0xff] %vm415_vm0, %v2920_v1 }
 0xc17   : > { %v2899_v46 = vmul.f32 %v5813_v51, %v2876_v40 }
 0xc19   : > { %v2922_v32 = vadd.f32 %v5819_v3, %v2899_v46 }
 0xc1b   : > { %2938 = vst.msk [vmem:[%s5826_s24 + $0x78] sm:$0xff] %vm415_vm0, %v2922_v32 }
 0xc1c   : > { %4161 = shalt.err (!%p4158_p10)
}
 0xc1d   : > { %s4162_s19 = scalar_lea.hbm %s5906_s23, 2048  ;;  %s4166_s21 = scalar_lea.hbm %s5963_s8, 4096 }
 0xc1e   : > { %p4163_p2 = scmp.ne.s32.totalorder %s5906_s23, %s4162_s19  ;;  %p4167_p8 = scmp.lt.s32.totalorder %s5906_s23, %s5963_s8 }
 0xc1f   : > { %p4168_p1 = scmp.lt.s32.totalorder %s4166_s21, %s4162_s19 }
 0xc20   : > { %p4164_p6 = pnand %p4163_p2, %p6131_p0 }
 0xc21   : > { %p4169_p5 = por %p4168_p1, %p4167_p8 }
 0xc22   : > { %p4165_p13 = pneg %p4164_p6 }
 0xc24   : > { %p4170_p3 = pnand %p4169_p5, %p4165_p13 }
 0xc26   : > { %4173 = shalt.err (!%p4170_p3)
}
 0xc27   : > { %s4246_s2 = smov 128   ;;  %s4247_s13 = smov 256  }
 0xc28   : > { %3634 = dma.vmem_to_hbm [thread:$0]  (%p6131_p0), %s5908_s12, 2048, %s5906_s23, %s2940_s9, %s4246_s2, %s4247_s13, %s4242_s15  }
 0xc29 PF: > { %s2967_s1 = sand.u32 1, %s4208_s27   ;;  %p6132_p4 = scmp.ne.s32.totalorder %s5999_s18, 0 }
 0xc2a   : > { %p6133_p11 = scmp.ge.s32.totalorder %s4220_s30, 2  ;;  %s2968_s26 = scalar_lea.sflag [#allocation4], %s2967_s1 }
 0xc2c   : > { %p3651_p12 = pnand %p6133_p11, %p6132_p4 }
 0xc2e   : > { %p3652_p9 = pneg %p3651_p12 }
 0xc30   : > { %4203 = dma.done.wait (%p3652_p9), %s2968_s26, 2048  }
 0xc31   : > { %4205 = vsyncadd (%p3652_p9), %s2968_s26, 4294965248  ;;  %s6134_s29 = sld [smem:[#allocation15_spill]]  ;;  %p23_p7 = scmp.ge.s32.totalorder %s4318_s11, 4  }
 0xc32   : > { %s6135_s14 = sld [smem:[#allocation16_spill]]  ;;  %s6136_s27 = smov %s4212_s28 }
 0xc33   : > { %s6139_s30 = smov %s4318_s11 }
 0xc34   :  { %25 = sbr.rel (!%p23_p7) target bundleno = 10 (0xa), region = 109 }
 0xc37   : > { %s6137_s28 = smov %s6134_s29 }
 0xc38   : > { %s6138_s29 = smov %s6135_s14 }
 0xc39   :  { %2973 = vsyncpa [#allocation3], 1 }
 0xc3a   :  { %2975 = vsyncpa [#allocation3 + $0x1], 1 }
 0xc3b   :  { %2976 = vsyncpa [#allocation6], 1 }
 0xc3c   :  { %2977 = vsyncpa [#allocation9], 1 }
 0xc3d   :  { %2978 = vsyncpa [#allocation4], 1 }
 0xc3e   :  { %2980 = vsyncpa [#allocation4 + $0x1], 1 }

</bundles_post_ra>
